<compile_context>
chip_gen: v5e
topology: v5e:2x2
jax: 0.10.0
libtpu: 0.0.40
codegen_flags: <defaults>
</compile_context>

<pallas_src>
import functools

import jax
import jax.numpy as jnp
from jax.experimental import pallas as pl
from jax.experimental.pallas import tpu as pltpu

LANE = 128
SUB = 8


def _silu(x):
    return x * jax.nn.sigmoid(x)


def _round_up(x, m):
    return ((x + m - 1) // m) * m


# ------------------------------------------------------------------ fused kernel

def gnn_fused_kernel(
    # per-batch inputs
    x_in_ref, e_in_ref, src_oh_ref, dst_oh_ref, scat_oh_ref,
    # node encoder MLP
    enw1_ref, enb1_ref, enw2_ref, enb2_ref, enw3_ref, enb3_ref,
    # edge encoder MLP
    eew1_ref, eeb1_ref, eew2_ref, eeb2_ref, eew3_ref, eeb3_ref,
    # processor edge MLP (stacked over mp_steps, step-indexed blocks)
    ew1e_ref, ew1s_ref, ew1d_ref, eb1_ref, ew2_ref, eb2_ref, ew3_ref, eb3_ref,
    # processor node MLP (stacked over mp_steps, step-indexed blocks)
    nw1x_ref, nw1a_ref, nb1_ref, nw2_ref, nb2_ref, nw3_ref, nb3_ref,
    # decoder MLP
    dw1_ref, db1_ref, dw2_ref, db2_ref, dw3_ref, db3_ref,
    # output
    out_ref,
    # VMEM scratch carried across the mp_steps grid axis
    x_sc, e_sc,
):
    s = pl.program_id(1)

    def mm(a, b):
        return jnp.dot(a, b, preferred_element_type=jnp.float32)

    def mlp3(v, w1, b1, w2, b2, w3, b3):
        h = _silu(mm(v, w1) + b1)
        h = _silu(mm(h, w2) + b2)
        return mm(h, w3) + b3

    # ---- encoders: once per batch element, at the first MP step ----
    @pl.when(s == 0)
    def _():
        x_sc[...] = mlp3(x_in_ref[0], enw1_ref[...], enb1_ref[...],
                         enw2_ref[...], enb2_ref[...], enw3_ref[...], enb3_ref[...])
        e_sc[...] = mlp3(e_in_ref[0], eew1_ref[...], eeb1_ref[...],
                         eew2_ref[...], eeb2_ref[...], eew3_ref[...], eeb3_ref[...])

    x = x_sc[...]                     # [N, HP]   current node features
    e = e_sc[...]                     # [E, HP]   current edge features

    # ---- edge model: cat([e, x[src], x[dest]]) @ W1  ==  e@W1e + OHs@(x@W1s) + OHd@(x@W1d)
    # Reassociated gather (N < E): project nodes first, then one-hot gather the projections.
    xw_s = mm(x, ew1s_ref[0])                                    # [N, HP]
    xw_d = mm(x, ew1d_ref[0])                                    # [N, HP]
    h = (mm(e, ew1e_ref[0])
         + mm(src_oh_ref[...], xw_s)                             # [E,N]@[N,HP]
         + mm(dst_oh_ref[...], xw_d)
         + eb1_ref[0])
    h = _silu(h)
    h = _silu(mm(h, ew2_ref[0]) + eb2_ref[0])
    e_new = mm(h, ew3_ref[0]) + eb3_ref[0]                       # [E, HP]

    # ---- node model: scatter_add over dest is a one-hot matmul ----
    agg = mm(scat_oh_ref[...], e_new)                            # [N,E]@[E,HP] -> [N,HP]
    h = mm(x, nw1x_ref[0]) + mm(agg, nw1a_ref[0]) + nb1_ref[0]
    h = _silu(h)
    h = _silu(mm(h, nw2_ref[0]) + nb2_ref[0])
    x_new = mm(h, nw3_ref[0]) + nb3_ref[0]                       # [N, HP]

    # ---- residual updates, kept in VMEM across MP steps (no HBM traffic) ----
    x_sc[...] = x + x_new
    e_sc[...] = e + e_new

    # ---- decoder + the only HBM store: once per batch element, at the last MP step ----
    @pl.when(s == pl.num_programs(1) - 1)
    def _():
        out = mlp3(x_sc[...], dw1_ref[...], db1_ref[...],
                   dw2_ref[...], db2_ref[...], dw3_ref[...], db3_ref[...])
        out_ref[0] = out.astype(out_ref.dtype)


# --------------------------------------------------------------- parameters

def init_linear(key, fan_in, fan_out):
    kw, kb = jax.random.split(key)
    bound = 1.0 / float(fan_in) ** 0.5
    w = jax.random.uniform(kw, (fan_in, fan_out), jnp.float32, -bound, bound)
    b = jax.random.uniform(kb, (fan_out,), jnp.float32, -bound, bound)
    return w, b


def init_mlp(key, num_layers, cin, hidden, cout):
    assert num_layers == 3, "fused kernel implements mlp_layers == 3"
    dims = [cin] + [hidden] * (num_layers - 1) + [cout]
    keys = jax.random.split(key, num_layers)
    return tuple(init_linear(keys[i], dims[i], dims[i + 1]) for i in range(num_layers))


def init_gnn(key, mlp_layers, in_node, in_edge, hidden, out_channels, mp_steps):
    keys = jax.random.split(key, 3 + 2 * mp_steps)
    params = {
        "hidden": hidden,
        "enc_node": init_mlp(keys[0], mlp_layers, in_node, hidden, hidden),
        "enc_edge": init_mlp(keys[1], mlp_layers, in_edge, hidden, hidden),
        "decoder": init_mlp(keys[2], mlp_layers, hidden, hidden, out_channels),
        "processor": [],
    }
    for s in range(mp_steps):
        edge_p = init_mlp(keys[3 + 2 * s], mlp_layers, 3 * hidden, hidden, hidden)
        node_p = init_mlp(keys[4 + 2 * s], mlp_layers, 2 * hidden, hidden, hidden)
        params["processor"].append((edge_p, node_p))
    return params


def _pad_w(w, rows, cols):
    return jnp.pad(w, ((0, rows - w.shape[0]), (0, cols - w.shape[1])))


def _pad_b(b, cols):
    return jnp.pad(b, (0, cols - b.shape[0])).reshape(1, -1)


def prepare_padded_params(params):
    """Zero-pad channel (lane) dims to multiples of 128 (encoder input rows to 8),
    split processor W1s per concat chunk, and stack per-step weights along mp_steps.

    Zero padding keeps the math exact: padded input lanes are zero, padded weight
    rows/cols and biases are zero, and SiLU(0) == 0, so padded lanes stay zero."""
    H = params["hidden"]
    HP = _round_up(H, LANE)
    assert len(params["processor"]) >= 1, "fused kernel needs mp_steps >= 1"

    def pad_mlp(mlp, in_rows, out_cols):
        (w1, b1), (w2, b2), (w3, b3) = mlp
        return {
            "w1": _pad_w(w1, in_rows, HP), "b1": _pad_b(b1, HP),
            "w2": _pad_w(w2, HP, HP), "b2": _pad_b(b2, HP),
            "w3": _pad_w(w3, HP, out_cols), "b3": _pad_b(b3, out_cols),
        }

    in_node = params["enc_node"][0][0].shape[0]
    in_edge = params["enc_edge"][0][0].shape[0]
    INP = _round_up(in_node, SUB)
    IEP = _round_up(in_edge, SUB)
    OUTP = _round_up(params["decoder"][2][0].shape[1], LANE)

    pp = {
        "enc_node": pad_mlp(params["enc_node"], INP, HP),
        "enc_edge": pad_mlp(params["enc_edge"], IEP, HP),
        "dec": pad_mlp(params["decoder"], HP, OUTP),
    }

    ew1e, ew1s, ew1d, eb1, ew2, eb2, ew3, eb3 = ([] for _ in range(8))
    nw1x, nw1a, nb1, nw2, nb2, nw3, nb3 = ([] for _ in range(7))
    for edge_p, node_p in params["processor"]:
        (we1, be1), (we2, be2), (we3, be3) = edge_p
        ew1e.append(_pad_w(we1[:H], HP, HP))          # concat order: [edge, src, dest]
        ew1s.append(_pad_w(we1[H:2 * H], HP, HP))
        ew1d.append(_pad_w(we1[2 * H:], HP, HP))
        eb1.append(_pad_b(be1, HP))
        ew2.append(_pad_w(we2, HP, HP)); eb2.append(_pad_b(be2, HP))
        ew3.append(_pad_w(we3, HP, HP)); eb3.append(_pad_b(be3, HP))

        (wn1, bn1), (wn2, bn2), (wn3, bn3) = node_p
        nw1x.append(_pad_w(wn1[:H], HP, HP))          # concat order: [x, agg]
        nw1a.append(_pad_w(wn1[H:], HP, HP))
        nb1.append(_pad_b(bn1, HP))
        nw2.append(_pad_w(wn2, HP, HP)); nb2.append(_pad_b(bn2, HP))
        nw3.append(_pad_w(wn3, HP, HP)); nb3.append(_pad_b(bn3, HP))

    st = lambda lst: jnp.stack(lst, axis=0)
    pp["proc_edge"] = {"w1e": st(ew1e), "w1s": st(ew1s), "w1d": st(ew1d), "b1": st(eb1),
                       "w2": st(ew2), "b2": st(eb2), "w3": st(ew3), "b3": st(eb3)}
    pp["proc_node"] = {"w1x": st(nw1x), "w1a": st(nw1a), "b1": st(nb1),
                       "w2": st(nw2), "b2": st(nb2), "w3": st(nw3), "b3": st(nb3)}
    return pp


# ------------------------------------------------------------------ forward

@functools.partial(jax.jit, static_argnums=(4,))
def gnn_forward(pp, x, edge_index, edge_attr, out_channels):
    B, N, in_node = x.shape
    E, in_edge = edge_attr.shape[1], edge_attr.shape[2]

    INP = pp["enc_node"]["w1"].shape[0]
    IEP = pp["enc_edge"]["w1"].shape[0]
    HP = pp["dec"]["w1"].shape[0]
    OUTP = pp["dec"]["w3"].shape[1]
    S = pp["proc_edge"]["w1e"].shape[0]          # mp_steps (static from shape)

    # Zero-pad raw input channels (exactness preserved: padded weight rows are zero).
    x_in = jnp.pad(x.astype(jnp.float32), ((0, 0), (0, 0), (0, INP - in_node)))
    e_in = jnp.pad(edge_attr.astype(jnp.float32), ((0, 0), (0, 0), (0, IEP - in_edge)))

    # Gather/scatter selectors: built once per forward, DMA'd once per core (constant
    # block index), shared by all MP steps.
    src, dest = edge_index[0], edge_index[1]
    src_oh = jax.nn.one_hot(src, N, dtype=jnp.float32)      # [E, N]  gather x[:, src]
    dst_oh = jax.nn.one_hot(dest, N, dtype=jnp.float32)     # [E, N]  gather x[:, dest]
    scat_oh = dst_oh.T                                       # [N, E]  scatter_add over dest

    rep2 = lambda shape: pl.BlockSpec(shape, lambda b, s: (0, 0))
    step_w = pl.BlockSpec((1, HP, HP), lambda b, s: (s, 0, 0))
    step_b = pl.BlockSpec((1, 1, HP), lambda b, s: (s, 0, 0))

    def mlp_specs(in_rows, out_cols):
        return [rep2((in_rows, HP)), rep2((1, HP)),
                rep2((HP, HP)), rep2((1, HP)),
                rep2((HP, out_cols)), rep2((1, out_cols))]

    in_specs = (
        [pl.BlockSpec((1, N, INP), lambda b, s: (b, 0, 0)),
         pl.BlockSpec((1, E, IEP), lambda b, s: (b, 0, 0)),
         rep2((E, N)), rep2((E, N)), rep2((N, E))]
        + mlp_specs(INP, HP)                                   # node encoder
        + mlp_specs(IEP, HP)                                   # edge encoder
        + [step_w, step_w, step_w, step_b, step_w, step_b, step_w, step_b]   # edge MLP / step
        + [step_w, step_w, step_b, step_w, step_b, step_w, step_b]           # node MLP / step
        + mlp_specs(HP, OUTP)                                  # decoder
    )

    en, ee, dd = pp["enc_node"], pp["enc_edge"], pp["dec"]
    pe, pn = pp["proc_edge"], pp["proc_node"]

    out = pl.pallas_call(
        gnn_fused_kernel,
        out_shape=jax.ShapeDtypeStruct((B, N, OUTP), jnp.float32),
        grid=(B, S),
        in_specs=in_specs,
        out_specs=pl.BlockSpec((1, N, OUTP), lambda b, s: (b, 0, 0)),
        scratch_shapes=[pltpu.VMEM((N, HP), jnp.float32),      # carried node features
                        pltpu.VMEM((E, HP), jnp.float32)],     # carried edge features
        compiler_params=pltpu.CompilerParams(
            dimension_semantics=("parallel", "arbitrary")),
    )(x_in, e_in, src_oh, dst_oh, scat_oh,
      en["w1"], en["b1"], en["w2"], en["b2"], en["w3"], en["b3"],
      ee["w1"], ee["b1"], ee["w2"], ee["b2"], ee["w3"], ee["b3"],
      pe["w1e"], pe["w1s"], pe["w1d"], pe["b1"], pe["w2"], pe["b2"], pe["w3"], pe["b3"],
      pn["w1x"], pn["w1a"], pn["b1"], pn["w2"], pn["b2"], pn["w3"], pn["b3"],
      dd["w1"], dd["b1"], dd["w2"], dd["b2"], dd["w3"], dd["b3"])

    return out[:, :, :out_channels]


# ---------------------------------------------------------- pure-JAX reference

def _mlp3_ref(x, params):
    (w1, b1), (w2, b2), (w3, b3) = params
    h = _silu(x @ w1 + b1)
    h = _silu(h @ w2 + b2)
    return h @ w3 + b3


def gnn_ref(params, x, edge_index, edge_attr):
    B, N, _ = x.shape
    H = params["hidden"]
    src, dest = edge_index[0], edge_index[1]
    x = _mlp3_ref(x, params["enc_node"])
    edge_attr = _mlp3_ref(edge_attr, params["enc_edge"])
    for edge_p, node_p in params["processor"]:
        e_in = jnp.concatenate([edge_attr, x[:, src], x[:, dest]], axis=2)
        edge_new = _mlp3_ref(e_in, edge_p)
        agg = jnp.zeros((B, N, H), jnp.float32).at[:, dest, :].add(edge_new)
        x_new = _mlp3_ref(jnp.concatenate([x, agg], axis=2), node_p)
        x = x + x_new
        edge_attr = edge_attr + edge_new
    return _mlp3_ref(x, params["decoder"])


# ----------------------------------------------------------------------- main

if __name__ == "__main__":
    # args: mlp_layers=3, in_node=6, in_edge=4, hidden_channels=32,
    #       out_channels=3, mp_steps=2
    MLP_LAYERS, IN_NODE, IN_EDGE, HIDDEN, OUT, MP_STEPS = 3, 6, 4, 32, 3, 2
    B, N, E = 2, 16, 32   # (batch_size-1, n_nodes, n_edges)

    key = jax.random.PRNGKey(0)
    kp, kx, ke, ki = jax.random.split(key, 4)

    params = init_gnn(kp, MLP_LAYERS, IN_NODE, IN_EDGE, HIDDEN, OUT, MP_STEPS)
    pparams = prepare_padded_params(params)

    x = jax.random.normal(kx, (B, N, IN_NODE), jnp.float32)
    edge_attr = jax.random.normal(ke, (B, E, IN_EDGE), jnp.float32)
    edge_index = jax.random.randint(ki, (2, E), 0, N, dtype=jnp.int32)

    out = jax.block_until_ready(gnn_forward(pparams, x, edge_index, edge_attr, OUT))
    ref = jax.block_until_ready(gnn_ref(params, x, edge_index, edge_attr))

    assert out.shape == (B, N, OUT)
    assert jnp.allclose(out, ref, rtol=1e-4, atol=1e-4), "mismatch vs pure-JAX reference"
    print("KERNEL_OK")
</pallas_src>

<mosaic_0001>
module attributes {stable_mosaic.version = 11 : i64} {
  func.func @gnn_fused_kernel(%arg0: i32, %arg1: i32, %arg2: memref<1x16x8xf32, #tpu.memory_space<vmem>>, %arg3: memref<1x32x8xf32, #tpu.memory_space<vmem>>, %arg4: memref<32x16xf32, #tpu.memory_space<vmem>>, %arg5: memref<32x16xf32, #tpu.memory_space<vmem>>, %arg6: memref<16x32xf32, #tpu.memory_space<vmem>>, %arg7: memref<8x128xf32, #tpu.memory_space<vmem>>, %arg8: memref<1x128xf32, #tpu.memory_space<vmem>>, %arg9: memref<128x128xf32, #tpu.memory_space<vmem>>, %arg10: memref<1x128xf32, #tpu.memory_space<vmem>>, %arg11: memref<128x128xf32, #tpu.memory_space<vmem>>, %arg12: memref<1x128xf32, #tpu.memory_space<vmem>>, %arg13: memref<8x128xf32, #tpu.memory_space<vmem>>, %arg14: memref<1x128xf32, #tpu.memory_space<vmem>>, %arg15: memref<128x128xf32, #tpu.memory_space<vmem>>, %arg16: memref<1x128xf32, #tpu.memory_space<vmem>>, %arg17: memref<128x128xf32, #tpu.memory_space<vmem>>, %arg18: memref<1x128xf32, #tpu.memory_space<vmem>>, %arg19: memref<1x128x128xf32, #tpu.memory_space<vmem>>, %arg20: memref<1x128x128xf32, #tpu.memory_space<vmem>>, %arg21: memref<1x128x128xf32, #tpu.memory_space<vmem>>, %arg22: memref<1x1x128xf32, #tpu.memory_space<vmem>>, %arg23: memref<1x128x128xf32, #tpu.memory_space<vmem>>, %arg24: memref<1x1x128xf32, #tpu.memory_space<vmem>>, %arg25: memref<1x128x128xf32, #tpu.memory_space<vmem>>, %arg26: memref<1x1x128xf32, #tpu.memory_space<vmem>>, %arg27: memref<1x128x128xf32, #tpu.memory_space<vmem>>, %arg28: memref<1x128x128xf32, #tpu.memory_space<vmem>>, %arg29: memref<1x1x128xf32, #tpu.memory_space<vmem>>, %arg30: memref<1x128x128xf32, #tpu.memory_space<vmem>>, %arg31: memref<1x1x128xf32, #tpu.memory_space<vmem>>, %arg32: memref<1x128x128xf32, #tpu.memory_space<vmem>>, %arg33: memref<1x1x128xf32, #tpu.memory_space<vmem>>, %arg34: memref<128x128xf32, #tpu.memory_space<vmem>>, %arg35: memref<1x128xf32, #tpu.memory_space<vmem>>, %arg36: memref<128x128xf32, #tpu.memory_space<vmem>>, %arg37: memref<1x128xf32, #tpu.memory_space<vmem>>, %arg38: memref<128x128xf32, #tpu.memory_space<vmem>>, %arg39: memref<1x128xf32, #tpu.memory_space<vmem>>, %arg40: memref<1x16x128xf32, #tpu.memory_space<vmem>>, %arg41: memref<16x128xf32, #tpu.memory_space<vmem>>, %arg42: memref<32x128xf32, #tpu.memory_space<vmem>>) attributes {dimension_semantics = [#tpu.dimension_semantics<parallel>, #tpu.dimension_semantics<arbitrary>], iteration_bounds = array<i64: 2, 2>, scalar_prefetch = 0 : i64, scratch_operands = 2 : i64, tpu.core_type = #tpu.core_type<tc>, window_params = [{transform_indices = @transform_0, window_bounds = array<i64: 1, 16, 8>}, {transform_indices = @transform_1, window_bounds = array<i64: 1, 32, 8>}, {pipeline_mode = #tpu.pipeline_mode<synchronous>, transform_indices = @transform_2, window_bounds = array<i64: 32, 16>}, {pipeline_mode = #tpu.pipeline_mode<synchronous>, transform_indices = @transform_3, window_bounds = array<i64: 32, 16>}, {pipeline_mode = #tpu.pipeline_mode<synchronous>, transform_indices = @transform_4, window_bounds = array<i64: 16, 32>}, {pipeline_mode = #tpu.pipeline_mode<synchronous>, transform_indices = @transform_5, window_bounds = array<i64: 8, 128>}, {pipeline_mode = #tpu.pipeline_mode<synchronous>, transform_indices = @transform_6, window_bounds = array<i64: 1, 128>}, {pipeline_mode = #tpu.pipeline_mode<synchronous>, transform_indices = @transform_7, window_bounds = array<i64: 128, 128>}, {pipeline_mode = #tpu.pipeline_mode<synchronous>, transform_indices = @transform_8, window_bounds = array<i64: 1, 128>}, {pipeline_mode = #tpu.pipeline_mode<synchronous>, transform_indices = @transform_9, window_bounds = array<i64: 128, 128>}, {pipeline_mode = #tpu.pipeline_mode<synchronous>, transform_indices = @transform_10, window_bounds = array<i64: 1, 128>}, {pipeline_mode = #tpu.pipeline_mode<synchronous>, transform_indices = @transform_11, window_bounds = array<i64: 8, 128>}, {pipeline_mode = #tpu.pipeline_mode<synchronous>, transform_indices = @transform_12, window_bounds = array<i64: 1, 128>}, {pipeline_mode = #tpu.pipeline_mode<synchronous>, transform_indices = @transform_13, window_bounds = array<i64: 128, 128>}, {pipeline_mode = #tpu.pipeline_mode<synchronous>, transform_indices = @transform_14, window_bounds = array<i64: 1, 128>}, {pipeline_mode = #tpu.pipeline_mode<synchronous>, transform_indices = @transform_15, window_bounds = array<i64: 128, 128>}, {pipeline_mode = #tpu.pipeline_mode<synchronous>, transform_indices = @transform_16, window_bounds = array<i64: 1, 128>}, {transform_indices = @transform_17, window_bounds = array<i64: 1, 128, 128>}, {transform_indices = @transform_18, window_bounds = array<i64: 1, 128, 128>}, {transform_indices = @transform_19, window_bounds = array<i64: 1, 128, 128>}, {transform_indices = @transform_20, window_bounds = array<i64: 1, 1, 128>}, {transform_indices = @transform_21, window_bounds = array<i64: 1, 128, 128>}, {transform_indices = @transform_22, window_bounds = array<i64: 1, 1, 128>}, {transform_indices = @transform_23, window_bounds = array<i64: 1, 128, 128>}, {transform_indices = @transform_24, window_bounds = array<i64: 1, 1, 128>}, {transform_indices = @transform_25, window_bounds = array<i64: 1, 128, 128>}, {transform_indices = @transform_26, window_bounds = array<i64: 1, 128, 128>}, {transform_indices = @transform_27, window_bounds = array<i64: 1, 1, 128>}, {transform_indices = @transform_28, window_bounds = array<i64: 1, 128, 128>}, {transform_indices = @transform_29, window_bounds = array<i64: 1, 1, 128>}, {transform_indices = @transform_30, window_bounds = array<i64: 1, 128, 128>}, {transform_indices = @transform_31, window_bounds = array<i64: 1, 1, 128>}, {pipeline_mode = #tpu.pipeline_mode<synchronous>, transform_indices = @transform_32, window_bounds = array<i64: 128, 128>}, {pipeline_mode = #tpu.pipeline_mode<synchronous>, transform_indices = @transform_33, window_bounds = array<i64: 1, 128>}, {pipeline_mode = #tpu.pipeline_mode<synchronous>, transform_indices = @transform_34, window_bounds = array<i64: 128, 128>}, {pipeline_mode = #tpu.pipeline_mode<synchronous>, transform_indices = @transform_35, window_bounds = array<i64: 1, 128>}, {pipeline_mode = #tpu.pipeline_mode<synchronous>, transform_indices = @transform_36, window_bounds = array<i64: 128, 128>}, {pipeline_mode = #tpu.pipeline_mode<synchronous>, transform_indices = @transform_37, window_bounds = array<i64: 1, 128>}, {transform_indices = @transform_38, window_bounds = array<i64: 1, 16, 128>}]} {
    %c0_i32 = arith.constant 0 : i32
    %0 = arith.cmpi eq, %arg1, %c0_i32 : i32
    %1 = arith.extui %0 : i1 to i32
    %c0_i32_0 = arith.constant 0 : i32
    %2 = arith.cmpi ne, %1, %c0_i32_0 : i32
    scf.if %2 {
      %c0_75 = arith.constant 0 : index
      %c0_76 = arith.constant 0 : index
      %c0_77 = arith.constant 0 : index
      %96 = vector.load %arg2[%c0_75, %c0_76, %c0_77] : memref<1x16x8xf32, #tpu.memory_space<vmem>>, vector<1x16x8xf32>
      %97 = vector.shape_cast %96 : vector<1x16x8xf32> to vector<16x8xf32>
      %c0_78 = arith.constant 0 : index
      %c0_79 = arith.constant 0 : index
      %98 = vector.load %arg7[%c0_78, %c0_79] : memref<8x128xf32, #tpu.memory_space<vmem>>, vector<8x128xf32>
      %c0_80 = arith.constant 0 : index
      %c0_81 = arith.constant 0 : index
      %99 = vector.load %arg8[%c0_80, %c0_81] : memref<1x128xf32, #tpu.memory_space<vmem>>, vector<1x128xf32>
      %c0_82 = arith.constant 0 : index
      %c0_83 = arith.constant 0 : index
      %100 = vector.load %arg9[%c0_82, %c0_83] : memref<128x128xf32, #tpu.memory_space<vmem>>, vector<128x128xf32>
      %c0_84 = arith.constant 0 : index
      %c0_85 = arith.constant 0 : index
      %101 = vector.load %arg10[%c0_84, %c0_85] : memref<1x128xf32, #tpu.memory_space<vmem>>, vector<1x128xf32>
      %c0_86 = arith.constant 0 : index
      %c0_87 = arith.constant 0 : index
      %102 = vector.load %arg11[%c0_86, %c0_87] : memref<128x128xf32, #tpu.memory_space<vmem>>, vector<128x128xf32>
      %c0_88 = arith.constant 0 : index
      %c0_89 = arith.constant 0 : index
      %103 = vector.load %arg12[%c0_88, %c0_89] : memref<1x128xf32, #tpu.memory_space<vmem>>, vector<1x128xf32>
      %cst_90 = arith.constant dense<0.000000e+00> : vector<16x128xf32>
      %104 = tpu.matmul %97, %98, %cst_90 {dimension_numbers = #tpu.dot_dimension_numbers<[1], [0], [0], [1], [0, 0, 1, 1], [], []>} : vector<16x8xf32>, vector<8x128xf32>, vector<16x128xf32> -> vector<16x128xf32>
      %105 = vector.broadcast %99 : vector<1x128xf32> to vector<16x128xf32>
      %106 = arith.addf %104, %105 : vector<16x128xf32>
      %107 = arith.negf %106 : vector<16x128xf32>
      %108 = math.exp %107 : vector<16x128xf32>
      %cst_91 = arith.constant 1.000000e+00 : f32
      %109 = vector.broadcast %cst_91 : f32 to vector<16x128xf32>
      %110 = arith.addf %109, %108 : vector<16x128xf32>
      %111 = arith.divf %109, %110 : vector<16x128xf32>
      %112 = arith.mulf %106, %111 : vector<16x128xf32>
      %cst_92 = arith.constant dense<0.000000e+00> : vector<16x128xf32>
      %113 = tpu.matmul %112, %100, %cst_92 {dimension_numbers = #tpu.dot_dimension_numbers<[1], [0], [0], [1], [0, 0, 1, 1], [], []>} : vector<16x128xf32>, vector<128x128xf32>, vector<16x128xf32> -> vector<16x128xf32>
      %114 = vector.broadcast %101 : vector<1x128xf32> to vector<16x128xf32>
      %115 = arith.addf %113, %114 : vector<16x128xf32>
      %116 = arith.negf %115 : vector<16x128xf32>
      %117 = math.exp %116 : vector<16x128xf32>
      %cst_93 = arith.constant 1.000000e+00 : f32
      %118 = vector.broadcast %cst_93 : f32 to vector<16x128xf32>
      %119 = arith.addf %118, %117 : vector<16x128xf32>
      %120 = arith.divf %118, %119 : vector<16x128xf32>
      %121 = arith.mulf %115, %120 : vector<16x128xf32>
      %cst_94 = arith.constant dense<0.000000e+00> : vector<16x128xf32>
      %122 = tpu.matmul %121, %102, %cst_94 {dimension_numbers = #tpu.dot_dimension_numbers<[1], [0], [0], [1], [0, 0, 1, 1], [], []>} : vector<16x128xf32>, vector<128x128xf32>, vector<16x128xf32> -> vector<16x128xf32>
      %123 = vector.broadcast %103 : vector<1x128xf32> to vector<16x128xf32>
      %124 = arith.addf %122, %123 : vector<16x128xf32>
      %c0_95 = arith.constant 0 : index
      %c0_96 = arith.constant 0 : index
      %125 = vector.load %arg41[%c0_95, %c0_96] : memref<16x128xf32, #tpu.memory_space<vmem>>, vector<16x128xf32>
      tpu.vector_store %arg41[%c0_95, %c0_96], %124 {strides = array<i32>} : memref<16x128xf32, #tpu.memory_space<vmem>>, vector<16x128xf32>,
      %c0_97 = arith.constant 0 : index
      %c0_98 = arith.constant 0 : index
      %c0_99 = arith.constant 0 : index
      %126 = vector.load %arg3[%c0_97, %c0_98, %c0_99] : memref<1x32x8xf32, #tpu.memory_space<vmem>>, vector<1x32x8xf32>
      %127 = vector.shape_cast %126 : vector<1x32x8xf32> to vector<32x8xf32>
      %c0_100 = arith.constant 0 : index
      %c0_101 = arith.constant 0 : index
      %128 = vector.load %arg13[%c0_100, %c0_101] : memref<8x128xf32, #tpu.memory_space<vmem>>, vector<8x128xf32>
      %c0_102 = arith.constant 0 : index
      %c0_103 = arith.constant 0 : index
      %129 = vector.load %arg14[%c0_102, %c0_103] : memref<1x128xf32, #tpu.memory_space<vmem>>, vector<1x128xf32>
      %c0_104 = arith.constant 0 : index
      %c0_105 = arith.constant 0 : index
      %130 = vector.load %arg15[%c0_104, %c0_105] : memref<128x128xf32, #tpu.memory_space<vmem>>, vector<128x128xf32>
      %c0_106 = arith.constant 0 : index
      %c0_107 = arith.constant 0 : index
      %131 = vector.load %arg16[%c0_106, %c0_107] : memref<1x128xf32, #tpu.memory_space<vmem>>, vector<1x128xf32>
      %c0_108 = arith.constant 0 : index
      %c0_109 = arith.constant 0 : index
      %132 = vector.load %arg17[%c0_108, %c0_109] : memref<128x128xf32, #tpu.memory_space<vmem>>, vector<128x128xf32>
      %c0_110 = arith.constant 0 : index
      %c0_111 = arith.constant 0 : index
      %133 = vector.load %arg18[%c0_110, %c0_111] : memref<1x128xf32, #tpu.memory_space<vmem>>, vector<1x128xf32>
      %cst_112 = arith.constant dense<0.000000e+00> : vector<32x128xf32>
      %134 = tpu.matmul %127, %128, %cst_112 {dimension_numbers = #tpu.dot_dimension_numbers<[1], [0], [0], [1], [0, 0, 1, 1], [], []>} : vector<32x8xf32>, vector<8x128xf32>, vector<32x128xf32> -> vector<32x128xf32>
      %135 = vector.broadcast %129 : vector<1x128xf32> to vector<32x128xf32>
      %136 = arith.addf %134, %135 : vector<32x128xf32>
      %137 = arith.negf %136 : vector<32x128xf32>
      %138 = math.exp %137 : vector<32x128xf32>
      %cst_113 = arith.constant 1.000000e+00 : f32
      %139 = vector.broadcast %cst_113 : f32 to vector<32x128xf32>
      %140 = arith.addf %139, %138 : vector<32x128xf32>
      %141 = arith.divf %139, %140 : vector<32x128xf32>
      %142 = arith.mulf %136, %141 : vector<32x128xf32>
      %cst_114 = arith.constant dense<0.000000e+00> : vector<32x128xf32>
      %143 = tpu.matmul %142, %130, %cst_114 {dimension_numbers = #tpu.dot_dimension_numbers<[1], [0], [0], [1], [0, 0, 1, 1], [], []>} : vector<32x128xf32>, vector<128x128xf32>, vector<32x128xf32> -> vector<32x128xf32>
      %144 = vector.broadcast %131 : vector<1x128xf32> to vector<32x128xf32>
      %145 = arith.addf %143, %144 : vector<32x128xf32>
      %146 = arith.negf %145 : vector<32x128xf32>
      %147 = math.exp %146 : vector<32x128xf32>
      %cst_115 = arith.constant 1.000000e+00 : f32
      %148 = vector.broadcast %cst_115 : f32 to vector<32x128xf32>
      %149 = arith.addf %148, %147 : vector<32x128xf32>
      %150 = arith.divf %148, %149 : vector<32x128xf32>
      %151 = arith.mulf %145, %150 : vector<32x128xf32>
      %cst_116 = arith.constant dense<0.000000e+00> : vector<32x128xf32>
      %152 = tpu.matmul %151, %132, %cst_116 {dimension_numbers = #tpu.dot_dimension_numbers<[1], [0], [0], [1], [0, 0, 1, 1], [], []>} : vector<32x128xf32>, vector<128x128xf32>, vector<32x128xf32> -> vector<32x128xf32>
      %153 = vector.broadcast %133 : vector<1x128xf32> to vector<32x128xf32>
      %154 = arith.addf %152, %153 : vector<32x128xf32>
      %c0_117 = arith.constant 0 : index
      %c0_118 = arith.constant 0 : index
      %155 = vector.load %arg42[%c0_117, %c0_118] : memref<32x128xf32, #tpu.memory_space<vmem>>, vector<32x128xf32>
      tpu.vector_store %arg42[%c0_117, %c0_118], %154 {strides = array<i32>} : memref<32x128xf32, #tpu.memory_space<vmem>>, vector<32x128xf32>,
    } else {
    }
    %c0 = arith.constant 0 : index
    %c0_1 = arith.constant 0 : index
    %3 = vector.load %arg41[%c0, %c0_1] : memref<16x128xf32, #tpu.memory_space<vmem>>, vector<16x128xf32>
    %c0_2 = arith.constant 0 : index
    %c0_3 = arith.constant 0 : index
    %4 = vector.load %arg42[%c0_2, %c0_3] : memref<32x128xf32, #tpu.memory_space<vmem>>, vector<32x128xf32>
    %c0_4 = arith.constant 0 : index
    %c0_5 = arith.constant 0 : index
    %c0_6 = arith.constant 0 : index
    %5 = vector.load %arg20[%c0_4, %c0_5, %c0_6] : memref<1x128x128xf32, #tpu.memory_space<vmem>>, vector<1x128x128xf32>
    %6 = vector.shape_cast %5 : vector<1x128x128xf32> to vector<128x128xf32>
    %cst = arith.constant dense<0.000000e+00> : vector<16x128xf32>
    %7 = tpu.matmul %3, %6, %cst {dimension_numbers = #tpu.dot_dimension_numbers<[1], [0], [0], [1], [0, 0, 1, 1], [], []>} : vector<16x128xf32>, vector<128x128xf32>, vector<16x128xf32> -> vector<16x128xf32>
    %c0_7 = arith.constant 0 : index
    %c0_8 = arith.constant 0 : index
    %c0_9 = arith.constant 0 : index
    %8 = vector.load %arg21[%c0_7, %c0_8, %c0_9] : memref<1x128x128xf32, #tpu.memory_space<vmem>>, vector<1x128x128xf32>
    %9 = vector.shape_cast %8 : vector<1x128x128xf32> to vector<128x128xf32>
    %cst_10 = arith.constant dense<0.000000e+00> : vector<16x128xf32>
    %10 = tpu.matmul %3, %9, %cst_10 {dimension_numbers = #tpu.dot_dimension_numbers<[1], [0], [0], [1], [0, 0, 1, 1], [], []>} : vector<16x128xf32>, vector<128x128xf32>, vector<16x128xf32> -> vector<16x128xf32>
    %c0_11 = arith.constant 0 : index
    %c0_12 = arith.constant 0 : index
    %c0_13 = arith.constant 0 : index
    %11 = vector.load %arg19[%c0_11, %c0_12, %c0_13] : memref<1x128x128xf32, #tpu.memory_space<vmem>>, vector<1x128x128xf32>
    %12 = vector.shape_cast %11 : vector<1x128x128xf32> to vector<128x128xf32>
    %cst_14 = arith.constant dense<0.000000e+00> : vector<32x128xf32>
    %13 = tpu.matmul %4, %12, %cst_14 {dimension_numbers = #tpu.dot_dimension_numbers<[1], [0], [0], [1], [0, 0, 1, 1], [], []>} : vector<32x128xf32>, vector<128x128xf32>, vector<32x128xf32> -> vector<32x128xf32>
    %c0_15 = arith.constant 0 : index
    %c0_16 = arith.constant 0 : index
    %14 = vector.load %arg4[%c0_15, %c0_16] : memref<32x16xf32, #tpu.memory_space<vmem>>, vector<32x16xf32>
    %cst_17 = arith.constant dense<0.000000e+00> : vector<32x128xf32>
    %15 = tpu.matmul %14, %7, %cst_17 {dimension_numbers = #tpu.dot_dimension_numbers<[1], [0], [0], [1], [0, 0, 1, 1], [], []>} : vector<32x16xf32>, vector<16x128xf32>, vector<32x128xf32> -> vector<32x128xf32>
    %16 = arith.addf %13, %15 : vector<32x128xf32>
    %c0_18 = arith.constant 0 : index
    %c0_19 = arith.constant 0 : index
    %17 = vector.load %arg5[%c0_18, %c0_19] : memref<32x16xf32, #tpu.memory_space<vmem>>, vector<32x16xf32>
    %cst_20 = arith.constant dense<0.000000e+00> : vector<32x128xf32>
    %18 = tpu.matmul %17, %10, %cst_20 {dimension_numbers = #tpu.dot_dimension_numbers<[1], [0], [0], [1], [0, 0, 1, 1], [], []>} : vector<32x16xf32>, vector<16x128xf32>, vector<32x128xf32> -> vector<32x128xf32>
    %19 = arith.addf %16, %18 : vector<32x128xf32>
    %c0_21 = arith.constant 0 : index
    %c0_22 = arith.constant 0 : index
    %c0_23 = arith.constant 0 : index
    %20 = vector.load %arg22[%c0_21, %c0_22, %c0_23] : memref<1x1x128xf32, #tpu.memory_space<vmem>>, vector<1x1x128xf32>
    %21 = vector.shape_cast %20 : vector<1x1x128xf32> to vector<1x128xf32>
    %22 = vector.broadcast %21 : vector<1x128xf32> to vector<32x128xf32>
    %23 = arith.addf %19, %22 : vector<32x128xf32>
    %24 = arith.negf %23 : vector<32x128xf32>
    %25 = math.exp %24 : vector<32x128xf32>
    %cst_24 = arith.constant 1.000000e+00 : f32
    %26 = vector.broadcast %cst_24 : f32 to vector<32x128xf32>
    %27 = arith.addf %26, %25 : vector<32x128xf32>
    %28 = arith.divf %26, %27 : vector<32x128xf32>
    %29 = arith.mulf %23, %28 : vector<32x128xf32>
    %c0_25 = arith.constant 0 : index
    %c0_26 = arith.constant 0 : index
    %c0_27 = arith.constant 0 : index
    %30 = vector.load %arg23[%c0_25, %c0_26, %c0_27] : memref<1x128x128xf32, #tpu.memory_space<vmem>>, vector<1x128x128xf32>
    %31 = vector.shape_cast %30 : vector<1x128x128xf32> to vector<128x128xf32>
    %cst_28 = arith.constant dense<0.000000e+00> : vector<32x128xf32>
    %32 = tpu.matmul %29, %31, %cst_28 {dimension_numbers = #tpu.dot_dimension_numbers<[1], [0], [0], [1], [0, 0, 1, 1], [], []>} : vector<32x128xf32>, vector<128x128xf32>, vector<32x128xf32> -> vector<32x128xf32>
    %c0_29 = arith.constant 0 : index
    %c0_30 = arith.constant 0 : index
    %c0_31 = arith.constant 0 : index
    %33 = vector.load %arg24[%c0_29, %c0_30, %c0_31] : memref<1x1x128xf32, #tpu.memory_space<vmem>>, vector<1x1x128xf32>
    %34 = vector.shape_cast %33 : vector<1x1x128xf32> to vector<1x128xf32>
    %35 = vector.broadcast %34 : vector<1x128xf32> to vector<32x128xf32>
    %36 = arith.addf %32, %35 : vector<32x128xf32>
    %37 = arith.negf %36 : vector<32x128xf32>
    %38 = math.exp %37 : vector<32x128xf32>
    %cst_32 = arith.constant 1.000000e+00 : f32
    %39 = vector.broadcast %cst_32 : f32 to vector<32x128xf32>
    %40 = arith.addf %39, %38 : vector<32x128xf32>
    %41 = arith.divf %39, %40 : vector<32x128xf32>
    %42 = arith.mulf %36, %41 : vector<32x128xf32>
    %c0_33 = arith.constant 0 : index
    %c0_34 = arith.constant 0 : index
    %c0_35 = arith.constant 0 : index
    %43 = vector.load %arg25[%c0_33, %c0_34, %c0_35] : memref<1x128x128xf32, #tpu.memory_space<vmem>>, vector<1x128x128xf32>
    %44 = vector.shape_cast %43 : vector<1x128x128xf32> to vector<128x128xf32>
    %cst_36 = arith.constant dense<0.000000e+00> : vector<32x128xf32>
    %45 = tpu.matmul %42, %44, %cst_36 {dimension_numbers = #tpu.dot_dimension_numbers<[1], [0], [0], [1], [0, 0, 1, 1], [], []>} : vector<32x128xf32>, vector<128x128xf32>, vector<32x128xf32> -> vector<32x128xf32>
    %c0_37 = arith.constant 0 : index
    %c0_38 = arith.constant 0 : index
    %c0_39 = arith.constant 0 : index
    %46 = vector.load %arg26[%c0_37, %c0_38, %c0_39] : memref<1x1x128xf32, #tpu.memory_space<vmem>>, vector<1x1x128xf32>
    %47 = vector.shape_cast %46 : vector<1x1x128xf32> to vector<1x128xf32>
    %48 = vector.broadcast %47 : vector<1x128xf32> to vector<32x128xf32>
    %49 = arith.addf %45, %48 : vector<32x128xf32>
    %c0_40 = arith.constant 0 : index
    %c0_41 = arith.constant 0 : index
    %50 = vector.load %arg6[%c0_40, %c0_41] : memref<16x32xf32, #tpu.memory_space<vmem>>, vector<16x32xf32>
    %cst_42 = arith.constant dense<0.000000e+00> : vector<16x128xf32>
    %51 = tpu.matmul %50, %49, %cst_42 {dimension_numbers = #tpu.dot_dimension_numbers<[1], [0], [0], [1], [0, 0, 1, 1], [], []>} : vector<16x32xf32>, vector<32x128xf32>, vector<16x128xf32> -> vector<16x128xf32>
    %c0_43 = arith.constant 0 : index
    %c0_44 = arith.constant 0 : index
    %c0_45 = arith.constant 0 : index
    %52 = vector.load %arg27[%c0_43, %c0_44, %c0_45] : memref<1x128x128xf32, #tpu.memory_space<vmem>>, vector<1x128x128xf32>
    %53 = vector.shape_cast %52 : vector<1x128x128xf32> to vector<128x128xf32>
    %cst_46 = arith.constant dense<0.000000e+00> : vector<16x128xf32>
    %54 = tpu.matmul %3, %53, %cst_46 {dimension_numbers = #tpu.dot_dimension_numbers<[1], [0], [0], [1], [0, 0, 1, 1], [], []>} : vector<16x128xf32>, vector<128x128xf32>, vector<16x128xf32> -> vector<16x128xf32>
    %c0_47 = arith.constant 0 : index
    %c0_48 = arith.constant 0 : index
    %c0_49 = arith.constant 0 : index
    %55 = vector.load %arg28[%c0_47, %c0_48, %c0_49] : memref<1x128x128xf32, #tpu.memory_space<vmem>>, vector<1x128x128xf32>
    %56 = vector.shape_cast %55 : vector<1x128x128xf32> to vector<128x128xf32>
    %cst_50 = arith.constant dense<0.000000e+00> : vector<16x128xf32>
    %57 = tpu.matmul %51, %56, %cst_50 {dimension_numbers = #tpu.dot_dimension_numbers<[1], [0], [0], [1], [0, 0, 1, 1], [], []>} : vector<16x128xf32>, vector<128x128xf32>, vector<16x128xf32> -> vector<16x128xf32>
    %58 = arith.addf %54, %57 : vector<16x128xf32>
    %c0_51 = arith.constant 0 : index
    %c0_52 = arith.constant 0 : index
    %c0_53 = arith.constant 0 : index
    %59 = vector.load %arg29[%c0_51, %c0_52, %c0_53] : memref<1x1x128xf32, #tpu.memory_space<vmem>>, vector<1x1x128xf32>
    %60 = vector.shape_cast %59 : vector<1x1x128xf32> to vector<1x128xf32>
    %61 = vector.broadcast %60 : vector<1x128xf32> to vector<16x128xf32>
    %62 = arith.addf %58, %61 : vector<16x128xf32>
    %63 = arith.negf %62 : vector<16x128xf32>
    %64 = math.exp %63 : vector<16x128xf32>
    %cst_54 = arith.constant 1.000000e+00 : f32
    %65 = vector.broadcast %cst_54 : f32 to vector<16x128xf32>
    %66 = arith.addf %65, %64 : vector<16x128xf32>
    %67 = arith.divf %65, %66 : vector<16x128xf32>
    %68 = arith.mulf %62, %67 : vector<16x128xf32>
    %c0_55 = arith.constant 0 : index
    %c0_56 = arith.constant 0 : index
    %c0_57 = arith.constant 0 : index
    %69 = vector.load %arg30[%c0_55, %c0_56, %c0_57] : memref<1x128x128xf32, #tpu.memory_space<vmem>>, vector<1x128x128xf32>
    %70 = vector.shape_cast %69 : vector<1x128x128xf32> to vector<128x128xf32>
    %cst_58 = arith.constant dense<0.000000e+00> : vector<16x128xf32>
    %71 = tpu.matmul %68, %70, %cst_58 {dimension_numbers = #tpu.dot_dimension_numbers<[1], [0], [0], [1], [0, 0, 1, 1], [], []>} : vector<16x128xf32>, vector<128x128xf32>, vector<16x128xf32> -> vector<16x128xf32>
    %c0_59 = arith.constant 0 : index
    %c0_60 = arith.constant 0 : index
    %c0_61 = arith.constant 0 : index
    %72 = vector.load %arg31[%c0_59, %c0_60, %c0_61] : memref<1x1x128xf32, #tpu.memory_space<vmem>>, vector<1x1x128xf32>
    %73 = vector.shape_cast %72 : vector<1x1x128xf32> to vector<1x128xf32>
    %74 = vector.broadcast %73 : vector<1x128xf32> to vector<16x128xf32>
    %75 = arith.addf %71, %74 : vector<16x128xf32>
    %76 = arith.negf %75 : vector<16x128xf32>
    %77 = math.exp %76 : vector<16x128xf32>
    %cst_62 = arith.constant 1.000000e+00 : f32
    %78 = vector.broadcast %cst_62 : f32 to vector<16x128xf32>
    %79 = arith.addf %78, %77 : vector<16x128xf32>
    %80 = arith.divf %78, %79 : vector<16x128xf32>
    %81 = arith.mulf %75, %80 : vector<16x128xf32>
    %c0_63 = arith.constant 0 : index
    %c0_64 = arith.constant 0 : index
    %c0_65 = arith.constant 0 : index
    %82 = vector.load %arg32[%c0_63, %c0_64, %c0_65] : memref<1x128x128xf32, #tpu.memory_space<vmem>>, vector<1x128x128xf32>
    %83 = vector.shape_cast %82 : vector<1x128x128xf32> to vector<128x128xf32>
    %cst_66 = arith.constant dense<0.000000e+00> : vector<16x128xf32>
    %84 = tpu.matmul %81, %83, %cst_66 {dimension_numbers = #tpu.dot_dimension_numbers<[1], [0], [0], [1], [0, 0, 1, 1], [], []>} : vector<16x128xf32>, vector<128x128xf32>, vector<16x128xf32> -> vector<16x128xf32>
    %c0_67 = arith.constant 0 : index
    %c0_68 = arith.constant 0 : index
    %c0_69 = arith.constant 0 : index
    %85 = vector.load %arg33[%c0_67, %c0_68, %c0_69] : memref<1x1x128xf32, #tpu.memory_space<vmem>>, vector<1x1x128xf32>
    %86 = vector.shape_cast %85 : vector<1x1x128xf32> to vector<1x128xf32>
    %87 = vector.broadcast %86 : vector<1x128xf32> to vector<16x128xf32>
    %88 = arith.addf %84, %87 : vector<16x128xf32>
    %89 = arith.addf %3, %88 : vector<16x128xf32>
    %c0_70 = arith.constant 0 : index
    %c0_71 = arith.constant 0 : index
    %90 = vector.load %arg41[%c0_70, %c0_71] : memref<16x128xf32, #tpu.memory_space<vmem>>, vector<16x128xf32>
    tpu.vector_store %arg41[%c0_70, %c0_71], %89 {strides = array<i32>} : memref<16x128xf32, #tpu.memory_space<vmem>>, vector<16x128xf32>,
    %91 = arith.addf %4, %49 : vector<32x128xf32>
    %c0_72 = arith.constant 0 : index
    %c0_73 = arith.constant 0 : index
    %92 = vector.load %arg42[%c0_72, %c0_73] : memref<32x128xf32, #tpu.memory_space<vmem>>, vector<32x128xf32>
    tpu.vector_store %arg42[%c0_72, %c0_73], %91 {strides = array<i32>} : memref<32x128xf32, #tpu.memory_space<vmem>>, vector<32x128xf32>,
    %c1_i32 = arith.constant 1 : i32
    %93 = arith.cmpi eq, %arg1, %c1_i32 : i32
    %94 = arith.extui %93 : i1 to i32
    %c0_i32_74 = arith.constant 0 : i32
    %95 = arith.cmpi ne, %94, %c0_i32_74 : i32
    scf.if %95 {
      %c0_75 = arith.constant 0 : index
      %c0_76 = arith.constant 0 : index
      %96 = vector.load %arg41[%c0_75, %c0_76] : memref<16x128xf32, #tpu.memory_space<vmem>>, vector<16x128xf32>
      %c0_77 = arith.constant 0 : index
      %c0_78 = arith.constant 0 : index
      %97 = vector.load %arg34[%c0_77, %c0_78] : memref<128x128xf32, #tpu.memory_space<vmem>>, vector<128x128xf32>
      %c0_79 = arith.constant 0 : index
      %c0_80 = arith.constant 0 : index
      %98 = vector.load %arg35[%c0_79, %c0_80] : memref<1x128xf32, #tpu.memory_space<vmem>>, vector<1x128xf32>
      %c0_81 = arith.constant 0 : index
      %c0_82 = arith.constant 0 : index
      %99 = vector.load %arg36[%c0_81, %c0_82] : memref<128x128xf32, #tpu.memory_space<vmem>>, vector<128x128xf32>
      %c0_83 = arith.constant 0 : index
      %c0_84 = arith.constant 0 : index
      %100 = vector.load %arg37[%c0_83, %c0_84] : memref<1x128xf32, #tpu.memory_space<vmem>>, vector<1x128xf32>
      %c0_85 = arith.constant 0 : index
      %c0_86 = arith.constant 0 : index
      %101 = vector.load %arg38[%c0_85, %c0_86] : memref<128x128xf32, #tpu.memory_space<vmem>>, vector<128x128xf32>
      %c0_87 = arith.constant 0 : index
      %c0_88 = arith.constant 0 : index
      %102 = vector.load %arg39[%c0_87, %c0_88] : memref<1x128xf32, #tpu.memory_space<vmem>>, vector<1x128xf32>
      %cst_89 = arith.constant dense<0.000000e+00> : vector<16x128xf32>
      %103 = tpu.matmul %96, %97, %cst_89 {dimension_numbers = #tpu.dot_dimension_numbers<[1], [0], [0], [1], [0, 0, 1, 1], [], []>} : vector<16x128xf32>, vector<128x128xf32>, vector<16x128xf32> -> vector<16x128xf32>
      %104 = vector.broadcast %98 : vector<1x128xf32> to vector<16x128xf32>
      %105 = arith.addf %103, %104 : vector<16x128xf32>
      %106 = arith.negf %105 : vector<16x128xf32>
      %107 = math.exp %106 : vector<16x128xf32>
      %cst_90 = arith.constant 1.000000e+00 : f32
      %108 = vector.broadcast %cst_90 : f32 to vector<16x128xf32>
      %109 = arith.addf %108, %107 : vector<16x128xf32>
      %110 = arith.divf %108, %109 : vector<16x128xf32>
      %111 = arith.mulf %105, %110 : vector<16x128xf32>
      %cst_91 = arith.constant dense<0.000000e+00> : vector<16x128xf32>
      %112 = tpu.matmul %111, %99, %cst_91 {dimension_numbers = #tpu.dot_dimension_numbers<[1], [0], [0], [1], [0, 0, 1, 1], [], []>} : vector<16x128xf32>, vector<128x128xf32>, vector<16x128xf32> -> vector<16x128xf32>
      %113 = vector.broadcast %100 : vector<1x128xf32> to vector<16x128xf32>
      %114 = arith.addf %112, %113 : vector<16x128xf32>
      %115 = arith.negf %114 : vector<16x128xf32>
      %116 = math.exp %115 : vector<16x128xf32>
      %cst_92 = arith.constant 1.000000e+00 : f32
      %117 = vector.broadcast %cst_92 : f32 to vector<16x128xf32>
      %118 = arith.addf %117, %116 : vector<16x128xf32>
      %119 = arith.divf %117, %118 : vector<16x128xf32>
      %120 = arith.mulf %114, %119 : vector<16x128xf32>
      %cst_93 = arith.constant dense<0.000000e+00> : vector<16x128xf32>
      %121 = tpu.matmul %120, %101, %cst_93 {dimension_numbers = #tpu.dot_dimension_numbers<[1], [0], [0], [1], [0, 0, 1, 1], [], []>} : vector<16x128xf32>, vector<128x128xf32>, vector<16x128xf32> -> vector<16x128xf32>
      %122 = vector.broadcast %102 : vector<1x128xf32> to vector<16x128xf32>
      %123 = arith.addf %121, %122 : vector<16x128xf32>
      %c0_94 = arith.constant 0 : index
      %c0_95 = arith.constant 0 : index
      %c0_96 = arith.constant 0 : index
      %124 = vector.load %arg40[%c0_94, %c0_95, %c0_96] : memref<1x16x128xf32, #tpu.memory_space<vmem>>, vector<1x16x128xf32>
      %125 = vector.shape_cast %124 : vector<1x16x128xf32> to vector<16x128xf32>
      %126 = vector.shape_cast %123 : vector<16x128xf32> to vector<1x16x128xf32>
      tpu.vector_store %arg40[%c0_94, %c0_95, %c0_96], %126 {strides = array<i32>} : memref<1x16x128xf32, #tpu.memory_space<vmem>>, vector<1x16x128xf32>,
    } else {
    }
    return
  }
  func.func @transform_0(%arg0: i32, %arg1: i32) -> (i32, i32, i32) {
    %c0_i32 = arith.constant 0 : i32
    %c0_i32_0 = arith.constant 0 : i32
    %c0_i32_1 = arith.constant 0 : i32
    return %arg0, %c0_i32, %c0_i32_0 : i32, i32, i32
  }
  func.func @transform_1(%arg0: i32, %arg1: i32) -> (i32, i32, i32) {
    %c0_i32 = arith.constant 0 : i32
    %c0_i32_0 = arith.constant 0 : i32
    %c0_i32_1 = arith.constant 0 : i32
    return %arg0, %c0_i32, %c0_i32_0 : i32, i32, i32
  }
  func.func @transform_2(%arg0: i32, %arg1: i32) -> (i32, i32) {
    %c0_i32 = arith.constant 0 : i32
    %c0_i32_0 = arith.constant 0 : i32
    %c0_i32_1 = arith.constant 0 : i32
    return %c0_i32, %c0_i32_0 : i32, i32
  }
  func.func @transform_3(%arg0: i32, %arg1: i32) -> (i32, i32) {
    %c0_i32 = arith.constant 0 : i32
    %c0_i32_0 = arith.constant 0 : i32
    %c0_i32_1 = arith.constant 0 : i32
    return %c0_i32, %c0_i32_0 : i32, i32
  }
  func.func @transform_4(%arg0: i32, %arg1: i32) -> (i32, i32) {
    %c0_i32 = arith.constant 0 : i32
    %c0_i32_0 = arith.constant 0 : i32
    %c0_i32_1 = arith.constant 0 : i32
    return %c0_i32, %c0_i32_0 : i32, i32
  }
  func.func @transform_5(%arg0: i32, %arg1: i32) -> (i32, i32) {
    %c0_i32 = arith.constant 0 : i32
    %c0_i32_0 = arith.constant 0 : i32
    %c0_i32_1 = arith.constant 0 : i32
    return %c0_i32, %c0_i32_0 : i32, i32
  }
  func.func @transform_6(%arg0: i32, %arg1: i32) -> (i32, i32) {
    %c0_i32 = arith.constant 0 : i32
    %c0_i32_0 = arith.constant 0 : i32
    %c0_i32_1 = arith.constant 0 : i32
    return %c0_i32, %c0_i32_0 : i32, i32
  }
  func.func @transform_7(%arg0: i32, %arg1: i32) -> (i32, i32) {
    %c0_i32 = arith.constant 0 : i32
    %c0_i32_0 = arith.constant 0 : i32
    %c0_i32_1 = arith.constant 0 : i32
    return %c0_i32, %c0_i32_0 : i32, i32
  }
  func.func @transform_8(%arg0: i32, %arg1: i32) -> (i32, i32) {
    %c0_i32 = arith.constant 0 : i32
    %c0_i32_0 = arith.constant 0 : i32
    %c0_i32_1 = arith.constant 0 : i32
    return %c0_i32, %c0_i32_0 : i32, i32
  }
  func.func @transform_9(%arg0: i32, %arg1: i32) -> (i32, i32) {
    %c0_i32 = arith.constant 0 : i32
    %c0_i32_0 = arith.constant 0 : i32
    %c0_i32_1 = arith.constant 0 : i32
    return %c0_i32, %c0_i32_0 : i32, i32
  }
  func.func @transform_10(%arg0: i32, %arg1: i32) -> (i32, i32) {
    %c0_i32 = arith.constant 0 : i32
    %c0_i32_0 = arith.constant 0 : i32
    %c0_i32_1 = arith.constant 0 : i32
    return %c0_i32, %c0_i32_0 : i32, i32
  }
  func.func @transform_11(%arg0: i32, %arg1: i32) -> (i32, i32) {
    %c0_i32 = arith.constant 0 : i32
    %c0_i32_0 = arith.constant 0 : i32
    %c0_i32_1 = arith.constant 0 : i32
    return %c0_i32, %c0_i32_0 : i32, i32
  }
  func.func @transform_12(%arg0: i32, %arg1: i32) -> (i32, i32) {
    %c0_i32 = arith.constant 0 : i32
    %c0_i32_0 = arith.constant 0 : i32
    %c0_i32_1 = arith.constant 0 : i32
    return %c0_i32, %c0_i32_0 : i32, i32
  }
  func.func @transform_13(%arg0: i32, %arg1: i32) -> (i32, i32) {
    %c0_i32 = arith.constant 0 : i32
    %c0_i32_0 = arith.constant 0 : i32
    %c0_i32_1 = arith.constant 0 : i32
    return %c0_i32, %c0_i32_0 : i32, i32
  }
  func.func @transform_14(%arg0: i32, %arg1: i32) -> (i32, i32) {
    %c0_i32 = arith.constant 0 : i32
    %c0_i32_0 = arith.constant 0 : i32
    %c0_i32_1 = arith.constant 0 : i32
    return %c0_i32, %c0_i32_0 : i32, i32
  }
  func.func @transform_15(%arg0: i32, %arg1: i32) -> (i32, i32) {
    %c0_i32 = arith.constant 0 : i32
    %c0_i32_0 = arith.constant 0 : i32
    %c0_i32_1 = arith.constant 0 : i32
    return %c0_i32, %c0_i32_0 : i32, i32
  }
  func.func @transform_16(%arg0: i32, %arg1: i32) -> (i32, i32) {
    %c0_i32 = arith.constant 0 : i32
    %c0_i32_0 = arith.constant 0 : i32
    %c0_i32_1 = arith.constant 0 : i32
    return %c0_i32, %c0_i32_0 : i32, i32
  }
  func.func @transform_17(%arg0: i32, %arg1: i32) -> (i32, i32, i32) {
    %c0_i32 = arith.constant 0 : i32
    %c0_i32_0 = arith.constant 0 : i32
    %c0_i32_1 = arith.constant 0 : i32
    return %arg1, %c0_i32, %c0_i32_0 : i32, i32, i32
  }
  func.func @transform_18(%arg0: i32, %arg1: i32) -> (i32, i32, i32) {
    %c0_i32 = arith.constant 0 : i32
    %c0_i32_0 = arith.constant 0 : i32
    %c0_i32_1 = arith.constant 0 : i32
    return %arg1, %c0_i32, %c0_i32_0 : i32, i32, i32
  }
  func.func @transform_19(%arg0: i32, %arg1: i32) -> (i32, i32, i32) {
    %c0_i32 = arith.constant 0 : i32
    %c0_i32_0 = arith.constant 0 : i32
    %c0_i32_1 = arith.constant 0 : i32
    return %arg1, %c0_i32, %c0_i32_0 : i32, i32, i32
  }
  func.func @transform_20(%arg0: i32, %arg1: i32) -> (i32, i32, i32) {
    %c0_i32 = arith.constant 0 : i32
    %c0_i32_0 = arith.constant 0 : i32
    %c0_i32_1 = arith.constant 0 : i32
    return %arg1, %c0_i32, %c0_i32_0 : i32, i32, i32
  }
  func.func @transform_21(%arg0: i32, %arg1: i32) -> (i32, i32, i32) {
    %c0_i32 = arith.constant 0 : i32
    %c0_i32_0 = arith.constant 0 : i32
    %c0_i32_1 = arith.constant 0 : i32
    return %arg1, %c0_i32, %c0_i32_0 : i32, i32, i32
  }
  func.func @transform_22(%arg0: i32, %arg1: i32) -> (i32, i32, i32) {
    %c0_i32 = arith.constant 0 : i32
    %c0_i32_0 = arith.constant 0 : i32
    %c0_i32_1 = arith.constant 0 : i32
    return %arg1, %c0_i32, %c0_i32_0 : i32, i32, i32
  }
  func.func @transform_23(%arg0: i32, %arg1: i32) -> (i32, i32, i32) {
    %c0_i32 = arith.constant 0 : i32
    %c0_i32_0 = arith.constant 0 : i32
    %c0_i32_1 = arith.constant 0 : i32
    return %arg1, %c0_i32, %c0_i32_0 : i32, i32, i32
  }
  func.func @transform_24(%arg0: i32, %arg1: i32) -> (i32, i32, i32) {
    %c0_i32 = arith.constant 0 : i32
    %c0_i32_0 = arith.constant 0 : i32
    %c0_i32_1 = arith.constant 0 : i32
    return %arg1, %c0_i32, %c0_i32_0 : i32, i32, i32
  }
  func.func @transform_25(%arg0: i32, %arg1: i32) -> (i32, i32, i32) {
    %c0_i32 = arith.constant 0 : i32
    %c0_i32_0 = arith.constant 0 : i32
    %c0_i32_1 = arith.constant 0 : i32
    return %arg1, %c0_i32, %c0_i32_0 : i32, i32, i32
  }
  func.func @transform_26(%arg0: i32, %arg1: i32) -> (i32, i32, i32) {
    %c0_i32 = arith.constant 0 : i32
    %c0_i32_0 = arith.constant 0 : i32
    %c0_i32_1 = arith.constant 0 : i32
    return %arg1, %c0_i32, %c0_i32_0 : i32, i32, i32
  }
  func.func @transform_27(%arg0: i32, %arg1: i32) -> (i32, i32, i32) {
    %c0_i32 = arith.constant 0 : i32
    %c0_i32_0 = arith.constant 0 : i32
    %c0_i32_1 = arith.constant 0 : i32
    return %arg1, %c0_i32, %c0_i32_0 : i32, i32, i32
  }
  func.func @transform_28(%arg0: i32, %arg1: i32) -> (i32, i32, i32) {
    %c0_i32 = arith.constant 0 : i32
    %c0_i32_0 = arith.constant 0 : i32
    %c0_i32_1 = arith.constant 0 : i32
    return %arg1, %c0_i32, %c0_i32_0 : i32, i32, i32
  }
  func.func @transform_29(%arg0: i32, %arg1: i32) -> (i32, i32, i32) {
    %c0_i32 = arith.constant 0 : i32
    %c0_i32_0 = arith.constant 0 : i32
    %c0_i32_1 = arith.constant 0 : i32
    return %arg1, %c0_i32, %c0_i32_0 : i32, i32, i32
  }
  func.func @transform_30(%arg0: i32, %arg1: i32) -> (i32, i32, i32) {
    %c0_i32 = arith.constant 0 : i32
    %c0_i32_0 = arith.constant 0 : i32
    %c0_i32_1 = arith.constant 0 : i32
    return %arg1, %c0_i32, %c0_i32_0 : i32, i32, i32
  }
  func.func @transform_31(%arg0: i32, %arg1: i32) -> (i32, i32, i32) {
    %c0_i32 = arith.constant 0 : i32
    %c0_i32_0 = arith.constant 0 : i32
    %c0_i32_1 = arith.constant 0 : i32
    return %arg1, %c0_i32, %c0_i32_0 : i32, i32, i32
  }
  func.func @transform_32(%arg0: i32, %arg1: i32) -> (i32, i32) {
    %c0_i32 = arith.constant 0 : i32
    %c0_i32_0 = arith.constant 0 : i32
    %c0_i32_1 = arith.constant 0 : i32
    return %c0_i32, %c0_i32_0 : i32, i32
  }
  func.func @transform_33(%arg0: i32, %arg1: i32) -> (i32, i32) {
    %c0_i32 = arith.constant 0 : i32
    %c0_i32_0 = arith.constant 0 : i32
    %c0_i32_1 = arith.constant 0 : i32
    return %c0_i32, %c0_i32_0 : i32, i32
  }
  func.func @transform_34(%arg0: i32, %arg1: i32) -> (i32, i32) {
    %c0_i32 = arith.constant 0 : i32
    %c0_i32_0 = arith.constant 0 : i32
    %c0_i32_1 = arith.constant 0 : i32
    return %c0_i32, %c0_i32_0 : i32, i32
  }
  func.func @transform_35(%arg0: i32, %arg1: i32) -> (i32, i32) {
    %c0_i32 = arith.constant 0 : i32
    %c0_i32_0 = arith.constant 0 : i32
    %c0_i32_1 = arith.constant 0 : i32
    return %c0_i32, %c0_i32_0 : i32, i32
  }
  func.func @transform_36(%arg0: i32, %arg1: i32) -> (i32, i32) {
    %c0_i32 = arith.constant 0 : i32
    %c0_i32_0 = arith.constant 0 : i32
    %c0_i32_1 = arith.constant 0 : i32
    return %c0_i32, %c0_i32_0 : i32, i32
  }
  func.func @transform_37(%arg0: i32, %arg1: i32) -> (i32, i32) {
    %c0_i32 = arith.constant 0 : i32
    %c0_i32_0 = arith.constant 0 : i32
    %c0_i32_1 = arith.constant 0 : i32
    return %c0_i32, %c0_i32_0 : i32, i32
  }
  func.func @transform_38(%arg0: i32, %arg1: i32) -> (i32, i32, i32) {
    %c0_i32 = arith.constant 0 : i32
    %c0_i32_0 = arith.constant 0 : i32
    %c0_i32_1 = arith.constant 0 : i32
    return %arg0, %c0_i32, %c0_i32_0 : i32, i32, i32
  }
}

</mosaic_0001>

<bundles_post_ra>
// kernel: gnn_forward.1
= control target key start
LH: loop header
LB: loop body
LE: loop exit
PB: predicated region body
PF: predicated region fallthrough
CT: control target
= control target key end

     0   :  { %s4612_s6 = smov 1   ;;  %s4613_s10 = smov 2   ;;  %s5601_s0 = inlined_call_operand.smem [shape: u32[39], index: -1, kind: input, shape index: {}] }
   0x1   :  { %s4665_s5 = sld [smem:[%s5601_s0]]   ;;  %s4614_s14 = smov 3  }
   0x2   :  { %s4670_s9 = sld [smem:[%s5601_s0 + %s4612_s6]]   ;;  %s4615_s18 = smov 4  }
   0x3   :  { %s4675_s13 = sld [smem:[%s5601_s0 + %s4613_s10]]   ;;  %s4616_s22 = smov 5  }
   0x4   :  { %s4680_s17 = sld [smem:[%s5601_s0 + %s4614_s14]]   ;;  %s4617_s26 = smov 6  }
   0x5   :  { %s4685_s21 = sld [smem:[%s5601_s0 + %s4615_s18]]   ;;  %s4618_s30 = smov 7  }
   0x6   :  { %s4690_s25 = sld [smem:[%s5601_s0 + %s4616_s22]]   ;;  %s4619_s4 = smov 8  }
   0x7   :  { %5643 = sst [smem:[#allocation26_spill]] %s4665_s5  ;;  %s4620_s10 = smov 9  }
   0x8   :  { %5644 = sst [smem:[#allocation27_spill]] %s4670_s9  ;;  %s4621_s15 = smov 10  }
   0x9   :  { %5645 = sst [smem:[#allocation28_spill]] %s4675_s13  ;;  %s4622_s20 = smov 11  }
   0xa   :  { %5646 = sst [smem:[#allocation29_spill]] %s4680_s17  ;;  %s4624_s1 = smov 13  }
   0xb   :  { %5647 = sst [smem:[#allocation30_spill]] %s4685_s21  ;;  %s4625_s7 = smov 14  }
   0xc   :  { %5648 = sst [smem:[#allocation31_spill]] %s4690_s25  ;;  %s4627_s22 = smov 16  }
   0xd   :  { %s4695_s29 = sld [smem:[%s5601_s0 + %s4617_s26]]   ;;  %s4623_s26 = smov 12  }
   0xe   :  { %s4700_s3 = sld [smem:[%s5601_s0 + %s4618_s30]]   ;;  %s4628_s28 = smov 17  }
   0xf   :  { %s4705_s8 = sld [smem:[%s5601_s0 + %s4619_s4]]  }
  0x10   :  { %s4710_s14 = sld [smem:[%s5601_s0 + %s4620_s10]]  }
  0x11   :  { %s4715_s19 = sld [smem:[%s5601_s0 + %s4621_s15]]   ;;  %s4626_s15 = smov 15  }
  0x12   :  { %s4720_s24 = sld [smem:[%s5601_s0 + %s4622_s20]]  }
  0x13   :  { %5649 = sst [smem:[#allocation32_spill]] %s4695_s29 }
  0x14   :  { %5650 = sst [smem:[#allocation33_spill]] %s4700_s3 }
  0x15   :  { %5651 = sst [smem:[#allocation34_spill]] %s4705_s8 }
  0x16   :  { %5652 = sst [smem:[#allocation35_spill]] %s4710_s14 }
  0x17   :  { %5653 = sst [smem:[#allocation36_spill]] %s4715_s19 }
  0x18   :  { %5654 = sst [smem:[#allocation37_spill]] %s4720_s24 }
  0x19   :  { %s4725_s30 = sld [smem:[%s5601_s0 + %s4623_s26]]  }
  0x1a   :  { %s4730_s6 = sld [smem:[%s5601_s0 + %s4624_s1]]  }
  0x1b   :  { %s4735_s12 = sld [smem:[%s5601_s0 + %s4625_s7]]   ;;  %s4629_s7 = smov 18  }
  0x1c   :  { %s4740_s20 = sld [smem:[%s5601_s0 + %s4626_s15]]   ;;  %s4630_s15 = smov 19  }
  0x1d   :  { %s4745_s27 = sld [smem:[%s5601_s0 + %s4627_s22]]   ;;  %s4631_s22 = smov 20  }
  0x1e   :  { %s4750_s4 = sld [smem:[%s5601_s0 + %s4628_s28]]   ;;  %s4632_s28 = smov 21  }
  0x1f   :  { %5655 = sst [smem:[#allocation38_spill]] %s4725_s30 }
  0x20   :  { %5656 = sst [smem:[#allocation39_spill]] %s4730_s6 }
  0x21   :  { %5657 = sst [smem:[#allocation40_spill]] %s4735_s12 }
  0x22   :  { %5658 = sst [smem:[#allocation41_spill]] %s4740_s20 }
  0x23   :  { %5659 = sst [smem:[#allocation42_spill]] %s4745_s27 }
  0x24   :  { %5660 = sst [smem:[#allocation43_spill]] %s4750_s4 }
  0x25   :  { %s4755_s21 = sld [smem:[%s5601_s0 + %s4629_s7]]   ;;  %s4633_s7 = smov 22  }
  0x26   :  { %s4760_s17 = sld [smem:[%s5601_s0 + %s4630_s15]]   ;;  %s4634_s15 = smov 23  }
  0x27   :  { %s4765_s13 = sld [smem:[%s5601_s0 + %s4631_s22]]   ;;  %s4635_s22 = smov 24  }
  0x28   :  { %s4770_s27 = sld [smem:[%s5601_s0 + %s4632_s28]]   ;;  %s4636_s28 = smov 25  }
  0x29   :  { %s4775_s19 = sld [smem:[%s5601_s0 + %s4633_s7]]   ;;  %s4637_s7 = smov 26  }
  0x2a   :  { %s4780_s12 = sld [smem:[%s5601_s0 + %s4634_s15]]   ;;  %s4638_s15 = smov 27  }
  0x2b   :  { %5661 = sst [smem:[#allocation44_spill]] %s4755_s21 }
  0x2c   :  { %5662 = sst [smem:[#allocation45_spill]] %s4760_s17 }
  0x2d   :  { %5663 = sst [smem:[#allocation46_spill]] %s4765_s13 }
  0x2e   :  { %5664 = sst [smem:[#allocation47_spill]] %s4770_s27 }
  0x2f   :  { %5665 = sst [smem:[#allocation48_spill]] %s4775_s19 }
  0x30   :  { %5666 = sst [smem:[#allocation49_spill]] %s4780_s12 }
  0x31   :  { %s4785_s8 = sld [smem:[%s5601_s0 + %s4635_s22]]   ;;  %s4639_s22 = smov 28  }
  0x32   :  { %s4790_s14 = sld [smem:[%s5601_s0 + %s4636_s28]]   ;;  %s4640_s28 = smov 29  }
  0x33   :  { %s4795_s30 = sld [smem:[%s5601_s0 + %s4637_s7]]   ;;  %s4641_s7 = smov 30  }
  0x34   :  { %s4800_s29 = sld [smem:[%s5601_s0 + %s4638_s15]]   ;;  %s4642_s15 = smov 31  }
  0x35   :  { %s4805_s3 = sld [smem:[%s5601_s0 + %s4639_s22]]   ;;  %s4643_s22 = smov 32  }
  0x36   :  { %s4810_s24 = sld [smem:[%s5601_s0 + %s4640_s28]]   ;;  %s4644_s28 = smov 33  }
  0x37   :  { %5667 = sst [smem:[#allocation50_spill]] %s4785_s8 }
  0x38   :  { %5668 = sst [smem:[#allocation51_spill]] %s4790_s14 }
  0x39   :  { %5669 = sst [smem:[#allocation52_spill]] %s4795_s30 }
  0x3a   :  { %5670 = sst [smem:[#allocation53_spill]] %s4800_s29 }
  0x3b   :  { %5671 = sst [smem:[#allocation54_spill]] %s4805_s3 }
  0x3c   :  { %5672 = sst [smem:[#allocation55_spill]] %s4810_s24 }
  0x3d   :  { %s4815_s25 = sld [smem:[%s5601_s0 + %s4641_s7]]   ;;  %s4645_s7 = smov 34  }
  0x3e   :  { %s4820_s29 = sld [smem:[%s5601_s0 + %s4642_s15]]   ;;  %s4646_s15 = smov 35  }
  0x3f   :  { %s4825_s8 = sld [smem:[%s5601_s0 + %s4643_s22]]   ;;  %s4647_s22 = smov 36  }
  0x40   :  { %s4830_s24 = sld [smem:[%s5601_s0 + %s4644_s28]]   ;;  %s4648_s28 = smov 37  }
  0x41   :  { %s4835_s19 = sld [smem:[%s5601_s0 + %s4645_s7]]   ;;  %s4649_s7 = smov 38  }
  0x42   :  { %s4845_s13 = sld [smem:[%s5601_s0 + %s4647_s22]]  }
  0x43   :  { %5673 = sst [smem:[#allocation56_spill]] %s4815_s25 }
  0x44   :  { %5674 = sst [smem:[#allocation57_spill]] %s4820_s29 }
  0x45   :  { %5675 = sst [smem:[#allocation58_spill]] %s4825_s8 }
  0x46   :  { %5676 = sst [smem:[#allocation59_spill]] %s4830_s24 }
  0x47   :  { %5677 = sst [smem:[#allocation60_spill]] %s4835_s19 }
  0x48   :  { %s4840_s29 = sld [smem:[%s5601_s0 + %s4646_s15]]  }
  0x49   :  { %5679 = sst [smem:[#allocation62_spill]] %s4845_s13 }
  0x4a   :  { %s4850_s24 = sld [smem:[%s5601_s0 + %s4648_s28]]  }
  0x4b   :  { %s4855_s9 = sld [smem:[%s5601_s0 + %s4649_s7]]  }
  0x4e   :  { %5678 = sst [smem:[#allocation61_spill]] %s4840_s29 }
  0x50   :  { %5680 = sst [smem:[#allocation63_spill]] %s4850_s24 }
  0x51   :  { %5681 = sst [smem:[#allocation64_spill]] %s4855_s9 }
  0x52   :  { %82 = vsyncpa [#allocation5], 0 }
  0x53   :  { %83 = vsyncpa [#allocation7], 0 }
  0x54   :  { %84 = vsyncpa [#allocation19], 0  ;;  %s4857_s15 = smov 0   ;;  %s4859_s16 = smov 0  }
  0x55   :  { %s4861_s18 = smov 0   ;;  %s4863_s22 = smov 0  }
  0x56   :  { %s4865_s23 = smov 0   ;;  %s4867_s26 = smov 0  }
  0x57   :  { %s4869_s28 = smov 0   ;;  %s4871_s1 = smov 0  }
  0x58 LB: > { %s5682_s30 = sld [smem:[#allocation52_spill]]  ;;  %s99_s2 = sadd.s32 1, %s4602_s26  ;;  %s4602_s26 = sphi %s4867_s26, %s5779_s26   ;;  %s4598_s23 = sphi %s4865_s23, %s5778_s23   ;;  %s4594_s22 = sphi %s4863_s22, %s5777_s22   ;;  %s4590_s18 = sphi %s4861_s18, %s5776_s18   ;;  %s4586_s16 = sphi %s4859_s16, %s5775_s16   ;;  %s4582_s15 = sphi %s4857_s15, %s5774_s15   ;;  %s4610_s1 = sphi %s4871_s1, %s90_s1   ;;  %s4606_s28 = sphi %s4869_s28, %s5780_s28  }
  0x59   : > { %s5683_s27 = sld [smem:[#allocation47_spill]]  ;;  %p100_p0 = scmp.ge.s32.totalorder %s99_s2, 2 }
  0x5a   : > { %s5684_s25 = sld [smem:[#allocation56_spill]]  ;;  %s102_s7 = sadd.s32 1, %s4606_s28 }
  0x5b   : > { %s5685_s21 = sld [smem:[#allocation44_spill]]  ;;  %s476_s10 = sadd.s32 1, %s4590_s18 }
  0x5c   : > { %s5686_s20 = sld [smem:[#allocation41_spill]]  ;;  %p483_p1 = scmp.ne.s32.totalorder %s4590_s18, %s4586_s16 }
  0x5d   : > { %s5687_s19 = sld [smem:[#allocation60_spill]]  ;;  %s5782_s2 = smov (%p100_p0, %s99_s2), 0 }
  0x5e   : > { %s5688_s17 = sld [smem:[#allocation45_spill]]  ;;  %s5784_s7 = smov (!%p100_p0, %s102_s7), %s4606_s28 }
  0x5f   : > { %s5689_s14 = sld [smem:[#allocation51_spill]]  ;;  %s473_s11 = ssub.s32 %s4602_s26, %s5782_s2 }
  0x60   : > { %s5690_s13 = sld [smem:[#allocation62_spill]]  ;;  %p484_p2 = scmp.eq.s32.totalorder %s4610_s1, 0 }
  0x61   : > { %s5691_s8 = sld [smem:[#allocation58_spill]]  ;;  %p104_p3 = scmp.ge.s32.totalorder %s5784_s7, 2 }
  0x62   : > { %s5692_s3 = sld [smem:[#allocation54_spill]]  ;;  %p474_p4 = scmp.eq.s32.totalorder %s473_s11, 0 }
  0x63   : > { %s5693_s12 = sld [smem:[#allocation49_spill]]  ;;  %p4907_p5 = por %p484_p2, %p483_p1 }
  0x64   : > { %s5694_s4 = sld [smem:[#allocation43_spill]]  ;;  %p489_p6 = scmp.ne.s32.totalorder %s4586_s16, %s4582_s15 }
  0x65   : > { %s5695_s6 = sld [smem:[#allocation39_spill]]  ;;  %s5786_s7 = smov (%p104_p3, %s5784_s7), 0 }
  0x66   : > { %5696 = sst [smem:[#allocation65_spill]] %s4586_s16  ;;  %s5707_s29 = sadd.s32 4294967295, %s4610_s1  }
  0x67   : > { %5697 = sst [smem:[#allocation66_spill]] %s4590_s18  ;;  %p4919_p7 = scmp.eq.s32.totalorder %s5707_s29, 0 }
  0x68   : > { %5698 = sst [smem:[#allocation67_spill]] %s4594_s22  ;;  %p3630_p8 = scmp.ge.s32.totalorder %s4610_s1, 1 }
  0x69   : > { %5699 = sst [smem:[#allocation68_spill]] %s4598_s23  ;;  %p1016_p9 = scmp.lt.s32.totalorder %s4610_s1, 5 }
  0x6a   : > { %5700 = sst [smem:[#allocation69_spill]] %s4602_s26  ;;  %p4927_p10 = por %p4919_p7, %p489_p6 }
  0x6b   : > { %5701 = sst [smem:[#allocation70_spill]] %s4606_s28  ;;  %s1060_s15 = sshll.u32 %s5695_s6, 4  ;;  %s1061_s15 = int_to_ptr.hbm [resolvable:$true] %s1060_s15 }
  0x6c   : > { %5702 = sst [smem:[#allocation71_spill]] %s4610_s1  ;;  %p4932_p11 = pnand %p3630_p8, %p1016_p9 }
  0x6d   : > { %5703 = sst [smem:[#allocation72_spill]] %s5782_s2  ;;  %s4650_s29 = smov [#allocation4]  }
  0x6e   : > { %5705 = sst [smem:[#allocation73_spill]] %s5786_s7  ;;  %p3815_p12 = pneg %p4932_p11 }
  0x6f   : > { %s4915_s0 = scalar_select %p474_p4, %s4590_s18, %s476_s10  }
  0x70   : > { %s5708_s9 = scalar_select %p4919_p7, 1, 0 }
  0x71   : > { %5706 = sst [smem:[#allocation74_spill]] %s4915_s0  ;;  %s1062_s10 = sshll.u32 %s4650_s29, 4  ;;  %s1063_s10 = int_to_ptr.vmem [resolvable:$true] %s1062_s10 }
  0x72   : > { %5709 = sst [smem:[#allocation75_spill]] %s5708_s9  ;;  %p4940_p13 = pnand %p3815_p12, %p4919_p7 }
  0x73   : > { %s5710_s11 = scalar_select %p4927_p10, 1, 0 }
  0x74   : > { %s5712_s2 = scalar_select %p4932_p11, 1, 0 }
  0x75   : > { %5711 = sst [smem:[#allocation76_spill]] %s5710_s11  ;;  %p3864_p0 = scmp.lt.s32.totalorder %s4610_s1, 4 }
  0x76   : > { %5713 = sst [smem:[#allocation77_spill]] %s5712_s2  ;;  %s1163_s28 = sand.u32 1, %s4610_s1  }
  0x77   : > { %s4108_s0 = sshra.s32 %s1061_s15, 4  ;;  %p4948_p2 = pneg %p4940_p13  ;;  %s4109_s0 = int_to_ptr.hbm [resolvable:$true] %s4108_s0 }
  0x78   : > { %s4110_s5 = scalar_lea.hbm %s4109_s0, 128  ;;  %s4115_s29 = scalar_lea.hbm %s5695_s6, 128 }
  0x79   : > { %p4111_p1 = scmp.ne.s32.totalorder %s4109_s0, %s4110_s5  ;;  %p4116_p6 = scmp.lt.s32.totalorder %s4109_s0, %s5695_s6 }
  0x7a   : > { %p4117_p8 = scmp.lt.s32.totalorder %s4115_s29, %s4110_s5 }
  0x7b   : > { %p4113_p3 = pnand %p4948_p2, %p4111_p1 }
  0x7c   : > { %p4118_p9 = por %p4117_p8, %p4116_p6 }
  0x7d   : > { %p4114_p4 = pneg %p4113_p3 }
  0x7f   : > { %p4119_p12 = pnand %p4118_p9, %p4114_p4 }
  0x81   : > { %4122 = shalt.err (!%p4119_p12)
}
  0x82   : > { %s5618_s23 = smov 128   ;;  %s5620_s11 = smov 8  }
  0x83   : > { %3818 = dma.hbm_to_vmem [thread:$0]  (!%p4940_p13), %s1061_s15, 2048, %s1063_s10, [#allocation5], %s5618_s23, %s5618_s23, %s5620_s11  }
  0x84   : > { %p4965_p1 = pnand %p3864_p0, %p4907_p5  ;;  %s1165_s0 = sand.u32 1, %s4590_s18  }
  0x85   : > { %s4970_s29 = sshll.u32 %s1165_s0, 7  ;;  %s4973_s6 = sshll.u32 %s4602_s26, 7 }
  0x86   : > { %s1172_s16 = scalar_lea.hbm %s5694_s4, %s4973_s6  ;;  %s1167_s9 = scalar_lea.vmem [#allocation8], %s4970_s29 }
  0x87   : > { %s1175_s2 = sshll.u32 %s1167_s9, 4  ;;  %s1173_s15 = sshll.u32 %s1172_s16, 4  ;;  %s1176_s2 = int_to_ptr.vmem [resolvable:$true] %s1175_s2  ;;  %s1174_s15 = int_to_ptr.hbm [resolvable:$true] %s1173_s15 }
  0x88   : > { %s4978_s24 = scalar_lea.sflag [#allocation5], %s1163_s28  ;;  %s4138_s10 = sshra.s32 %s1174_s15, 4  ;;  %s4139_s10 = int_to_ptr.hbm [resolvable:$true] %s4138_s10 }
  0x89   : > { %s4140_s23 = scalar_lea.hbm %s4139_s10, 128  ;;  %p4982_p0 = pneg %p4965_p1 }
  0x8a   : > { %p4141_p5 = scmp.ne.s32.totalorder %s4139_s10, %s4140_s23  ;;  %s4145_s11 = scalar_lea.hbm %s5694_s4, 256 }
  0x8b   : > { %p4146_p6 = scmp.lt.s32.totalorder %s4139_s10, %s5694_s4  ;;  %p4147_p8 = scmp.lt.s32.totalorder %s4145_s11, %s4140_s23 }
  0x8c   : > { %p4143_p3 = pnand %p4982_p0, %p4141_p5 }
  0x8d   : > { %p4148_p9 = por %p4147_p8, %p4146_p6 }
  0x8e   : > { %p4144_p4 = pneg %p4143_p3 }
  0x90   : > { %p4149_p12 = pnand %p4148_p9, %p4144_p4 }
  0x92   : > { %4152 = shalt.err (!%p4149_p12)
}
  0x93   : > { %s5718_s9 = smov 8   ;;  %s5719_s16 = smov 128  }
  0x94   : > { %3834 = dma.hbm_to_vmem [thread:$0]  (!%p4965_p1), %s1174_s15, 2048, %s1176_s2, %s4978_s24, %s5719_s16, %s5719_s16, %s5718_s9  }
  0x95   : > { %s1194_s28 = scalar_lea.hbm %s5685_s21, %s4973_s6  ;;  %s1189_s26 = scalar_lea.vmem [#allocation9], %s4970_s29 }
  0x96   : > { %s1197_s10 = sshll.u32 %s1189_s26, 4  ;;  %s1195_s23 = sshll.u32 %s1194_s28, 4  ;;  %s1198_s10 = int_to_ptr.vmem [resolvable:$true] %s1197_s10  ;;  %s1196_s23 = int_to_ptr.hbm [resolvable:$true] %s1195_s23 }
  0x97   : > { %s4168_s11 = sshra.s32 %s1196_s23, 4  ;;  %s4175_s18 = scalar_lea.hbm %s5685_s21, 256  ;;  %s4169_s11 = int_to_ptr.hbm [resolvable:$true] %s4168_s11 }
  0x98   : > { %s4170_s4 = scalar_lea.hbm %s4169_s11, 128  ;;  %p4176_p6 = scmp.lt.s32.totalorder %s4169_s11, %s5685_s21 }
  0x99   : > { %p4171_p5 = scmp.ne.s32.totalorder %s4169_s11, %s4170_s4  ;;  %p4177_p8 = scmp.lt.s32.totalorder %s4175_s18, %s4170_s4 }
  0x9b   : > { %p4173_p3 = pnand %p4171_p5, %p4982_p0  ;;  %p4178_p9 = por %p4177_p8, %p4176_p6 }
  0x9d   : > { %p4174_p4 = pneg %p4173_p3 }
  0x9f   : > { %p4179_p12 = pnand %p4178_p9, %p4174_p4 }
  0xa1   : > { %4182 = shalt.err (!%p4179_p12)
}
  0xa2   : > { %3837 = dma.hbm_to_vmem [thread:$0]  (!%p4965_p1), %s1196_s23, 2048, %s1198_s10, %s4978_s24, %s5719_s16, %s5719_s16, %s5718_s9  }
  0xa3   : > { %s1216_s26 = scalar_lea.hbm %s5688_s17, %s4973_s6  ;;  %s1211_s2 = scalar_lea.vmem [#allocation10], %s4970_s29 }
  0xa4   : > { %s1219_s15 = sshll.u32 %s1211_s2, 4  ;;  %s1217_s4 = sshll.u32 %s1216_s26, 4  ;;  %s1220_s15 = int_to_ptr.vmem [resolvable:$true] %s1219_s15  ;;  %s1218_s4 = int_to_ptr.hbm [resolvable:$true] %s1217_s4 }
  0xa5   : > { %s4198_s18 = sshra.s32 %s1218_s4, 4  ;;  %s4205_s11 = scalar_lea.hbm %s5688_s17, 256  ;;  %s4199_s18 = int_to_ptr.hbm [resolvable:$true] %s4198_s18 }
  0xa6   : > { %s4200_s28 = scalar_lea.hbm %s4199_s18, 128  ;;  %p4206_p6 = scmp.lt.s32.totalorder %s4199_s18, %s5688_s17 }
  0xa7   : > { %p4201_p5 = scmp.ne.s32.totalorder %s4199_s18, %s4200_s28  ;;  %p4207_p8 = scmp.lt.s32.totalorder %s4205_s11, %s4200_s28 }
  0xa9   : > { %p4203_p3 = pnand %p4201_p5, %p4982_p0  ;;  %p4208_p9 = por %p4207_p8, %p4206_p6 }
  0xab   : > { %p4204_p4 = pneg %p4203_p3 }
  0xad   : > { %p4209_p12 = pnand %p4208_p9, %p4204_p4 }
  0xaf   : > { %4212 = shalt.err (!%p4209_p12)
}
  0xb0   : > { %3840 = dma.hbm_to_vmem [thread:$0]  (!%p4965_p1), %s1218_s4, 2048, %s1220_s15, %s4978_s24, %s5719_s16, %s5719_s16, %s5718_s9  }
  0xb1   : > { %s1244_s10 = scalar_lea.hbm %s5683_s27, %s4973_s6  ;;  %s1239_s23 = scalar_lea.vmem [#allocation11], %s4970_s29 }
  0xb2   : > { %s1247_s26 = sshll.u32 %s1239_s23, 4  ;;  %s1245_s2 = sshll.u32 %s1244_s10, 4  ;;  %s1248_s26 = int_to_ptr.vmem [resolvable:$true] %s1247_s26  ;;  %s1246_s2 = int_to_ptr.hbm [resolvable:$true] %s1245_s2 }
  0xb3   : > { %s4228_s18 = sshra.s32 %s1246_s2, 4  ;;  %s4235_s11 = scalar_lea.hbm %s5683_s27, 256  ;;  %s4229_s18 = int_to_ptr.hbm [resolvable:$true] %s4228_s18 }
  0xb4   : > { %s4230_s28 = scalar_lea.hbm %s4229_s18, 128  ;;  %p4236_p6 = scmp.lt.s32.totalorder %s4229_s18, %s5683_s27 }
  0xb5   : > { %p4231_p5 = scmp.ne.s32.totalorder %s4229_s18, %s4230_s28  ;;  %p4237_p8 = scmp.lt.s32.totalorder %s4235_s11, %s4230_s28 }
  0xb7   : > { %p4233_p3 = pnand %p4231_p5, %p4982_p0  ;;  %p4238_p9 = por %p4237_p8, %p4236_p6 }
  0xb9   : > { %p4234_p4 = pneg %p4233_p3 }
  0xbb   : > { %p4239_p12 = pnand %p4238_p9, %p4234_p4 }
  0xbd   : > { %4242 = shalt.err (!%p4239_p12)
}
  0xbe   : > { %3843 = dma.hbm_to_vmem [thread:$0]  (!%p4965_p1), %s1246_s2, 2048, %s1248_s26, %s4978_s24, %s5719_s16, %s5719_s16, %s5718_s9  }
  0xbf   : > { %s1272_s15 = scalar_lea.hbm %s5693_s12, %s4973_s6  ;;  %s1267_s4 = scalar_lea.vmem [#allocation12], %s4970_s29 }
  0xc0   : > { %s1275_s10 = sshll.u32 %s1267_s4, 4  ;;  %s1273_s23 = sshll.u32 %s1272_s15, 4  ;;  %s1276_s10 = int_to_ptr.vmem [resolvable:$true] %s1275_s10  ;;  %s1274_s23 = int_to_ptr.hbm [resolvable:$true] %s1273_s23 }
  0xc1   : > { %s4258_s18 = sshra.s32 %s1274_s23, 4  ;;  %s4265_s11 = scalar_lea.hbm %s5693_s12, 256  ;;  %s4259_s18 = int_to_ptr.hbm [resolvable:$true] %s4258_s18 }
  0xc2   : > { %s4260_s28 = scalar_lea.hbm %s4259_s18, 128  ;;  %p4266_p6 = scmp.lt.s32.totalorder %s4259_s18, %s5693_s12 }
  0xc3   : > { %p4261_p5 = scmp.ne.s32.totalorder %s4259_s18, %s4260_s28  ;;  %p4267_p8 = scmp.lt.s32.totalorder %s4265_s11, %s4260_s28 }
  0xc5   : > { %p4263_p3 = pnand %p4261_p5, %p4982_p0  ;;  %p4268_p9 = por %p4267_p8, %p4266_p6 }
  0xc7   : > { %p4264_p4 = pneg %p4263_p3 }
  0xc9   : > { %p4269_p12 = pnand %p4268_p9, %p4264_p4 }
  0xcb   : > { %4272 = shalt.err (!%p4269_p12)
}
  0xcc   : > { %3846 = dma.hbm_to_vmem [thread:$0]  (!%p4965_p1), %s1274_s23, 2048, %s1276_s10, %s4978_s24, %s5719_s16, %s5719_s16, %s5718_s9  }
  0xcd   : > { %s1300_s26 = scalar_lea.hbm %s5689_s14, %s4973_s6  ;;  %s1295_s2 = scalar_lea.vmem [#allocation13], %s4970_s29 }
  0xce   : > { %s1303_s15 = sshll.u32 %s1295_s2, 4  ;;  %s1301_s4 = sshll.u32 %s1300_s26, 4  ;;  %s1304_s15 = int_to_ptr.vmem [resolvable:$true] %s1303_s15  ;;  %s1302_s4 = int_to_ptr.hbm [resolvable:$true] %s1301_s4 }
  0xcf   : > { %s4288_s18 = sshra.s32 %s1302_s4, 4  ;;  %s4295_s11 = scalar_lea.hbm %s5689_s14, 256  ;;  %s4289_s18 = int_to_ptr.hbm [resolvable:$true] %s4288_s18 }
  0xd0   : > { %s4290_s28 = scalar_lea.hbm %s4289_s18, 128  ;;  %p4296_p6 = scmp.lt.s32.totalorder %s4289_s18, %s5689_s14 }
  0xd1   : > { %p4291_p5 = scmp.ne.s32.totalorder %s4289_s18, %s4290_s28  ;;  %p4297_p8 = scmp.lt.s32.totalorder %s4295_s11, %s4290_s28 }
  0xd3   : > { %p4293_p3 = pnand %p4291_p5, %p4982_p0  ;;  %p4298_p9 = por %p4297_p8, %p4296_p6 }
  0xd5   : > { %p4294_p4 = pneg %p4293_p3 }
  0xd7   : > { %p4299_p12 = pnand %p4298_p9, %p4294_p4 }
  0xd9   : > { %4302 = shalt.err (!%p4299_p12)
}
  0xda   : > { %3849 = dma.hbm_to_vmem [thread:$0]  (!%p4965_p1), %s1302_s4, 2048, %s1304_s15, %s4978_s24, %s5719_s16, %s5719_s16, %s5718_s9  }
  0xdb   : > { %s1322_s10 = scalar_lea.hbm %s5682_s30, %s4973_s6  ;;  %s1317_s23 = scalar_lea.vmem [#allocation14], %s4970_s29 }
  0xdc   : > { %s1325_s26 = sshll.u32 %s1317_s23, 4  ;;  %s1323_s2 = sshll.u32 %s1322_s10, 4  ;;  %s1326_s26 = int_to_ptr.vmem [resolvable:$true] %s1325_s26  ;;  %s1324_s2 = int_to_ptr.hbm [resolvable:$true] %s1323_s2 }
  0xdd   : > { %s1077_s18 = sshll.u32 %s5686_s20, 4  ;;  %s4318_s28 = sshra.s32 %s1324_s2, 4  ;;  %s4319_s28 = int_to_ptr.hbm [resolvable:$true] %s4318_s28  ;;  %s1078_s18 = int_to_ptr.hbm [resolvable:$true] %s1077_s18 }
  0xde   : > { %s4320_s11 = scalar_lea.hbm %s4319_s28, 128  ;;  %s4325_s12 = scalar_lea.hbm %s5682_s30, 256 }
  0xdf   : > { %p4321_p5 = scmp.ne.s32.totalorder %s4319_s28, %s4320_s11  ;;  %p4326_p6 = scmp.lt.s32.totalorder %s4319_s28, %s5682_s30 }
  0xe0   : > { %p4327_p8 = scmp.lt.s32.totalorder %s4325_s12, %s4320_s11 }
  0xe1   : > { %p4323_p3 = pnand %p4321_p5, %p4982_p0 }
  0xe2   : > { %p4328_p9 = por %p4327_p8, %p4326_p6 }
  0xe3   : > { %p4324_p4 = pneg %p4323_p3 }
  0xe5   : > { %p4329_p12 = pnand %p4328_p9, %p4324_p4 }
  0xe7   : > { %4332 = shalt.err (!%p4329_p12)
}
  0xe8   : > { %3852 = dma.hbm_to_vmem [thread:$0]  (!%p4965_p1), %s1324_s2, 2048, %s1326_s26, %s4978_s24, %s5719_s16, %s5719_s16, %s5718_s9  }
  0xe9   : > { %s4653_s15 = smov [#allocation6]   ;;  %s1111_s10 = sshll.u32 %s5687_s19, 4  ;;  %s5076_s10 = int_to_ptr.hbm [resolvable:$true] %s1111_s10 }
  0xea   : > { %s1079_s4 = sshll.u32 %s4653_s15, 4  ;;  %s4348_s12 = sshra.s32 %s1078_s18, 4  ;;  %s1080_s4 = int_to_ptr.vmem [resolvable:$true] %s1079_s4  ;;  %s4349_s12 = int_to_ptr.hbm [resolvable:$true] %s4348_s12 }
  0xeb   : > { %s4350_s23 = scalar_lea.hbm %s4349_s12, 128  ;;  %s4355_s28 = scalar_lea.hbm %s5686_s20, 128 }
  0xec   : > { %p4351_p5 = scmp.ne.s32.totalorder %s4349_s12, %s4350_s23  ;;  %p4356_p6 = scmp.lt.s32.totalorder %s4349_s12, %s5686_s20 }
  0xed   : > { %p4357_p8 = scmp.lt.s32.totalorder %s4355_s28, %s4350_s23 }
  0xee   : > { %p4353_p3 = pnand %p4351_p5, %p4948_p2 }
  0xef   : > { %p4358_p9 = por %p4357_p8, %p4356_p6 }
  0xf0   : > { %p4354_p4 = pneg %p4353_p3 }
  0xf2   : > { %p4359_p12 = pnand %p4358_p9, %p4354_p4 }
  0xf4   : > { %4362 = shalt.err (!%p4359_p12)
}
  0xf5   : > { %3821 = dma.hbm_to_vmem [thread:$0]  (!%p4940_p13), %s1078_s18, 2048, %s1080_s4, [#allocation7], %s5719_s16, %s5719_s16, %s5718_s9  }
  0xf6   : > { %s4654_s26 = smov [#allocation18]   ;;  %s1350_s11 = scalar_lea.hbm %s5692_s3, %s4973_s6 }
  0xf7   : > { %s1113_s2 = sshll.u32 %s4654_s26, 4  ;;  %s5089_s15 = sshll.u32 %s1350_s11, 4  ;;  %s1114_s2 = int_to_ptr.vmem [resolvable:$true] %s1113_s2  ;;  %s1352_s15 = int_to_ptr.hbm [resolvable:$true] %s5089_s15 }
  0xf8   : > { %s4378_s12 = sshra.s32 %s5076_s10, 4  ;;  %s4385_s28 = scalar_lea.hbm %s5687_s19, 128  ;;  %s4379_s12 = int_to_ptr.hbm [resolvable:$true] %s4378_s12 }
  0xf9   : > { %s4380_s23 = scalar_lea.hbm %s4379_s12, 128  ;;  %p4386_p6 = scmp.lt.s32.totalorder %s4379_s12, %s5687_s19 }
  0xfa   : > { %p4381_p5 = scmp.ne.s32.totalorder %s4379_s12, %s4380_s23  ;;  %p4387_p8 = scmp.lt.s32.totalorder %s4385_s28, %s4380_s23 }
  0xfc   : > { %p4383_p3 = pnand %p4381_p5, %p4948_p2  ;;  %p4388_p9 = por %p4387_p8, %p4386_p6 }
  0xfe   : > { %p4384_p4 = pneg %p4383_p3 }
 0x100   : > { %p4389_p12 = pnand %p4388_p9, %p4384_p4 }
 0x102   : > { %4392 = shalt.err (!%p4389_p12)
}
 0x103   : > { %3827 = dma.hbm_to_vmem [thread:$0]  (!%p4940_p13), %s5076_s10, 2048, %s1114_s2, [#allocation19], %s5719_s16, %s5719_s16, %s5718_s9  }
 0x104   : > { %s1345_s18 = scalar_lea.vmem [#allocation15], %s4970_s29  ;;  %s1094_s26 = sshll.u32 %s5691_s8, 4  ;;  %s1095_s26 = int_to_ptr.hbm [resolvable:$true] %s1094_s26 }
 0x105   : > { %s1353_s4 = sshll.u32 %s1345_s18, 4  ;;  %s4408_s11 = sshra.s32 %s1352_s15, 4  ;;  %s1354_s4 = int_to_ptr.vmem [resolvable:$true] %s1353_s4  ;;  %s4409_s11 = int_to_ptr.hbm [resolvable:$true] %s4408_s11 }
 0x106   : > { %s4410_s12 = scalar_lea.hbm %s4409_s11, 128  ;;  %s4415_s23 = scalar_lea.hbm %s5692_s3, 256 }
 0x107   : > { %p4411_p5 = scmp.ne.s32.totalorder %s4409_s11, %s4410_s12  ;;  %p4416_p6 = scmp.lt.s32.totalorder %s4409_s11, %s5692_s3 }
 0x108   : > { %p4417_p8 = scmp.lt.s32.totalorder %s4415_s23, %s4410_s12 }
 0x109   : > { %p4413_p3 = pnand %p4411_p5, %p4982_p0 }
 0x10a   : > { %p4418_p9 = por %p4417_p8, %p4416_p6 }
 0x10b   : > { %p4414_p4 = pneg %p4413_p3 }
 0x10d   : > { %p4419_p12 = pnand %p4418_p9, %p4414_p4 }
 0x10f   : > { %4422 = shalt.err (!%p4419_p12)
}
 0x110   : > { %3855 = dma.hbm_to_vmem [thread:$0]  (!%p4965_p1), %s1352_s15, 2048, %s1354_s4, %s4978_s24, %s5719_s16, %s5719_s16, %s5718_s9  }
 0x111   : > { %s4655_s10 = smov [#allocation17]   ;;  %s1128_s28 = sshll.u32 %s5690_s13, 4  ;;  %s5116_s28 = int_to_ptr.hbm [resolvable:$true] %s1128_s28 }
 0x112   : > { %s1096_s2 = sshll.u32 %s4655_s10, 4  ;;  %s4438_s18 = sshra.s32 %s1095_s26, 4  ;;  %s1097_s2 = int_to_ptr.vmem [resolvable:$true] %s1096_s2  ;;  %s4439_s18 = int_to_ptr.hbm [resolvable:$true] %s4438_s18 }
 0x113   : > { %s4440_s11 = scalar_lea.hbm %s4439_s18, 128  ;;  %s4445_s12 = scalar_lea.hbm %s5691_s8, 128 }
 0x114   : > { %p4441_p5 = scmp.ne.s32.totalorder %s4439_s18, %s4440_s11  ;;  %p4446_p6 = scmp.lt.s32.totalorder %s4439_s18, %s5691_s8 }
 0x115   : > { %p4447_p8 = scmp.lt.s32.totalorder %s4445_s12, %s4440_s11 }
 0x116   : > { %p4443_p3 = pnand %p4441_p5, %p4948_p2 }
 0x117   : > { %p4448_p9 = por %p4447_p8, %p4446_p6 }
 0x118   : > { %p4444_p4 = pneg %p4443_p3 }
 0x11a   : > { %p4449_p12 = pnand %p4448_p9, %p4444_p4 }
 0x11c   : > { %4452 = shalt.err (!%p4449_p12)
}
 0x11d   : > { %3824 = dma.hbm_to_vmem [thread:$0]  (!%p4940_p13), %s1095_s26, 2048, %s1097_s2, [#allocation7], %s5719_s16, %s5719_s16, %s5718_s9  }
 0x11e   : > { %s4656_s15 = smov [#allocation20]   ;;  %s1378_s23 = scalar_lea.hbm %s5684_s25, %s4973_s6 }
 0x11f   : > { %s1130_s4 = sshll.u32 %s4656_s15, 4  ;;  %s5129_s10 = sshll.u32 %s1378_s23, 4  ;;  %s1131_s4 = int_to_ptr.vmem [resolvable:$true] %s1130_s4  ;;  %s1380_s10 = int_to_ptr.hbm [resolvable:$true] %s5129_s10 }
 0x120   : > { %s4468_s18 = sshra.s32 %s5116_s28, 4  ;;  %s4475_s12 = scalar_lea.hbm %s5690_s13, 128  ;;  %s4469_s18 = int_to_ptr.hbm [resolvable:$true] %s4468_s18 }
 0x121   : > { %s4470_s11 = scalar_lea.hbm %s4469_s18, 128  ;;  %p4476_p6 = scmp.lt.s32.totalorder %s4469_s18, %s5690_s13 }
 0x122   : > { %p4471_p5 = scmp.ne.s32.totalorder %s4469_s18, %s4470_s11  ;;  %p4477_p8 = scmp.lt.s32.totalorder %s4475_s12, %s4470_s11 }
 0x124   : > { %p4473_p3 = pnand %p4471_p5, %p4948_p2  ;;  %p4478_p9 = por %p4477_p8, %p4476_p6 }
 0x126   : > { %p4474_p4 = pneg %p4473_p3 }
 0x128   : > { %p4479_p12 = pnand %p4478_p9, %p4474_p4 }
 0x12a   : > { %4482 = shalt.err (!%p4479_p12)
}
 0x12b   : > { %3830 = dma.hbm_to_vmem [thread:$0]  (!%p4940_p13), %s5116_s28, 2048, %s1131_s4, [#allocation19], %s5719_s16, %s5719_s16, %s5718_s9  }
 0x12c   : > { %s1373_s6 = scalar_lea.vmem [#allocation16], %s4970_s29  ;;  %s4498_s26 = sshra.s32 %s1380_s10, 4  ;;  %s4499_s26 = int_to_ptr.hbm [resolvable:$true] %s4498_s26 }
 0x12d   : > { %s1381_s22 = sshll.u32 %s1373_s6, 4  ;;  %s4500_s2 = scalar_lea.hbm %s4499_s26, 128  ;;  %s1382_s22 = int_to_ptr.vmem [resolvable:$true] %s1381_s22 }
 0x12e   : > { %p4501_p2 = scmp.ne.s32.totalorder %s4499_s26, %s4500_s2  ;;  %s4505_s7 = scalar_lea.hbm %s5684_s25, 256 }
 0x12f   : > { %p4506_p4 = scmp.lt.s32.totalorder %s4499_s26, %s5684_s25  ;;  %p4507_p6 = scmp.lt.s32.totalorder %s4505_s7, %s4500_s2 }
 0x130   : > { %p4503_p5 = pnand %p4501_p2, %p4982_p0 }
 0x131   : > { %p4508_p8 = por %p4507_p6, %p4506_p4 }
 0x132   : > { %p4504_p3 = pneg %p4503_p5 }
 0x134   : > { %p4509_p9 = pnand %p4508_p8, %p4504_p3 }
 0x136   : > { %4512 = shalt.err (!%p4509_p9)
}
 0x137   : > { %3858 = dma.hbm_to_vmem [thread:$0]  (!%p4965_p1), %s1380_s10, 2048, %s1382_s22, %s4978_s24, %s5719_s16, %s5719_s16, %s5718_s9  }
 0x138   : > { %1399 = sbr.rel (%p4932_p11) target bundleno = 2632 (0xa48), region = 172 }
 0x13d   : > { %4561 = dma.done.wait (%p4919_p7), [#allocation5], 2048  }
 0x13e   : > { %4563 = vsyncadd (%p4919_p7), [#allocation5], 4294965248 }
 0x13f   : > { %4565 = dma.done.wait (%p4919_p7), [#allocation7], 2048  }
 0x140   : > { %4567 = vsyncadd (%p4919_p7), [#allocation7], 4294965248  ;;  %s5722_s5 = sadd.s32 4294967295, %s4610_s1   ;;  %s5723_s0 = sld [smem:[#allocation65_spill]] }
 0x141   : > { %s1411_s24 = sand.u32 1, %s5722_s5  }
 0x142   : > { %s1412_s4 = scalar_lea.sflag [#allocation5], %s1411_s24 }
 0x146   : > { %s1413_s9 = sand.u32 1, %s5723_s0  }
 0x147   : > { %s3667_s16 = sshll.u32 %s1413_s9, 7 }
 0x148   : > { %s5167_s23 = scalar_lea.vmem [#allocation8], %s3667_s16 }
 0x149   : > { %4569 = dma.done.wait (%p4927_p10), %s1412_s4, 18432  }
 0x14a   : > { %4571 = vsyncadd (%p4927_p10), %s1412_s4, 4294948864  ;;  %s5173_s10 = scalar_lea.vmem [#allocation9], %s3667_s16  ;;  %s5175_s18 = scalar_lea.vmem [#allocation10], %s3667_s16 }
 0x14b   : > { %s5177_s11 = scalar_lea.vmem [#allocation11], %s3667_s16  ;;  %s5179_s12 = scalar_lea.vmem [#allocation12], %s3667_s16 }
 0x14c   : > { %5725 = sst [smem:[#allocation78_spill]] %s5179_s12  ;;  %s5181_s6 = scalar_lea.vmem [#allocation13], %s3667_s16 }
 0x14d   : > { %5726 = sst [smem:[#allocation79_spill]] %s5181_s6  ;;  %s5183_s22 = scalar_lea.vmem [#allocation14], %s3667_s16 }
 0x14e   : > { %5727 = sst [smem:[#allocation80_spill]] %s5183_s22  ;;  %s5185_s26 = scalar_lea.vmem [#allocation15], %s3667_s16 }
 0x14f   : > { %5728 = sst [smem:[#allocation81_spill]] %s5185_s26  ;;  %s5187_s2 = scalar_lea.vmem [#allocation16], %s3667_s16 }
 0x150   : > { %5729 = sst [smem:[#allocation82_spill]] %s5187_s2 }
 0x151   : > { %4573 = dma.done.wait (%p4919_p7), [#allocation7], 2048  }
 0x152   : > { %4575 = vsyncadd (%p4919_p7), [#allocation7], 4294965248 }
 0x153   : > { %4577 = dma.done.wait (%p4919_p7), [#allocation19], 4096  }
 0x154   : > { %4579 = vsyncadd (%p4919_p7), [#allocation19], 4294963200  ;;  %s5730_s7 = sld [smem:[#allocation68_spill]] }
 0x155   : > { %s5731_s29 = sld [smem:[#allocation67_spill]] }
 0x156   : > { %s5732_s5 = sld [smem:[#allocation26_spill]] }
 0x157   : > { %s5733_s0 = sld [smem:[#allocation27_spill]] }
 0x158   : > { %s5734_s15 = sld [smem:[#allocation46_spill]] }
 0x159   : > { %s5735_s24 = sld [smem:[#allocation48_spill]] }
 0x15a   : > { %s5736_s9 = sld [smem:[#allocation50_spill]]  ;;  %p1672_p10 = scmp.lt.s32.totalorder %s5730_s7, 1 }
 0x15b   : > { %s5737_s16 = sld [smem:[#allocation53_spill]]  ;;  %p1682_p11 = scmp.lt.s32.totalorder %s5731_s29, 1 }
 0x15c   : > { %s5738_s4 = sld [smem:[#allocation55_spill]]  ;;  %s5788_s7 = smov (!%p1672_p10, %s5730_s7), 1 }
 0x15d   : > { %s5739_s3 = sld [smem:[#allocation57_spill]]  ;;  %s3742_s28 = sshll.u32 %s5788_s7, 4 }
 0x15e   : > { %s5740_s8 = sld [smem:[#allocation64_spill]]  ;;  %s3743_s14 = sshll.u32 %s5788_s7, 5 }
 0x15f   : > { %s5201_s13 = scalar_select %p1682_p11, %s5731_s29, 1 }
 0x160   : > { %s1676_s17 = scalar_lea.vmem %s5732_s5, %s3742_s28  ;;  %s1681_s19 = scalar_lea.vmem %s5733_s0, %s3743_s14 }
 0x161   : > { %s1684_s20 = scalar_lea.vmem %s5734_s15, %s5201_s13  ;;  %s1687_s21 = scalar_lea.vmem %s5735_s24, %s5201_s13 }
 0x162   : > { %s1690_s25 = scalar_lea.vmem %s5736_s9, %s5201_s13  ;;  %s1693_s27 = scalar_lea.vmem %s5737_s16, %s5201_s13 }
 0x163   : > { %s1696_s30 = scalar_lea.vmem %s5738_s4, %s5201_s13  ;;  %s1699_s1 = scalar_lea.vmem %s5739_s3, %s5201_s13 }
 0x164   : > { %s5218_s2 = scalar_lea.vmem %s5740_s8, %s3742_s28  ;;  %p3685_p7 = scmp.ne.s32.totalorder %s5731_s29, 0 }
 0x165   : > { %s5741_s26 = sld [smem:[#allocation31_spill]] (!%p3685_p7) }
 0x166   : > { %1708 = sbr.rel (%p3685_p7) target bundleno = 848 (0x350), region = 232  ;;  %s5742_s6 = sld [smem:[#allocation37_spill]] (!%p3685_p7) }
 0x167   : > { %s5743_s22 = sld [smem:[#allocation33_spill]] (!%p3685_p7) }
 0x168   : > { %s5746_s3 = sld [smem:[#allocation38_spill]] (!%p3685_p7) }
 0x169   : > { %s5749_s8 = sld [smem:[#allocation35_spill]] (!%p3685_p7) }
 0x16a   : > { %s5750_s14 = sld [smem:[#allocation34_spill]] (!%p3685_p7) }
 0x16b   : > { %v1711_v0 = vld [vmem:[%s5741_s26] sm:$0xff]  ;;  %vm1750_vm0 = vcmask 64512   ;;  %v1710_v4 = vld [vmem:[%s1676_s17 + $0x8] sm:$0xff]  ;;  %v1916_v6 = vld [vmem:[%s1681_s19 + $0x10] sm:$0xff] }
 0x16c   : > { %v1918_v1 = vld [vmem:[%s5742_s6] sm:$0xff]  ;;  %1772 = vmatpush.msra.mxu1 %v1711_v0  ;;  %v1915_v5 = vld [vmem:[%s1681_s19 + $0x8] sm:$0xff]  ;;  %v1917_v7 = vld [vmem:[%s1681_s19 + $0x18] sm:$0xff]  ;;  %s5752_s6 = sld [smem:[#allocation36_spill]] }
 0x16d   : > { %s5744_s12 = smov %s5743_s22  ;;  %v1709_v2 = vld [vmem:[%s1676_s17] sm:$0xff]  ;;  %1984 = vmatpush.msra.mxu3 %v1918_v1  ;;  %v1728_v8 = vld [vmem:[%s5743_s22 + $0x78] sm:$0xff]  ;;  %v1935_v12 = vld [vmem:[#allocation4 + $0x78] sm:$0xff]  ;;  %s5745_s17 = sld [smem:[#allocation32_spill]] }
 0x16e   : > { %v1914_v3 = vld [vmem:[%s1681_s19] sm:$0xff]  ;;  %3686 = vmatmul.msk.f32.vlgmr.msra.gmra.mxu1 %vm1750_vm0, %v1709_v2  ;;  %v1727_v9 = vld [vmem:[%s5744_s12 + $0x70] sm:$0xff]  ;;  %v1726_v10 = vld [vmem:[%s5744_s12 + $0x68] sm:$0xff]  ;;  %2081 = vmatpush.msra.mxu0 %v1935_v12  ;;  %s5751_s19 = sld [smem:[#allocation40_spill]] }
 0x16f   : > { %3692 = vmatmul.msk.f32.vlgmr.msra.gmra.mxu3 %vm1750_vm0, %v1914_v3  ;;  %1823 = vmatpush.msrb.mxu1 %v1728_v8  ;;  %v1725_v11 = vld [vmem:[%s5744_s12 + $0x60] sm:$0xff]  ;;  %v1724_v13 = vld [vmem:[%s5744_s12 + $0x58] sm:$0xff]  ;;  %v1723_v15 = vld [vmem:[%s5744_s12 + $0x50] sm:$0xff]  ;;  %s5753_s22 = sld [smem:[#allocation42_spill]] }
 0x170   : > { %v1934_v14 = vld [vmem:[#allocation4 + $0x70] sm:$0xff]  ;;  %v1933_v16 = vld [vmem:[#allocation4 + $0x68] sm:$0xff]  ;;  %v1722_v17 = vld [vmem:[%s5744_s12 + $0x48] sm:$0xff] }
 0x171   : > { %1824 = vmatpush.msrb.mxu1 %v1727_v9  ;;  %2082 = vmatpush.msra.mxu0 %v1934_v14  ;;  %v1932_v18 = vld [vmem:[#allocation4 + $0x60] sm:$0xff]  ;;  %v1721_v19 = vld [vmem:[%s5744_s12 + $0x40] sm:$0xff]  ;;  %v1931_v20 = vld [vmem:[#allocation4 + $0x58] sm:$0xff] }
 0x172   : > { %v1720_v21 = vld [vmem:[%s5744_s12 + $0x38] sm:$0xff]  ;;  %v1930_v22 = vld [vmem:[#allocation4 + $0x50] sm:$0xff]  ;;  %v1719_v23 = vld [vmem:[%s5744_s12 + $0x30] sm:$0xff] }
 0x173   : > { %1825 = vmatpush.msrb.mxu1 %v1726_v10  ;;  %2083 = vmatpush.msra.mxu0 %v1933_v16  ;;  %v1929_v24 = vld [vmem:[#allocation4 + $0x48] sm:$0xff]  ;;  %v1718_v25 = vld [vmem:[%s5744_s12 + $0x28] sm:$0xff]  ;;  %v1928_v26 = vld [vmem:[#allocation4 + $0x40] sm:$0xff] }
 0x174   : > { %v1717_v27 = vld [vmem:[%s5744_s12 + $0x20] sm:$0xff]  ;;  %v1927_v28 = vld [vmem:[#allocation4 + $0x38] sm:$0xff]  ;;  %v1716_v29 = vld [vmem:[%s5744_s12 + $0x18] sm:$0xff] }
 0x175   : > { %1826 = vmatpush.msrb.mxu1 %v1725_v11  ;;  %2084 = vmatpush.msra.mxu0 %v1932_v18  ;;  %v1926_v30 = vld [vmem:[#allocation4 + $0x30] sm:$0xff]  ;;  %v1715_v31 = vld [vmem:[%s5744_s12 + $0x10] sm:$0xff]  ;;  %v1925_v32 = vld [vmem:[#allocation4 + $0x28] sm:$0xff] }
 0x176   : > { %3687 = vmatmul.msk.f32.gmra.mxu1 %vm1750_vm0, %v1710_v4  ;;  %v3979_v33 = vld [vmem:[%s5745_s17] ss:$0 sm:$0xff]  ;;  %v1714_v34 = vld [vmem:[%s5744_s12 + $0x8] sm:$0xff]  ;;  %v1924_v35 = vld [vmem:[#allocation4 + $0x20] sm:$0xff] }
 0x177   : > { %3693 = vmatmul.msk.f32.gmra.mxu3 %vm1750_vm0, %v1915_v5  ;;  %1827 = vmatpush.msrb.mxu1 %v1724_v13  ;;  %v1713_v36 = vld [vmem:[%s5744_s12] sm:$0xff]  ;;  %v1923_v37 = vld [vmem:[#allocation4 + $0x18] sm:$0xff]  ;;  %v1921_v43 = vld [vmem:[#allocation4 + $0x8] sm:$0xff] }
 0x178   : > { %2085 = vmatpush.msra.mxu0 %v1931_v20  ;;  %v1922_v40 = vld [vmem:[#allocation4 + $0x10] sm:$0xff]  ;;  %v1920_v44 = vld [vmem:[#allocation4] sm:$0xff] }
 0x179   : > { %1828 = vmatpush.msrb.mxu1 %v1723_v15  ;;  %v3980_v42 = vld [vmem:[%s5746_s3] ss:$0 sm:$0xff] }
 0x17a   : > { %2086 = vmatpush.msra.mxu0 %v1930_v22 }
 0x17b   : > { %1829 = vmatpush.msrb.mxu1 %v1722_v17 }
 0x17c   : > { %2087 = vmatpush.msra.mxu0 %v1929_v24 }
 0x17d   : > { %1830 = vmatpush.msrb.mxu1 %v1721_v19 }
 0x17e   : > { %2088 = vmatpush.msra.mxu0 %v1928_v26 }
 0x17f   : > { %3694 = vmatmul.msk.f32.gmra.mxu3 %vm1750_vm0, %v1916_v6  ;;  %1831 = vmatpush.msrb.mxu1 %v1720_v21 }
 0x180   : > { %2089 = vmatpush.msra.mxu0 %v1927_v28 }
 0x181   : > { %1832 = vmatpush.msrb.mxu1 %v1719_v23 }
 0x182   : > { %2090 = vmatpush.msra.mxu0 %v1926_v30 }
 0x183   : > { %1833 = vmatpush.msrb.mxu1 %v1718_v25 }
 0x184   : > { %2091 = vmatpush.msra.mxu0 %v1925_v32 }
 0x185   : > { %1834 = vmatpush.msrb.mxu1 %v1717_v27 }
 0x186   : > { %2092 = vmatpush.msra.mxu0 %v1924_v35 }
 0x187   : > { %3695 = vmatmul.msk.f32.gmra.mxu3 %vm1750_vm0, %v1917_v7  ;;  %1835 = vmatpush.msrb.mxu1 %v1716_v29 }
 0x188   : > { %2093 = vmatpush.msra.mxu0 %v1923_v37 }
 0x189   : > { %1836 = vmatpush.msrb.mxu1 %v1715_v31 }
 0x18a   : > { %2094 = vmatpush.msra.mxu0 %v1922_v40 }
 0x18b   : > { %1837 = vmatpush.msrb.mxu1 %v1714_v34 }
 0x18c   : > { %2095 = vmatpush.msra.mxu0 %v1921_v43 }
 0x18d   : > { %1838 = vmatpush.msrb.mxu1 %v1713_v36 }
 0x18e   : > { %2096 = vmatpush.msra.mxu0 %v1920_v44 }
 0x1eb   : > { %v1774_v38 = vpop.f32.mrf.mxu1 }
 0x1ec   : > { %v5240_v39 = vadd.f32 %v3979_v33, %v1774_v38 }
 0x1ee   : > { %v3688_v41 = vmul.f32 -1.442695, %v5240_v39 }
 0x1f0   : > { %3985 = vpow2.f32 %v3688_v41 }
 0x1f2   : > { %v1986_v45 = vpop.f32.mrf.mxu3 }
 0x1f3   : > { %v5244_v46 = vadd.f32 %v3980_v42, %v1986_v45  ;;  %v1777_v47 = vpop.f32.mrf.mxu1 }
 0x1f4   : > { %v5247_v49 = vadd.f32 %v3979_v33, %v1777_v47 }
 0x1f5   : > { %v3696_v48 = vmul.f32 -1.442695, %v5244_v46 }
 0x1f6   : > { %v3986_v50 = vpop.eup %3985  ;;  %v3689_v51 = vmul.f32 -1.442695, %v5247_v49 }
 0x1f7   : > { %3987 = vpow2.f32 %v3696_v48  ;;  %v1786_v52 = vadd.f32 1.0, %v3986_v50 }
 0x1f8   : > { %3989 = vpow2.f32 %v3689_v51 }
 0x1f9   : > { %3991 = vrcp.f32 %v1786_v52  ;;  %vm1793_vm1 = vweird.f32 %v1786_v52  ;;  %v1799_v62 = vand.u32 2147483648, %v1786_v52  ;;  %v1797_v1 = vand.u32 2147483647, %v1786_v52 }
 0x1fa   : > { %v1989_v53 = vpop.f32.mrf.mxu3 }
 0x1fb   : > { %v5250_v54 = vadd.f32 %v3980_v42, %v1989_v53  ;;  %v1800_v8 = vor.u32 1.1754944e-38, %v1799_v62  ;;  %vm1798_vm4 = vcmp.eq.f32.partialorder %v1797_v1, 8.507059e+37 }
 0x1fd   : > { %v3988_v55 = vpop.eup %3987  ;;  %v3697_v56 = vmul.f32 -1.442695, %v5250_v54 }
 0x1fe   : > { %v2010_v57 = vadd.f32 1.0, %v3988_v55  ;;  %v3990_v58 = vpop.eup %3989 }
 0x1ff   : > { %3993 = vpow2.f32 %v3697_v56  ;;  %v3992_v59 = vpop.eup %3991  ;;  %v1787_v60 = vadd.f32 1.0, %v3990_v58 }
 0x200   : > { %3995 = vrcp.f32 %v2010_v57  ;;  %v1789_v61 = vmul.f32 %v3992_v59, %v1786_v52  ;;  %vm1794_vm2 = vweird.f32 %v3992_v59  ;;  %v2023_v13 = vand.u32 2147483647, %v2010_v57 }
 0x201   : > { %3997 = vrcp.f32 %v1787_v60  ;;  %vm5256_vm3 = vmor %vm1793_vm1, %vm1794_vm2  ;;  %v2025_v14 = vand.u32 2147483648, %v2010_v57  ;;  %vm1808_vm5 = vweird.f32 %v1787_v60  ;;  %v1812_v18 = vand.u32 2147483647, %v1787_v60 }
 0x202   : > { %v1992_v63 = vpop.f32.mrf.mxu3  ;;  %v1790_v0 = vsub.f32 1.0, %v1789_v61  ;;  %v1814_v21 = vand.u32 2147483648, %v1787_v60  ;;  %vm2019_vm8 = vweird.f32 %v2010_v57  ;;  %vm2024_vm10 = vcmp.eq.f32.partialorder %v2023_v13, 8.507059e+37  ;;  %v1743_v13 = vld [vmem:[%s5749_s8 + $0x68] sm:$0xff] }
 0x203   : > { %v5253_v2 = vadd.f32 %v3980_v42, %v1992_v63  ;;  %v2026_v32 = vor.u32 1.1754944e-38, %v2025_v14  ;;  %vm1813_vm12 = vcmp.eq.f32.partialorder %v1812_v18, 8.507059e+37  ;;  %v1952_v14 = vld [vmem:[#allocation6 + $0x78] sm:$0xff]  ;;  %v1950_v18 = vld [vmem:[#allocation6 + $0x68] sm:$0xff] }
 0x204   : > { %v1791_v4 = vmul.f32 %v3992_v59, %v1790_v0  ;;  %v1815_v33 = vor.u32 1.1754944e-38, %v1814_v21  ;;  %2193 = vmatpush.msrb.mxu3 %v1952_v14  ;;  %v1739_v21 = vld [vmem:[%s5749_s8 + $0x48] sm:$0xff] }
 0x205   : > { %v3994_v3 = vpop.eup %3993  ;;  %v3698_v5 = vmul.f32 -1.442695, %v5253_v2 }
 0x206   : > { %v3996_v6 = vpop.eup %3995  ;;  %v5260_v9 = vadd.f32 1.0, %v3994_v3  ;;  %v1792_v10 = vadd.f32 %v3992_v59, %v1791_v4 }
 0x207   : > { %3999 = vpow2.f32 %v3698_v5  ;;  %v2015_v11 = vmul.f32 %v3996_v6, %v2010_v57  ;;  %v3998_v12 = vpop.eup %3997  ;;  %vm2020_vm6 = vweird.f32 %v3996_v6 }
 0x208   : > { %4001 = vrcp.f32 %v5260_v9  ;;  %v1796_v15 = vsel %vm5256_vm3, %v3992_v59, %v1792_v10  ;;  %v1804_v17 = vmul.f32 %v3998_v12, %v1787_v60  ;;  %vm1809_vm7 = vweird.f32 %v3998_v12  ;;  %vm2021_vm9 = vmor %vm2019_vm8, %vm2020_vm6 }
 0x209   : > { %v2016_v16 = vsub.f32 1.0, %v2015_v11  ;;  %v1801_v19 = vsel %vm1798_vm4, %v1800_v8, %v1796_v15  ;;  %vm1810_vm11 = vmor %vm1808_vm5, %vm1809_vm7  ;;  %v2038_v45 = vand.u32 2147483647, %v5260_v9  ;;  %vm2034_vm14 = vweird.f32 %v5260_v9  ;;  %v1745_v11 = vld [vmem:[%s5749_s8 + $0x78] sm:$0xff]  ;;  %v1742_v15 = vld [vmem:[%s5749_s8 + $0x60] sm:$0xff] }
 0x20a   : > { %v1995_v20 = vpop.f32.mrf.mxu3  ;;  %v1818_v22 = vmul.f32 %v1801_v19, %v5240_v39  ;;  %v1805_v25 = vsub.f32 1.0, %v1804_v17  ;;  %1889 = vmatpush.msra.mxu2 %v1745_v11  ;;  %v1741_v17 = vld [vmem:[%s5749_s8 + $0x58] sm:$0xff]  ;;  %v1740_v19 = vld [vmem:[%s5749_s8 + $0x50] sm:$0xff] }
 0x20b   : > { %v5266_v23 = vadd.f32 %v3980_v42, %v1995_v20  ;;  %v2017_v24 = vmul.f32 %v3996_v6, %v2016_v16  ;;  %v2040_v42 = vand.u32 2147483648, %v5260_v9  ;;  %vm2039_vm0 = vcmp.eq.f32.partialorder %v2038_v45, 8.507059e+37  ;;  %v1951_v16 = vld [vmem:[#allocation6 + $0x70] sm:$0xff]  ;;  %v1949_v20 = vld [vmem:[#allocation6 + $0x60] sm:$0xff] }
 0x20c   : > { %1839 = vmatmul.f32.vlgmr.msrb.gmra.mxu1 %v1818_v22  ;;  %v1806_v29 = vmul.f32 %v3998_v12, %v1805_v25  ;;  %2194 = vmatpush.msrb.mxu3 %v1951_v16  ;;  %v1948_v22 = vld [vmem:[#allocation6 + $0x58] sm:$0xff]  ;;  %v1737_v25 = vld [vmem:[%s5749_s8 + $0x38] sm:$0xff]  ;;  %v1939_v45 = vld [vmem:[#allocation6 + $0x10] sm:$0xff] }
 0x20d   : > { %v4000_v26 = vpop.eup %3999  ;;  %v3699_v27 = vmul.f32 -1.442695, %v5266_v23  ;;  %v2018_v28 = vadd.f32 %v3996_v6, %v2017_v24  ;;  %v1947_v24 = vld [vmem:[#allocation6 + $0x50] sm:$0xff] }
 0x20e   : > { %v4002_v30 = vpop.eup %4001  ;;  %v2012_v31 = vadd.f32 1.0, %v4000_v26  ;;  %v1807_v35 = vadd.f32 %v3998_v12, %v1806_v29  ;;  %2195 = vmatpush.msrb.mxu3 %v1950_v18  ;;  %v1946_v26 = vld [vmem:[#allocation6 + $0x48] sm:$0xff]  ;;  %v1735_v29 = vld [vmem:[%s5749_s8 + $0x28] sm:$0xff] }
 0x20f   : > { %4003 = vpow2.f32 %v3699_v27  ;;  %v2022_v34 = vsel %vm2021_vm9, %v3996_v6, %v2018_v28  ;;  %v2030_v36 = vmul.f32 %v4002_v30, %v5260_v9  ;;  %vm2035_vm13 = vweird.f32 %v4002_v30  ;;  %v1736_v27 = vld [vmem:[%s5749_s8 + $0x30] sm:$0xff] }
 0x210   : > { %4005 = vrcp.f32 %v2012_v31  ;;  %v2027_v37 = vsel %vm2024_vm10, %v2026_v32, %v2022_v34  ;;  %v1811_v39 = vsel %vm1810_vm11, %v3998_v12, %v1807_v35  ;;  %vm2036_vm15 = vmor %vm2034_vm14, %vm2035_vm13  ;;  %v2055_v57 = vand.u32 2147483648, %v2012_v31  ;;  %v1744_v12 = vld [vmem:[%s5749_s8 + $0x70] sm:$0xff]  ;;  %2196 = vmatpush.msrb.mxu3 %v1949_v20  ;;  %v1943_v32 = vld [vmem:[#allocation6 + $0x30] sm:$0xff] }
 0x211   : > { %v2074_v38 = vmul.f32 %v2027_v37, %v5244_v46  ;;  %v2031_v40 = vsub.f32 1.0, %v2030_v36  ;;  %v1816_v41 = vsel %vm1813_vm12, %v1815_v33, %v1811_v39  ;;  %v2041_v46 = vor.u32 1.1754944e-38, %v2040_v42  ;;  %1890 = vmatpush.msra.mxu2 %v1744_v12  ;;  %v1945_v28 = vld [vmem:[#allocation6 + $0x40] sm:$0xff]  ;;  %v1733_v33 = vld [vmem:[%s5749_s8 + $0x18] sm:$0xff]  ;;  %v3981_v34 = vld [vmem:[%s5750_s14] ss:$0 sm:$0xff] }
 0x212   : > { %v1819_v43 = vmul.f32 %v1816_v41, %v5247_v49  ;;  %v2053_v59 = vand.u32 2147483647, %v2012_v31  ;;  %vm2049_vm2 = vweird.f32 %v2012_v31  ;;  %v2056_v62 = vor.u32 1.1754944e-38, %v2055_v57  ;;  %2197 = vmatpush.msrb.mxu3 %v1948_v22  ;;  %v1942_v35 = vld [vmem:[#allocation6 + $0x28] sm:$0xff]  ;;  %v1732_v36 = vld [vmem:[%s5749_s8 + $0x10] sm:$0xff]  ;;  %v1940_v41 = vld [vmem:[#allocation6 + $0x18] sm:$0xff] }
 0x213   : > { %2097 = vmatmul.f32.vlgmr.msra.gmra.mxu0 %v2074_v38  ;;  %v2032_v44 = vmul.f32 %v4002_v30, %v2031_v40  ;;  %1891 = vmatpush.msra.mxu2 %v1743_v13  ;;  %v1941_v37 = vld [vmem:[#allocation6 + $0x20] sm:$0xff]  ;;  %v1731_v38 = vld [vmem:[%s5749_s8 + $0x8] sm:$0xff]  ;;  %v1730_v42 = vld [vmem:[%s5749_s8] sm:$0xff] }
 0x214   : > { %1842 = vmatmul.f32.gmra.mxu1 %v1819_v43  ;;  %vm2054_vm4 = vcmp.eq.f32.partialorder %v2053_v59, 8.507059e+37  ;;  %2198 = vmatpush.msrb.mxu3 %v1947_v24 }
 0x215   : > { %v4004_v47 = vpop.eup %4003  ;;  %v2033_v48 = vadd.f32 %v4002_v30, %v2032_v44  ;;  %1892 = vmatpush.msra.mxu2 %v1742_v15  ;;  %v3982_v44 = vld [vmem:[%s5751_s19] ss:$0 sm:$0xff] }
 0x216   : > { %v4006_v50 = vpop.eup %4005  ;;  %v2013_v51 = vadd.f32 1.0, %v4004_v47  ;;  %2199 = vmatpush.msrb.mxu3 %v1946_v26  ;;  %v1938_v47 = vld [vmem:[#allocation6 + $0x8] sm:$0xff] }
 0x217   : > { %v2037_v52 = vsel %vm2036_vm15, %v4002_v30, %v2033_v48  ;;  %v2045_v53 = vmul.f32 %v4006_v50, %v2012_v31  ;;  %vm2050_vm1 = vweird.f32 %v4006_v50  ;;  %1893 = vmatpush.msra.mxu2 %v1741_v17  ;;  %v1944_v30 = vld [vmem:[#allocation6 + $0x38] sm:$0xff]  ;;  %v1734_v31 = vld [vmem:[%s5749_s8 + $0x20] sm:$0xff] }
 0x218   : > { %4007 = vrcp.f32 %v2013_v51  ;;  %v2042_v55 = vsel %vm2039_vm0, %v2041_v46, %v2037_v52  ;;  %vm2051_vm3 = vmor %vm2049_vm2, %vm2050_vm1  ;;  %v2068_v6 = vand.u32 2147483647, %v2013_v51  ;;  %vm2064_vm6 = vweird.f32 %v2013_v51  ;;  %2200 = vmatpush.msrb.mxu3 %v1945_v28 }
 0x219   : > { %v2075_v49 = vmul.f32 %v2042_v55, %v5250_v54  ;;  %v2046_v56 = vsub.f32 1.0, %v2045_v53  ;;  %v2070_v54 = vand.u32 2147483648, %v2013_v51  ;;  %1894 = vmatpush.msra.mxu2 %v1740_v19 }
 0x21a   : > { %vm2069_vm8 = vcmp.eq.f32.partialorder %v2068_v6, 8.507059e+37  ;;  %2201 = vmatpush.msrb.mxu3 %v1944_v30 }
 0x21b   : > { %2100 = vmatmul.f32.gmra.mxu0 %v2075_v49  ;;  %v2047_v58 = vmul.f32 %v4006_v50, %v2046_v56  ;;  %v2071_v8 = vor.u32 1.1754944e-38, %v2070_v54  ;;  %1895 = vmatpush.msra.mxu2 %v1739_v21 }
 0x21c   : > { %2202 = vmatpush.msrb.mxu3 %v1943_v32 }
 0x21d   : > { %v2048_v60 = vadd.f32 %v4006_v50, %v2047_v58 }
 0x21e   : > { %v4008_v61 = vpop.eup %4007  ;;  %2203 = vmatpush.msrb.mxu3 %v1942_v35 }
 0x21f   : > { %v2052_v63 = vsel %vm2051_vm3, %v4006_v50, %v2048_v60  ;;  %v2060_v0 = vmul.f32 %v4008_v61, %v2013_v51  ;;  %vm2065_vm5 = vweird.f32 %v4008_v61  ;;  %v1937_v51 = vld [vmem:[#allocation6] sm:$0xff] }
 0x220   : > { %v2057_v1 = vsel %vm2054_vm4, %v2056_v62, %v2052_v63  ;;  %vm2066_vm7 = vmor %vm2064_vm6, %vm2065_vm5  ;;  %2204 = vmatpush.msrb.mxu3 %v1941_v37 }
 0x221   : > { %v2076_v3 = vmul.f32 %v2057_v1, %v5253_v2  ;;  %v2061_v4 = vsub.f32 1.0, %v2060_v0 }
 0x222   : > { %2205 = vmatpush.msrb.mxu3 %v1940_v41 }
 0x223   : > { %2103 = vmatmul.f32.gmra.mxu0 %v2076_v3  ;;  %v2062_v5 = vmul.f32 %v4008_v61, %v2061_v4 }
 0x224   : > { %2206 = vmatpush.msrb.mxu3 %v1939_v45 }
 0x225   : > { %v2063_v7 = vadd.f32 %v4008_v61, %v2062_v5 }
 0x226   : > { %2207 = vmatpush.msrb.mxu3 %v1938_v47 }
 0x227   : > { %v2067_v9 = vsel %vm2066_vm7, %v4008_v61, %v2063_v7 }
 0x228   : > { %v2072_v10 = vsel %vm2069_vm8, %v2071_v8, %v2067_v9  ;;  %2208 = vmatpush.msrb.mxu3 %v1937_v51 }
 0x229   : > { %v2077_v2 = vmul.f32 %v2072_v10, %v5266_v23  ;;  %v1738_v23 = vld [vmem:[%s5749_s8 + $0x40] sm:$0xff] }
 0x22a   : > { %1896 = vmatpush.msra.mxu2 %v1738_v23 }
 0x22b   : > { %2106 = vmatmul.f32.gmra.mxu0 %v2077_v2 }
 0x22c   : > { %1897 = vmatpush.msra.mxu2 %v1737_v25 }
 0x22e   : > { %1898 = vmatpush.msra.mxu2 %v1736_v27 }
 0x230   : > { %1899 = vmatpush.msra.mxu2 %v1735_v29 }
 0x232   : > { %1900 = vmatpush.msra.mxu2 %v1734_v31 }
 0x234   : > { %1901 = vmatpush.msra.mxu2 %v1733_v33 }
 0x236   : > { %1902 = vmatpush.msra.mxu2 %v1732_v36 }
 0x238   : > { %1903 = vmatpush.msra.mxu2 %v1731_v38 }
 0x23a   : > { %1904 = vmatpush.msra.mxu2 %v1730_v42 }
 0x289   : > { %v1840_v39 = vpop.f32.mrf.mxu1 }
 0x28a   : > { %v5296_v40 = vadd.f32 %v3981_v34, %v1840_v39 }
 0x28c   : > { %v3690_v43 = vmul.f32 -1.442695, %v5296_v40 }
 0x28e   : > { %4009 = vpow2.f32 %v3690_v43 }
 0x290   : > { %v2098_v48 = vpop.f32.mrf.mxu0 }
 0x291   : > { %v5301_v50 = vadd.f32 %v3982_v44, %v2098_v48  ;;  %v1843_v46 = vpop.f32.mrf.mxu1 }
 0x292   : > { %v5304_v53 = vadd.f32 %v3981_v34, %v1843_v46 }
 0x293   : > { %v3700_v52 = vmul.f32 -1.442695, %v5301_v50 }
 0x294   : > { %v4010_v55 = vpop.eup %4009  ;;  %v3691_v49 = vmul.f32 -1.442695, %v5304_v53 }
 0x295   : > { %4011 = vpow2.f32 %v3700_v52  ;;  %v1852_v56 = vadd.f32 1.0, %v4010_v55 }
 0x296   : > { %4013 = vpow2.f32 %v3691_v49 }
 0x297   : > { %4015 = vrcp.f32 %v1852_v56  ;;  %v1865_v5 = vand.u32 2147483648, %v1852_v56  ;;  %v1863_v9 = vand.u32 2147483647, %v1852_v56  ;;  %vm1859_vm10 = vweird.f32 %v1852_v56 }
 0x298   : > { %v2101_v57 = vpop.f32.mrf.mxu0 }
 0x299   : > { %v5307_v58 = vadd.f32 %v3982_v44, %v2101_v57  ;;  %v1866_v13 = vor.u32 1.1754944e-38, %v1865_v5  ;;  %vm1864_vm12 = vcmp.eq.f32.partialorder %v1863_v9, 8.507059e+37 }
 0x29b   : > { %v4012_v59 = vpop.eup %4011  ;;  %v3701_v60 = vmul.f32 -1.442695, %v5307_v58 }
 0x29c   : > { %v2122_v61 = vadd.f32 1.0, %v4012_v59  ;;  %v4014_v62 = vpop.eup %4013 }
 0x29d   : > { %4017 = vpow2.f32 %v3701_v60  ;;  %v4016_v63 = vpop.eup %4015  ;;  %v1853_v0 = vadd.f32 1.0, %v4014_v62 }
 0x29e   : > { %4019 = vrcp.f32 %v2122_v61  ;;  %v1855_v1 = vmul.f32 %v4016_v63, %v1852_v56  ;;  %vm1860_vm9 = vweird.f32 %v4016_v63  ;;  %v2137_v16 = vand.u32 2147483648, %v2122_v61 }
 0x29f   : > { %4021 = vrcp.f32 %v1853_v0  ;;  %vm1861_vm11 = vmor %vm1859_vm10, %vm1860_vm9  ;;  %v2135_v18 = vand.u32 2147483647, %v2122_v61  ;;  %vm2131_vm14 = vweird.f32 %v2122_v61  ;;  %v1880_v30 = vand.u32 2147483648, %v1853_v0 }
 0x2a0   : > { %v2104_v3 = vpop.f32.mrf.mxu0  ;;  %v1856_v54 = vsub.f32 1.0, %v1855_v1  ;;  %v2138_v28 = vor.u32 1.1754944e-38, %v2137_v16  ;;  %v1878_v34 = vand.u32 2147483647, %v1853_v0  ;;  %vm1874_vm2 = vweird.f32 %v1853_v0  ;;  %v3984_v16 = vld [vmem:[%s5753_s22] ss:$0 sm:$0xff] }
 0x2a1   : > { %v5310_v4 = vadd.f32 %v3982_v44, %v2104_v3  ;;  %vm2136_vm1 = vcmp.eq.f32.partialorder %v2135_v18, 8.507059e+37 }
 0x2a2   : > { %v1857_v8 = vmul.f32 %v4016_v63, %v1856_v54  ;;  %vm1879_vm4 = vcmp.eq.f32.partialorder %v1878_v34, 8.507059e+37 }
 0x2a3   : > { %v4018_v6 = vpop.eup %4017  ;;  %v3702_v7 = vmul.f32 -1.442695, %v5310_v4 }
 0x2a4   : > { %v4020_v10 = vpop.eup %4019  ;;  %v5313_v2 = vadd.f32 1.0, %v4018_v6  ;;  %v1858_v12 = vadd.f32 %v4016_v63, %v1857_v8 }
 0x2a5   : > { %v2127_v11 = vmul.f32 %v4020_v10, %v2122_v61  ;;  %4023 = vpow2.f32 %v3702_v7  ;;  %v4022_v14 = vpop.eup %4021  ;;  %vm2132_vm13 = vweird.f32 %v4020_v10 }
 0x2a6   : > { %4025 = vrcp.f32 %v5313_v2  ;;  %v1862_v17 = vsel %vm1861_vm11, %v4016_v63, %v1858_v12  ;;  %v1870_v21 = vmul.f32 %v4022_v14, %v1853_v0  ;;  %vm2133_vm15 = vmor %vm2131_vm14, %vm2132_vm13  ;;  %vm1875_vm0 = vweird.f32 %v4022_v14 }
 0x2a7   : > { %v2128_v15 = vsub.f32 1.0, %v2127_v11  ;;  %v1867_v20 = vsel %vm1864_vm12, %v1866_v13, %v1862_v17  ;;  %vm1876_vm3 = vmor %vm1874_vm2, %vm1875_vm0  ;;  %v2152_v43 = vand.u32 2147483648, %v5313_v2  ;;  %v2150_v47 = vand.u32 2147483647, %v5313_v2 }
 0x2a8   : > { %v2107_v19 = vpop.f32.mrf.mxu0  ;;  %v1884_v24 = vmul.f32 %v1867_v20, %v5296_v40  ;;  %v1871_v25 = vsub.f32 1.0, %v1870_v21  ;;  %v1881_v40 = vor.u32 1.1754944e-38, %v1880_v30  ;;  %vm2146_vm6 = vweird.f32 %v5313_v2 }
 0x2a9   : > { %v2129_v22 = vmul.f32 %v4020_v10, %v2128_v15  ;;  %v5316_v23 = vadd.f32 %v3982_v44, %v2107_v19  ;;  %v2153_v55 = vor.u32 1.1754944e-38, %v2152_v43  ;;  %vm2151_vm8 = vcmp.eq.f32.partialorder %v2150_v47, 8.507059e+37 }
 0x2aa   : > { %1905 = vmatmul.f32.vlgmr.msra.gmra.mxu2 %v1884_v24  ;;  %v1872_v33 = vmul.f32 %v4022_v14, %v1871_v25 }
 0x2ab   : > { %v4024_v26 = vpop.eup %4023  ;;  %v2130_v27 = vadd.f32 %v4020_v10, %v2129_v22  ;;  %v3703_v29 = vmul.f32 -1.442695, %v5316_v23 }
 0x2ac   : > { %v4026_v31 = vpop.eup %4025  ;;  %v2124_v32 = vadd.f32 1.0, %v4024_v26  ;;  %v1873_v38 = vadd.f32 %v4022_v14, %v1872_v33 }
 0x2ad   : > { %v2134_v35 = vsel %vm2133_vm15, %v4020_v10, %v2130_v27  ;;  %4027 = vpow2.f32 %v3703_v29  ;;  %v2142_v36 = vmul.f32 %v4026_v31, %v5313_v2  ;;  %vm2147_vm5 = vweird.f32 %v4026_v31 }
 0x2ae   : > { %v2139_v37 = vsel %vm2136_vm1, %v2138_v28, %v2134_v35  ;;  %4029 = vrcp.f32 %v2124_v32  ;;  %v1877_v42 = vsel %vm1876_vm3, %v4022_v14, %v1873_v38  ;;  %vm2148_vm7 = vmor %vm2146_vm6, %vm2147_vm5  ;;  %v2167_v61 = vand.u32 2147483648, %v2124_v32  ;;  %v3983_v14 = vld [vmem:[%s5752_s6] ss:$0 sm:$0xff] }
 0x2af   : > { %v2186_v39 = vmul.f32 %v2139_v37, %v5301_v50  ;;  %v2143_v41 = vsub.f32 1.0, %v2142_v36  ;;  %v1882_v44 = vsel %vm1879_vm4, %v1881_v40, %v1877_v42  ;;  %v2165_v62 = vand.u32 2147483647, %v2124_v32 }
 0x2b0   : > { %v1885_v48 = vmul.f32 %v1882_v44, %v5304_v53  ;;  %vm2161_vm10 = vweird.f32 %v2124_v32  ;;  %v2168_v1 = vor.u32 1.1754944e-38, %v2167_v61 }
 0x2b1   : > { %2209 = vmatmul.f32.vlgmr.msrb.gmra.mxu3 %v2186_v39  ;;  %v2144_v45 = vmul.f32 %v4026_v31, %v2143_v41  ;;  %vm2166_vm12 = vcmp.eq.f32.partialorder %v2165_v62, 8.507059e+37 }
 0x2b2   : > { %1908 = vmatmul.f32.gmra.mxu2 %v1885_v48 }
 0x2b3   : > { %v4028_v51 = vpop.eup %4027  ;;  %v2145_v46 = vadd.f32 %v4026_v31, %v2144_v45 }
 0x2b4   : > { %v4030_v50 = vpop.eup %4029  ;;  %v2125_v52 = vadd.f32 1.0, %v4028_v51 }
 0x2b5   : > { %v2149_v49 = vsel %vm2148_vm7, %v4026_v31, %v2145_v46  ;;  %v2157_v56 = vmul.f32 %v4030_v50, %v2124_v32  ;;  %vm2162_vm9 = vweird.f32 %v4030_v50 }
 0x2b6   : > { %4031 = vrcp.f32 %v2125_v52  ;;  %v2154_v57 = vsel %vm2151_vm8, %v2153_v55, %v2149_v49  ;;  %vm2163_vm11 = vmor %vm2161_vm10, %vm2162_vm9  ;;  %v2180_v9 = vand.u32 2147483647, %v2125_v52  ;;  %vm2176_vm14 = vweird.f32 %v2125_v52 }
 0x2b7   : > { %v2187_v59 = vmul.f32 %v2154_v57, %v5307_v58  ;;  %v2158_v60 = vsub.f32 1.0, %v2157_v56  ;;  %v2182_v58 = vand.u32 2147483648, %v2125_v52 }
 0x2b8   : > { %vm2181_vm0 = vcmp.eq.f32.partialorder %v2180_v9, 8.507059e+37 }
 0x2b9   : > { %2212 = vmatmul.f32.gmra.mxu3 %v2187_v59  ;;  %v2159_v53 = vmul.f32 %v4030_v50, %v2158_v60  ;;  %v2183_v2 = vor.u32 1.1754944e-38, %v2182_v58 }
 0x2bb   : > { %v2160_v63 = vadd.f32 %v4030_v50, %v2159_v53 }
 0x2bc   : > { %v4032_v0 = vpop.eup %4031 }
 0x2bd   : > { %v2164_v3 = vsel %vm2163_vm11, %v4030_v50, %v2160_v63  ;;  %v2172_v54 = vmul.f32 %v4032_v0, %v2125_v52  ;;  %vm2177_vm13 = vweird.f32 %v4032_v0 }
 0x2be   : > { %v2169_v5 = vsel %vm2166_vm12, %v2168_v1, %v2164_v3  ;;  %vm2178_vm15 = vmor %vm2176_vm14, %vm2177_vm13 }
 0x2bf   : > { %v2188_v6 = vmul.f32 %v2169_v5, %v5310_v4  ;;  %v2173_v7 = vsub.f32 1.0, %v2172_v54 }
 0x2c1   : > { %2215 = vmatmul.f32.gmra.mxu3 %v2188_v6  ;;  %v2174_v8 = vmul.f32 %v4032_v0, %v2173_v7 }
 0x2c3   : > { %v2175_v10 = vadd.f32 %v4032_v0, %v2174_v8 }
 0x2c5   : > { %v2179_v11 = vsel %vm2178_vm15, %v4032_v0, %v2175_v10 }
 0x2c6   : > { %v2184_v12 = vsel %vm2181_vm0, %v2183_v2, %v2179_v11 }
 0x2c7   : > { %v2189_v13 = vmul.f32 %v2184_v12, %v5316_v23 }
 0x2c9   : > { %2218 = vmatmul.f32.gmra.mxu3 %v2189_v13 }
 0x32d   : > { %v1906_v4 = vpop.f32.mrf.mxu2 }
 0x32e   : > { %v1907_v15 = vadd.f32 %v3983_v14, %v1906_v4 }
 0x330   : > { %1912 = vst [vmem:[#allocation2] sm:$0xff] %v1907_v15 }
 0x334   : > { %v2210_v17 = vpop.f32.mrf.mxu3 }
 0x335   : > { %v2211_v18 = vadd.f32 %v3984_v16, %v2210_v17  ;;  %v1909_v19 = vpop.f32.mrf.mxu2 }
 0x336   : > { %v1910_v20 = vadd.f32 %v3983_v14, %v1909_v19 }
 0x337   : > { %2222 = vst [vmem:[#allocation3 + $0x8] sm:$0xff] %v2211_v18 }
 0x338   : > { %1913 = vst [vmem:[#allocation2 + $0x8] sm:$0xff] %v1910_v20 }
 0x33c   : > { %v2213_v21 = vpop.f32.mrf.mxu3 }
 0x33d   : > { %v2214_v22 = vadd.f32 %v3984_v16, %v2213_v21 }
 0x33f   : > { %2223 = vst [vmem:[#allocation3 + $0x10] sm:$0xff] %v2214_v22 }
 0x344   : > { %v2216_v24 = vpop.f32.mrf.mxu3 }
 0x345   : > { %v2217_v25 = vadd.f32 %v3984_v16, %v2216_v24 }
 0x347   : > { %2224 = vst [vmem:[#allocation3] sm:$0xff] %v2217_v25 }
 0x34c   : > { %v2219_v26 = vpop.f32.mrf.mxu3 }
 0x34d   : > { %v2220_v23 = vadd.f32 %v3984_v16, %v2219_v26 }
 0x34f   : > { %2225 = vst [vmem:[#allocation3 + $0x18] sm:$0xff] %v2220_v23 }
 0x350 PF: > { %v2247_v27 = vld [vmem:[%s5173_s10 + $0x78] sm:$0xff]  ;;  %v2246_v28 = vld [vmem:[%s5173_s10 + $0x70] sm:$0xff]  ;;  %v2245_v29 = vld [vmem:[%s5173_s10 + $0x68] sm:$0xff]  ;;  %vm2330_vm1 = vcmask 130048   ;;  %s5761_s26 = sld [smem:[#allocation80_spill]] }
 0x351   : > { %2248 = vmatpush.msra.mxu0 %v2247_v27  ;;  %v2286_v30 = vld [vmem:[%s5175_s18 + $0x78] sm:$0xff]  ;;  %v2244_v31 = vld [vmem:[%s5173_s10 + $0x60] sm:$0xff]  ;;  %v2285_v32 = vld [vmem:[%s5175_s18 + $0x70] sm:$0xff]  ;;  %s5762_s29 = sld [smem:[#allocation79_spill]] }
 0x352   : > { %2287 = vmatpush.msra.mxu1 %v2286_v30  ;;  %v2284_v33 = vld [vmem:[%s5175_s18 + $0x68] sm:$0xff]  ;;  %v2243_v34 = vld [vmem:[%s5173_s10 + $0x58] sm:$0xff]  ;;  %v2283_v35 = vld [vmem:[%s5175_s18 + $0x60] sm:$0xff]  ;;  %s5764_s5 = sld [smem:[#allocation81_spill]] }
 0x353   : > { %2249 = vmatpush.msra.mxu0 %v2246_v28  ;;  %v2242_v36 = vld [vmem:[%s5173_s10 + $0x50] sm:$0xff]  ;;  %v2282_v37 = vld [vmem:[%s5175_s18 + $0x58] sm:$0xff]  ;;  %v2241_v38 = vld [vmem:[%s5173_s10 + $0x48] sm:$0xff]  ;;  %s5769_s24 = sld [smem:[#allocation67_spill]] }
 0x354   : > { %2288 = vmatpush.msra.mxu1 %v2285_v32  ;;  %v2281_v39 = vld [vmem:[%s5175_s18 + $0x50] sm:$0xff]  ;;  %v2325_v40 = vld [vmem:[%s5167_s23 + $0x78] sm:$0xff]  ;;  %v2240_v42 = vld [vmem:[%s5173_s10 + $0x40] sm:$0xff] }
 0x355   : > { %2250 = vmatpush.msra.mxu0 %v2245_v29  ;;  %v2324_v41 = vld [vmem:[%s5167_s23 + $0x70] sm:$0xff]  ;;  %2372 = vmatpush.msra.mxu3 %v2325_v40  ;;  %v2239_v43 = vld [vmem:[%s5173_s10 + $0x38] sm:$0xff]  ;;  %v2280_v44 = vld [vmem:[%s5175_s18 + $0x48] sm:$0xff] }
 0x356   : > { %2289 = vmatpush.msra.mxu1 %v2284_v33  ;;  %v2323_v45 = vld [vmem:[%s5167_s23 + $0x68] sm:$0xff]  ;;  %v2279_v47 = vld [vmem:[%s5175_s18 + $0x40] sm:$0xff]  ;;  %v2238_v51 = vld [vmem:[%s5173_s10 + $0x30] sm:$0xff] }
 0x357   : > { %2251 = vmatpush.msra.mxu0 %v2244_v31  ;;  %2373 = vmatpush.msra.mxu3 %v2324_v41  ;;  %v2322_v48 = vld [vmem:[%s5167_s23 + $0x60] sm:$0xff]  ;;  %v2278_v46 = vld [vmem:[%s5175_s18 + $0x38] sm:$0xff]  ;;  %v2237_v52 = vld [vmem:[%s5173_s10 + $0x28] sm:$0xff] }
 0x358   : > { %2290 = vmatpush.msra.mxu1 %v2283_v35  ;;  %v2321_v50 = vld [vmem:[%s5167_s23 + $0x58] sm:$0xff]  ;;  %v2277_v55 = vld [vmem:[%s5175_s18 + $0x30] sm:$0xff]  ;;  %v2236_v56 = vld [vmem:[%s5173_s10 + $0x20] sm:$0xff] }
 0x359   : > { %2252 = vmatpush.msra.mxu0 %v2243_v34  ;;  %2374 = vmatpush.msra.mxu3 %v2323_v45  ;;  %v2320_v49 = vld [vmem:[%s5167_s23 + $0x50] sm:$0xff]  ;;  %v2276_v57 = vld [vmem:[%s5175_s18 + $0x28] sm:$0xff]  ;;  %v2235_v60 = vld [vmem:[%s5173_s10 + $0x18] sm:$0xff]  ;;  %p3726_p13 = scmp.ne.s32.totalorder %s5769_s24, 1 }
 0x35a   : > { %2291 = vmatpush.msra.mxu1 %v2282_v37  ;;  %v2319_v59 = vld [vmem:[%s5167_s23 + $0x48] sm:$0xff]  ;;  %v2275_v61 = vld [vmem:[%s5175_s18 + $0x20] sm:$0xff]  ;;  %v2234_v62 = vld [vmem:[%s5173_s10 + $0x10] sm:$0xff]  ;;  %s5770_s13 = sld [smem:[#allocation59_spill]] (!%p3726_p13) }
 0x35b   : > { %2253 = vmatpush.msra.mxu0 %v2242_v36  ;;  %2375 = vmatpush.msra.mxu3 %v2322_v48  ;;  %v2318_v53 = vld [vmem:[%s5167_s23 + $0x40] sm:$0xff]  ;;  %v2274_v63 = vld [vmem:[%s5175_s18 + $0x18] sm:$0xff]  ;;  %v2233_v1 = vld [vmem:[%s5173_s10 + $0x8] sm:$0xff]  ;;  %s5772_s9 = sld [smem:[#allocation63_spill]] (!%p3726_p13) }
 0x35c   : > { %2292 = vmatpush.msra.mxu1 %v2281_v39  ;;  %v2317_v0 = vld [vmem:[%s5167_s23 + $0x38] sm:$0xff]  ;;  %v2273_v3 = vld [vmem:[%s5175_s18 + $0x10] sm:$0xff]  ;;  %v2232_v5 = vld [vmem:[%s5173_s10] sm:$0xff]  ;;  %s5754_s10 = sld [smem:[#allocation28_spill]] }
 0x35d   : > { %2254 = vmatpush.msra.mxu0 %v2241_v38  ;;  %2376 = vmatpush.msra.mxu3 %v2321_v50  ;;  %v2316_v54 = vld [vmem:[%s5167_s23 + $0x30] sm:$0xff]  ;;  %v2272_v7 = vld [vmem:[%s5175_s18 + $0x8] sm:$0xff]  ;;  %v2271_v58 = vld [vmem:[%s5175_s18] sm:$0xff] }
 0x35e   : > { %2293 = vmatpush.msra.mxu1 %v2280_v44  ;;  %v5371_v6 = vld [vmem:[#allocation2] sm:$0xff]  ;;  %v5377_v8 = vld [vmem:[#allocation2 + $0x8] sm:$0xff]  ;;  %v2315_v9 = vld [vmem:[%s5167_s23 + $0x28] sm:$0xff] }
 0x35f   : > { %2255 = vmatpush.msra.mxu0 %v2240_v42  ;;  %2377 = vmatpush.msra.mxu3 %v2320_v49  ;;  %v2314_v10 = vld [vmem:[%s5167_s23 + $0x20] sm:$0xff]  ;;  %v2313_v2 = vld [vmem:[%s5167_s23 + $0x18] sm:$0xff]  ;;  %v2312_v11 = vld [vmem:[%s5167_s23 + $0x10] sm:$0xff] }
 0x360   : > { %2294 = vmatpush.msra.mxu1 %v2279_v47  ;;  %v2311_v12 = vld [vmem:[%s5167_s23 + $0x8] sm:$0xff]  ;;  %v2310_v13 = vld [vmem:[%s5167_s23] sm:$0xff]  ;;  %v5390_v4 = vld [vmem:[#allocation3 + $0x10] sm:$0xff]  ;;  %s5755_s23 = sld [smem:[#allocation29_spill]] }
 0x361   : > { %2256 = vmatpush.msra.mxu0 %v2239_v43  ;;  %2378 = vmatpush.msra.mxu3 %v2319_v59  ;;  %v5387_v14 = vld [vmem:[#allocation3 + $0x8] sm:$0xff]  ;;  %v5393_v15 = vld [vmem:[#allocation3] sm:$0xff]  ;;  %v5396_v18 = vld [vmem:[#allocation3 + $0x18] sm:$0xff] }
 0x362   : > { %2295 = vmatpush.msra.mxu1 %v2278_v46  ;;  %v2326_v20 = vld [vmem:[%s5754_s10] sm:$0xff]  ;;  %v2327_v22 = vld [vmem:[%s5754_s10 + $0x8] sm:$0xff]  ;;  %v2328_v24 = vld [vmem:[%s5754_s10 + $0x10] sm:$0xff] }
 0x363   : > { %2257 = vmatpush.msra.mxu0 %v2238_v51  ;;  %2379 = vmatpush.msra.mxu3 %v2318_v53  ;;  %v2329_v25 = vld [vmem:[%s5754_s10 + $0x18] sm:$0xff]  ;;  %v2553_v30 = vld [vmem:[%s5177_s11 + $0x78] sm:$0xff]  ;;  %v2552_v31 = vld [vmem:[%s5177_s11 + $0x70] sm:$0xff] }
 0x364   : > { %2296 = vmatpush.msra.mxu1 %v2277_v55  ;;  %v2551_v32 = vld [vmem:[%s5177_s11 + $0x68] sm:$0xff]  ;;  %v2550_v34 = vld [vmem:[%s5177_s11 + $0x60] sm:$0xff]  ;;  %v2549_v35 = vld [vmem:[%s5177_s11 + $0x58] sm:$0xff] }
 0x365   : > { %2258 = vmatpush.msra.mxu0 %v2237_v52  ;;  %2380 = vmatpush.msra.mxu3 %v2317_v0  ;;  %v2548_v36 = vld [vmem:[%s5177_s11 + $0x50] sm:$0xff]  ;;  %v2547_v37 = vld [vmem:[%s5177_s11 + $0x48] sm:$0xff]  ;;  %v2546_v39 = vld [vmem:[%s5177_s11 + $0x40] sm:$0xff] }
 0x366   : > { %2297 = vmatpush.msra.mxu1 %v2276_v57  ;;  %s5756_s7 = smov %s5755_s23  ;;  %v2401_v26 = vld [vmem:[%s5755_s23] sm:$0xff]  ;;  %v2545_v40 = vld [vmem:[%s5177_s11 + $0x38] sm:$0xff]  ;;  %v2543_v43 = vld [vmem:[%s5177_s11 + $0x28] sm:$0xff] }
 0x367   : > { %2259 = vmatpush.msra.mxu0 %v2236_v56  ;;  %2381 = vmatpush.msra.mxu3 %v2316_v54  ;;  %v2402_v23 = vld [vmem:[%s5756_s7 + $0x8] sm:$0xff]  ;;  %v2403_v27 = vld [vmem:[%s5756_s7 + $0x10] sm:$0xff]  ;;  %v2404_v28 = vld [vmem:[%s5756_s7 + $0x18] sm:$0xff] }
 0x368   : > { %2298 = vmatpush.msra.mxu1 %v2275_v61  ;;  %v2544_v41 = vld [vmem:[%s5177_s11 + $0x30] sm:$0xff]  ;;  %v2542_v45 = vld [vmem:[%s5177_s11 + $0x20] sm:$0xff]  ;;  %v2541_v47 = vld [vmem:[%s5177_s11 + $0x18] sm:$0xff] }
 0x369   : > { %2260 = vmatpush.msra.mxu0 %v2235_v60  ;;  %2382 = vmatpush.msra.mxu3 %v2315_v9  ;;  %v2540_v48 = vld [vmem:[%s5177_s11 + $0x10] sm:$0xff]  ;;  %v2539_v50 = vld [vmem:[%s5177_s11 + $0x8] sm:$0xff]  ;;  %v2538_v56 = vld [vmem:[%s5177_s11] sm:$0xff] }
 0x36a   : > { %2299 = vmatpush.msra.mxu1 %v2274_v63  ;;  %v4033_v46 = vld [vmem:[%s1684_s20] ss:$0 sm:$0xff]  ;;  %s5758_s20 = sld [smem:[#allocation78_spill]] }
 0x36b   : > { %2261 = vmatpush.msra.mxu0 %v2234_v62  ;;  %2383 = vmatpush.msra.mxu3 %v2314_v10 }
 0x36c   : > { %2300 = vmatpush.msra.mxu1 %v2273_v3 }
 0x36d   : > { %2262 = vmatpush.msra.mxu0 %v2233_v1  ;;  %2384 = vmatpush.msra.mxu3 %v2313_v2 }
 0x36e   : > { %2301 = vmatpush.msra.mxu1 %v2272_v7 }
 0x36f   : > { %2263 = vmatpush.msra.mxu0 %v2232_v5  ;;  %2385 = vmatpush.msra.mxu3 %v2312_v11 }
 0x370   : > { %2264 = vmatmul.f32.vlgmr.msra.gmra.mxu0 %v5371_v6  ;;  %2302 = vmatpush.msra.mxu1 %v2271_v58 }
 0x371   : > { %2303 = vmatmul.f32.vlgmr.msra.gmra.mxu1 %v5371_v6  ;;  %2386 = vmatpush.msra.mxu3 %v2311_v12 }
 0x372   : > { %2558 = vmatpush.msrb.mxu0 %v2553_v30 }
 0x373   : > { %2387 = vmatpush.msra.mxu3 %v2310_v13 }
 0x374   : > { %2388 = vmatmul.f32.vlgmr.msra.gmra.mxu3 %v5387_v14  ;;  %2559 = vmatpush.msrb.mxu0 %v2552_v31 }
 0x376   : > { %2560 = vmatpush.msrb.mxu0 %v2551_v32 }
 0x378   : > { %2267 = vmatmul.f32.gmra.mxu0 %v5377_v8 }
 0x379   : > { %2306 = vmatmul.f32.gmra.mxu1 %v5377_v8  ;;  %2561 = vmatpush.msrb.mxu0 %v2550_v34 }
 0x37b   : > { %2562 = vmatpush.msrb.mxu0 %v2549_v35 }
 0x37c   : > { %2391 = vmatmul.f32.gmra.mxu3 %v5390_v4 }
 0x37d   : > { %2563 = vmatpush.msrb.mxu0 %v2548_v36 }
 0x37f   : > { %2564 = vmatpush.msrb.mxu0 %v2547_v37 }
 0x381   : > { %2565 = vmatpush.msrb.mxu0 %v2546_v39 }
 0x383   : > { %2566 = vmatpush.msrb.mxu0 %v2545_v40 }
 0x384   : > { %2394 = vmatmul.f32.gmra.mxu3 %v5393_v15 }
 0x385   : > { %2567 = vmatpush.msrb.mxu0 %v2544_v41 }
 0x387   : > { %2568 = vmatpush.msrb.mxu0 %v2543_v43 }
 0x389   : > { %2569 = vmatpush.msrb.mxu0 %v2542_v45 }
 0x38b   : > { %2570 = vmatpush.msrb.mxu0 %v2541_v47 }
 0x38c   : > { %2397 = vmatmul.f32.gmra.mxu3 %v5396_v18 }
 0x38d   : > { %2571 = vmatpush.msrb.mxu0 %v2540_v48 }
 0x38f   : > { %2572 = vmatpush.msrb.mxu0 %v2539_v50 }
 0x391   : > { %2573 = vmatpush.msrb.mxu0 %v2538_v56 }
 0x3ed   : > { %v2265_v16 = vpop.f32.mrf.mxu0 }
 0x3ee   : > { %v2304_v17 = vpop.f32.mrf.mxu1 }
 0x3f5   : > { %v2268_v19 = vpop.f32.mrf.mxu0 }
 0x3f6   : > { %2357 = vmatpush.msra.mxu2 %v2268_v19  ;;  %v2307_v21 = vpop.f32.mrf.mxu1 }
 0x3f7   : > { %v2389_v42 = vpop.f32.mrf.mxu3 }
 0x3f8   : > { %2358 = vmatpush.msra.mxu2 %v2265_v16 }
 0x3f9   : > { %3704 = vmatmul.msk.f32.vlgmr.msra.gmra.mxu2 %vm2330_vm1, %v2326_v20 }
 0x3fa   : > { %2431 = vmatpush.msrb.mxu2 %v2307_v21 }
 0x3fc   : > { %2432 = vmatpush.msrb.mxu2 %v2304_v17 }
 0x3ff   : > { %v2392_v52 = vpop.f32.mrf.mxu3 }
 0x401   : > { %3705 = vmatmul.msk.f32.gmra.mxu2 %vm2330_vm1, %v2327_v22 }
 0x407   : > { %v2395_v62 = vpop.f32.mrf.mxu3 }
 0x409   : > { %3706 = vmatmul.msk.f32.gmra.mxu2 %vm2330_vm1, %v2328_v24 }
 0x40f   : > { %v2398_v9 = vpop.f32.mrf.mxu3 }
 0x411   : > { %3707 = vmatmul.msk.f32.gmra.mxu2 %vm2330_vm1, %v2329_v25 }
 0x419   : > { %3708 = vmatmul.msk.f32.vlgmr.msrb.gmra.mxu2 %vm2330_vm1, %v2401_v26 }
 0x421   : > { %3709 = vmatmul.msk.f32.gmra.mxu2 %vm2330_vm1, %v2402_v23 }
 0x429   : > { %3710 = vmatmul.msk.f32.gmra.mxu2 %vm2330_vm1, %v2403_v27 }
 0x431   : > { %3711 = vmatmul.msk.f32.gmra.mxu2 %vm2330_vm1, %v2404_v28 }
 0x47c   : > { %v2360_v29 = vpop.f32.mrf.mxu2 }
 0x47d   : > { %v2390_v51 = vadd.f32 %v2389_v42, %v2360_v29 }
 0x484   : > { %v2363_v33 = vpop.f32.mrf.mxu2 }
 0x485   : > { %v2393_v60 = vadd.f32 %v2392_v52, %v2363_v33 }
 0x48c   : > { %v2366_v38 = vpop.f32.mrf.mxu2 }
 0x48d   : > { %v2396_v54 = vadd.f32 %v2395_v62, %v2366_v38 }
 0x494   : > { %v2369_v44 = vpop.f32.mrf.mxu2 }
 0x495   : > { %v2399_v13 = vadd.f32 %v2398_v9, %v2369_v44  ;;  %v2681_v9 = vld [vmem:[%s5758_s20 + $0x70] sm:$0xff] }
 0x49c   : > { %v2434_v55 = vpop.f32.mrf.mxu2 }
 0x49d   : > { %v2446_v49 = vadd.f32 %v2434_v55, %v2390_v51 }
 0x49f   : > { %v2454_v57 = vadd.f32 %v4033_v46, %v2446_v49 }
 0x4a1   : > { %v3712_v59 = vmul.f32 -1.442695, %v2454_v57 }
 0x4a3   : > { %4039 = vpow2.f32 %v3712_v59 }
 0x4a4   : > { %v2437_v61 = vpop.f32.mrf.mxu2 }
 0x4a5   : > { %v2447_v53 = vadd.f32 %v2437_v61, %v2393_v60 }
 0x4a7   : > { %v2455_v63 = vadd.f32 %v4033_v46, %v2447_v53 }
 0x4a9   : > { %v4040_v0 = vpop.eup %4039  ;;  %v3713_v1 = vmul.f32 -1.442695, %v2455_v63 }
 0x4aa   : > { %v2470_v3 = vadd.f32 1.0, %v4040_v0 }
 0x4ab   : > { %4041 = vpow2.f32 %v3713_v1 }
 0x4ac   : > { %4043 = vrcp.f32 %v2470_v3  ;;  %v2440_v5 = vpop.f32.mrf.mxu2  ;;  %v2485_v21 = vand.u32 2147483648, %v2470_v3  ;;  %v2483_v25 = vand.u32 2147483647, %v2470_v3  ;;  %vm2479_vm3 = vweird.f32 %v2470_v3 }
 0x4ad   : > { %v2448_v7 = vadd.f32 %v2440_v5, %v2396_v54 }
 0x4ae   : > { %v2486_v30 = vor.u32 1.1754944e-38, %v2485_v21  ;;  %vm2484_vm5 = vcmp.eq.f32.partialorder %v2483_v25, 8.507059e+37  ;;  %v2671_v21 = vld [vmem:[%s5758_s20 + $0x20] sm:$0xff] }
 0x4af   : > { %v5434_v58 = vadd.f32 %v4033_v46, %v2448_v7  ;;  %v4034_v25 = vld [vmem:[%s1687_s21] ss:$0 sm:$0xff] }
 0x4b1   : > { %v4042_v10 = vpop.eup %4041  ;;  %v3714_v2 = vmul.f32 -1.442695, %v5434_v58 }
 0x4b2   : > { %v4044_v11 = vpop.eup %4043  ;;  %v2471_v12 = vadd.f32 1.0, %v4042_v10  ;;  %v2680_v10 = vld [vmem:[%s5758_s20 + $0x68] sm:$0xff] }
 0x4b3   : > { %4045 = vpow2.f32 %v3714_v2  ;;  %v2475_v16 = vmul.f32 %v4044_v11, %v2470_v3  ;;  %vm2480_vm2 = vweird.f32 %v4044_v11  ;;  %v2679_v2 = vld [vmem:[%s5758_s20 + $0x60] sm:$0xff] }
 0x4b4   : > { %4047 = vrcp.f32 %v2471_v12  ;;  %v2443_v17 = vpop.f32.mrf.mxu2  ;;  %vm2481_vm4 = vmor %vm2479_vm3, %vm2480_vm2  ;;  %v2500_v36 = vand.u32 2147483648, %v2471_v12  ;;  %v2498_v38 = vand.u32 2147483647, %v2471_v12  ;;  %vm2494_vm7 = vweird.f32 %v2471_v12 }
 0x4b5   : > { %v2449_v19 = vadd.f32 %v2443_v17, %v2399_v13  ;;  %v2476_v20 = vsub.f32 1.0, %v2475_v16  ;;  %v2676_v13 = vld [vmem:[%s5758_s20 + $0x48] sm:$0xff]  ;;  %v2675_v16 = vld [vmem:[%s5758_s20 + $0x40] sm:$0xff]  ;;  %v2674_v17 = vld [vmem:[%s5758_s20 + $0x38] sm:$0xff] }
 0x4b6   : > { %v2501_v43 = vor.u32 1.1754944e-38, %v2500_v36  ;;  %vm2499_vm9 = vcmp.eq.f32.partialorder %v2498_v38, 8.507059e+37 }
 0x4b7   : > { %v5437_v22 = vadd.f32 %v4033_v46, %v2449_v19  ;;  %v2477_v24 = vmul.f32 %v4044_v11, %v2476_v20  ;;  %v2673_v19 = vld [vmem:[%s5758_s20 + $0x30] sm:$0xff]  ;;  %v2672_v20 = vld [vmem:[%s5758_s20 + $0x28] sm:$0xff] }
 0x4b9   : > { %v4046_v26 = vpop.eup %4045  ;;  %v3715_v23 = vmul.f32 -1.442695, %v5437_v22  ;;  %v2478_v27 = vadd.f32 %v4044_v11, %v2477_v24  ;;  %v2669_v24 = vld [vmem:[%s5758_s20 + $0x10] sm:$0xff] }
 0x4ba   : > { %v4048_v28 = vpop.eup %4047  ;;  %v2472_v29 = vadd.f32 1.0, %v4046_v26  ;;  %v2668_v26 = vld [vmem:[%s5758_s20 + $0x8] sm:$0xff] }
 0x4bb   : > { %4049 = vpow2.f32 %v3715_v23  ;;  %v2482_v31 = vsel %vm2481_vm4, %v4044_v11, %v2478_v27  ;;  %v2490_v32 = vmul.f32 %v4048_v28, %v2471_v12  ;;  %vm2495_vm6 = vweird.f32 %v4048_v28  ;;  %v2678_v11 = vld [vmem:[%s5758_s20 + $0x58] sm:$0xff]  ;;  %v2677_v12 = vld [vmem:[%s5758_s20 + $0x50] sm:$0xff]  ;;  %v2667_v27 = vld [vmem:[%s5758_s20] sm:$0xff] }
 0x4bc   : > { %4051 = vrcp.f32 %v2472_v29  ;;  %v2487_v33 = vsel %vm2484_vm5, %v2486_v30, %v2482_v31  ;;  %vm2496_vm8 = vmor %vm2494_vm7, %vm2495_vm6  ;;  %v2515_v46 = vand.u32 2147483648, %v2472_v29  ;;  %v2513_v52 = vand.u32 2147483647, %v2472_v29 }
 0x4bd   : > { %v2534_v34 = vmul.f32 %v2487_v33, %v2454_v57  ;;  %v2491_v35 = vsub.f32 1.0, %v2490_v32  ;;  %vm2509_vm11 = vweird.f32 %v2472_v29 }
 0x4be   : > { %v2516_v56 = vor.u32 1.1754944e-38, %v2515_v46  ;;  %vm2514_vm13 = vcmp.eq.f32.partialorder %v2513_v52, 8.507059e+37 }
 0x4bf   : > { %2574 = vmatmul.f32.vlgmr.msrb.gmra.mxu0 %v2534_v34  ;;  %v2492_v37 = vmul.f32 %v4048_v28, %v2491_v35 }
 0x4c1   : > { %v4050_v39 = vpop.eup %4049  ;;  %v2493_v40 = vadd.f32 %v4048_v28, %v2492_v37 }
 0x4c2   : > { %v4052_v41 = vpop.eup %4051  ;;  %v2473_v42 = vadd.f32 1.0, %v4050_v39 }
 0x4c3   : > { %v2497_v44 = vsel %vm2496_vm8, %v4048_v28, %v2493_v40  ;;  %v2505_v45 = vmul.f32 %v4052_v41, %v2472_v29  ;;  %vm2510_vm10 = vweird.f32 %v4052_v41 }
 0x4c4   : > { %4053 = vrcp.f32 %v2473_v42  ;;  %v2502_v47 = vsel %vm2499_vm9, %v2501_v43, %v2497_v44  ;;  %vm2511_vm12 = vmor %vm2509_vm11, %vm2510_vm10  ;;  %v2530_v62 = vand.u32 2147483648, %v2473_v42  ;;  %v2528_v0 = vand.u32 2147483647, %v2473_v42 }
 0x4c5   : > { %v2535_v48 = vmul.f32 %v2502_v47, %v2455_v63  ;;  %v2506_v51 = vsub.f32 1.0, %v2505_v45  ;;  %vm2524_vm15 = vweird.f32 %v2473_v42 }
 0x4c6   : > { %v2531_v3 = vor.u32 1.1754944e-38, %v2530_v62  ;;  %vm2529_vm1 = vcmp.eq.f32.partialorder %v2528_v0, 8.507059e+37 }
 0x4c7   : > { %2577 = vmatmul.f32.gmra.mxu0 %v2535_v48  ;;  %v2507_v50 = vmul.f32 %v4052_v41, %v2506_v51 }
 0x4c9   : > { %v2508_v55 = vadd.f32 %v4052_v41, %v2507_v50 }
 0x4ca   : > { %v4054_v49 = vpop.eup %4053 }
 0x4cb   : > { %v2512_v57 = vsel %vm2511_vm12, %v4052_v41, %v2508_v55  ;;  %v2520_v59 = vmul.f32 %v4054_v49, %v2473_v42  ;;  %vm2525_vm14 = vweird.f32 %v4054_v49 }
 0x4cc   : > { %v2517_v60 = vsel %vm2514_vm13, %v2516_v56, %v2512_v57  ;;  %vm2526_vm0 = vmor %vm2524_vm15, %vm2525_vm14 }
 0x4cd   : > { %v2536_v61 = vmul.f32 %v2517_v60, %v5434_v58  ;;  %v2521_v53 = vsub.f32 1.0, %v2520_v59  ;;  %v2682_v58 = vld [vmem:[%s5758_s20 + $0x78] sm:$0xff] }
 0x4ce   : > { %2687 = vmatpush.msrb.mxu1 %v2682_v58 }
 0x4cf   : > { %2580 = vmatmul.f32.gmra.mxu0 %v2536_v61  ;;  %v2522_v63 = vmul.f32 %v4054_v49, %v2521_v53 }
 0x4d0   : > { %2688 = vmatpush.msrb.mxu1 %v2681_v9 }
 0x4d1   : > { %v2523_v1 = vadd.f32 %v4054_v49, %v2522_v63 }
 0x4d2   : > { %2689 = vmatpush.msrb.mxu1 %v2680_v10 }
 0x4d3   : > { %v2527_v54 = vsel %vm2526_vm0, %v4054_v49, %v2523_v1 }
 0x4d4   : > { %v2532_v5 = vsel %vm2529_vm1, %v2531_v3, %v2527_v54  ;;  %2690 = vmatpush.msrb.mxu1 %v2679_v2 }
 0x4d5   : > { %v2537_v7 = vmul.f32 %v2532_v5, %v5437_v22  ;;  %v2670_v22 = vld [vmem:[%s5758_s20 + $0x18] sm:$0xff] }
 0x4d6   : > { %2691 = vmatpush.msrb.mxu1 %v2678_v11 }
 0x4d7   : > { %2583 = vmatmul.f32.gmra.mxu0 %v2537_v7 }
 0x4d8   : > { %2692 = vmatpush.msrb.mxu1 %v2677_v12 }
 0x4da   : > { %2693 = vmatpush.msrb.mxu1 %v2676_v13 }
 0x4dc   : > { %2694 = vmatpush.msrb.mxu1 %v2675_v16 }
 0x4de   : > { %2695 = vmatpush.msrb.mxu1 %v2674_v17 }
 0x4e0   : > { %2696 = vmatpush.msrb.mxu1 %v2673_v19 }
 0x4e2   : > { %2697 = vmatpush.msrb.mxu1 %v2672_v20 }
 0x4e4   : > { %2698 = vmatpush.msrb.mxu1 %v2671_v21 }
 0x4e6   : > { %2699 = vmatpush.msrb.mxu1 %v2670_v22 }
 0x4e8   : > { %2700 = vmatpush.msrb.mxu1 %v2669_v24 }
 0x4ea   : > { %2701 = vmatpush.msrb.mxu1 %v2668_v26 }
 0x4ec   : > { %2702 = vmatpush.msrb.mxu1 %v2667_v27 }
 0x53c   : > { %v2575_v23 = vpop.f32.mrf.mxu0 }
 0x53d   : > { %v2576_v28 = vadd.f32 %v4034_v25, %v2575_v23 }
 0x53f   : > { %v3716_v29 = vmul.f32 -1.442695, %v2576_v28 }
 0x541   : > { %4055 = vpow2.f32 %v3716_v29 }
 0x544   : > { %v2578_v30 = vpop.f32.mrf.mxu0 }
 0x545   : > { %v2579_v31 = vadd.f32 %v4034_v25, %v2578_v30 }
 0x547   : > { %v4056_v32 = vpop.eup %4055  ;;  %v3717_v33 = vmul.f32 -1.442695, %v2579_v31 }
 0x548   : > { %v2599_v34 = vadd.f32 1.0, %v4056_v32 }
 0x549   : > { %4057 = vpow2.f32 %v3717_v33  ;;  %v4035_v33 = vld [vmem:[%s1690_s25] ss:$0 sm:$0xff]  ;;  %s5763_s25 = sld [smem:[#allocation30_spill]] }
 0x54a   : > { %4059 = vrcp.f32 %v2599_v34  ;;  %v2614_v43 = vand.u32 2147483648, %v2599_v34  ;;  %v2612_v47 = vand.u32 2147483647, %v2599_v34  ;;  %vm2608_vm3 = vweird.f32 %v2599_v34 }
 0x54c   : > { %v2581_v35 = vpop.f32.mrf.mxu0  ;;  %v2615_v55 = vor.u32 1.1754944e-38, %v2614_v43  ;;  %vm2613_vm5 = vcmp.eq.f32.partialorder %v2612_v47, 8.507059e+37  ;;  %v5481_v43 = vld [vmem:[%s5762_s29 + $0x78] sm:$0xff] }
 0x54d   : > { %v5461_v36 = vadd.f32 %v4034_v25, %v2581_v35  ;;  %2803 = vmatpush.msra.mxu0 %v5481_v43  ;;  %v2775_v47 = vld [vmem:[%s5761_s26 + $0x58] sm:$0xff] }
 0x54f   : > { %v4058_v37 = vpop.eup %4057  ;;  %v3718_v38 = vmul.f32 -1.442695, %v5461_v36 }
 0x550   : > { %v4060_v39 = vpop.eup %4059  ;;  %v2600_v40 = vadd.f32 1.0, %v4058_v37 }
 0x551   : > { %v2604_v41 = vmul.f32 %v4060_v39, %v2599_v34  ;;  %4061 = vpow2.f32 %v3718_v38  ;;  %vm2609_vm2 = vweird.f32 %v4060_v39 }
 0x552   : > { %4063 = vrcp.f32 %v2600_v40  ;;  %vm2610_vm4 = vmor %vm2608_vm3, %vm2609_vm2  ;;  %v2629_v53 = vand.u32 2147483648, %v2600_v40  ;;  %v2627_v63 = vand.u32 2147483647, %v2600_v40  ;;  %vm2623_vm7 = vweird.f32 %v2600_v40 }
 0x553   : > { %v2605_v42 = vsub.f32 1.0, %v2604_v41  ;;  %vm2718_vm2 = vcmask 261120  }
 0x554   : > { %v2584_v44 = vpop.f32.mrf.mxu0  ;;  %v2630_v5 = vor.u32 1.1754944e-38, %v2629_v53  ;;  %vm2628_vm9 = vcmp.eq.f32.partialorder %v2627_v63, 8.507059e+37  ;;  %v2770_v53 = vld [vmem:[%s5761_s26 + $0x30] sm:$0xff]  ;;  %v2755_v63 = vld [vmem:[%s5762_s29 + $0x38] sm:$0xff] }
 0x555   : > { %v2606_v45 = vmul.f32 %v4060_v39, %v2605_v42  ;;  %v5464_v48 = vadd.f32 %v4034_v25, %v2584_v44  ;;  %v2777_v42 = vld [vmem:[%s5761_s26 + $0x68] sm:$0xff]  ;;  %v2776_v44 = vld [vmem:[%s5761_s26 + $0x60] sm:$0xff] }
 0x557   : > { %v4062_v51 = vpop.eup %4061  ;;  %v2607_v46 = vadd.f32 %v4060_v39, %v2606_v45  ;;  %v3719_v50 = vmul.f32 -1.442695, %v5464_v48  ;;  %v5489_v45 = vld [vmem:[%s5762_s29 + $0x68] sm:$0xff] }
 0x558   : > { %v4064_v52 = vpop.eup %4063  ;;  %v2601_v49 = vadd.f32 1.0, %v4062_v51  ;;  %v2760_v51 = vld [vmem:[%s5762_s29 + $0x60] sm:$0xff] }
 0x559   : > { %v2611_v56 = vsel %vm2610_vm4, %v4060_v39, %v2607_v46  ;;  %4065 = vpow2.f32 %v3719_v50  ;;  %v2619_v57 = vmul.f32 %v4064_v52, %v2600_v40  ;;  %vm2624_vm6 = vweird.f32 %v4064_v52  ;;  %v2779_v39 = vld [vmem:[%s5761_s26 + $0x78] sm:$0xff]  ;;  %v2778_v40 = vld [vmem:[%s5761_s26 + $0x70] sm:$0xff] }
 0x55a   : > { %v2616_v59 = vsel %vm2613_vm5, %v2615_v55, %v2611_v56  ;;  %4067 = vrcp.f32 %v2601_v49  ;;  %vm2625_vm8 = vmor %vm2623_vm7, %vm2624_vm6  ;;  %v2644_v11 = vand.u32 2147483648, %v2601_v49  ;;  %v2642_v13 = vand.u32 2147483647, %v2601_v49  ;;  %2780 = vmatpush.msra.mxu2 %v2779_v39  ;;  %v2774_v46 = vld [vmem:[%s5761_s26 + $0x50] sm:$0xff]  ;;  %v2773_v55 = vld [vmem:[%s5761_s26 + $0x48] sm:$0xff] }
 0x55b   : > { %v2663_v60 = vmul.f32 %v2616_v59, %v2576_v28  ;;  %v2620_v61 = vsub.f32 1.0, %v2619_v57  ;;  %vm2638_vm11 = vweird.f32 %v2601_v49  ;;  %v2772_v56 = vld [vmem:[%s5761_s26 + $0x40] sm:$0xff]  ;;  %v2757_v57 = vld [vmem:[%s5762_s29 + $0x48] sm:$0xff] }
 0x55c   : > { %v2645_v19 = vor.u32 1.1754944e-38, %v2644_v11  ;;  %vm2643_vm13 = vcmp.eq.f32.partialorder %v2642_v13, 8.507059e+37  ;;  %2781 = vmatpush.msra.mxu2 %v2778_v40  ;;  %v2751_v11 = vld [vmem:[%s5762_s29 + $0x18] sm:$0xff]  ;;  %v2749_v13 = vld [vmem:[%s5762_s29 + $0x8] sm:$0xff] }
 0x55d   : > { %2703 = vmatmul.f32.vlgmr.msrb.gmra.mxu1 %v2663_v60  ;;  %v2621_v62 = vmul.f32 %v4064_v52, %v2620_v61  ;;  %v2771_v60 = vld [vmem:[%s5761_s26 + $0x38] sm:$0xff]  ;;  %v2756_v61 = vld [vmem:[%s5762_s29 + $0x40] sm:$0xff] }
 0x55e   : > { %2782 = vmatpush.msra.mxu2 %v2777_v42 }
 0x55f   : > { %v4066_v0 = vpop.eup %4065  ;;  %v2622_v1 = vadd.f32 %v4064_v52, %v2621_v62 }
 0x560   : > { %v4068_v3 = vpop.eup %4067  ;;  %v2602_v54 = vadd.f32 1.0, %v4066_v0  ;;  %2783 = vmatpush.msra.mxu2 %v2776_v44  ;;  %v2769_v0 = vld [vmem:[%s5761_s26 + $0x28] sm:$0xff] }
 0x561   : > { %v2626_v7 = vsel %vm2625_vm8, %v4064_v52, %v2622_v1  ;;  %v2634_v58 = vmul.f32 %v4068_v3, %v2601_v49  ;;  %vm2639_vm10 = vweird.f32 %v4068_v3  ;;  %v2759_v52 = vld [vmem:[%s5762_s29 + $0x58] sm:$0xff]  ;;  %v2758_v49 = vld [vmem:[%s5762_s29 + $0x50] sm:$0xff] }
 0x562   : > { %4069 = vrcp.f32 %v2602_v54  ;;  %v2631_v9 = vsel %vm2628_vm9, %v2630_v5, %v2626_v7  ;;  %vm2640_vm12 = vmor %vm2638_vm11, %vm2639_vm10  ;;  %v2659_v26 = vand.u32 2147483648, %v2602_v54  ;;  %v2657_v27 = vand.u32 2147483647, %v2602_v54  ;;  %2784 = vmatpush.msra.mxu2 %v2775_v47  ;;  %v2754_v1 = vld [vmem:[%s5762_s29 + $0x30] sm:$0xff]  ;;  %v2767_v5 = vld [vmem:[%s5761_s26 + $0x18] sm:$0xff] }
 0x563   : > { %v2664_v10 = vmul.f32 %v2631_v9, %v2579_v31  ;;  %v2635_v2 = vsub.f32 1.0, %v2634_v58  ;;  %vm2653_vm15 = vweird.f32 %v2602_v54  ;;  %v2752_v7 = vld [vmem:[%s5762_s29 + $0x20] sm:$0xff]  ;;  %v2766_v58 = vld [vmem:[%s5761_s26 + $0x10] sm:$0xff]  ;;  %v2765_v9 = vld [vmem:[%s5761_s26 + $0x8] sm:$0xff] }
 0x564   : > { %v2660_v29 = vor.u32 1.1754944e-38, %v2659_v26  ;;  %vm2658_vm1 = vcmp.eq.f32.partialorder %v2657_v27, 8.507059e+37  ;;  %2785 = vmatpush.msra.mxu2 %v2774_v46  ;;  %v2881_v26 = vld [vmem:[%s5764_s5 + $0x48] sm:$0xff]  ;;  %v2878_v27 = vld [vmem:[%s5764_s5 + $0x30] sm:$0xff] }
 0x565   : > { %2706 = vmatmul.f32.gmra.mxu1 %v2664_v10  ;;  %v2636_v12 = vmul.f32 %v4068_v3, %v2635_v2  ;;  %v2764_v10 = vld [vmem:[%s5761_s26] sm:$0xff]  ;;  %v2717_v2 = vld [vmem:[%s5763_s25 + $0x8] sm:$0xff] }
 0x566   : > { %2786 = vmatpush.msra.mxu2 %v2773_v55 }
 0x567   : > { %v2637_v16 = vadd.f32 %v4068_v3, %v2636_v12  ;;  %v2750_v12 = vld [vmem:[%s5762_s29 + $0x10] sm:$0xff] }
 0x568   : > { %v4070_v17 = vpop.eup %4069  ;;  %2787 = vmatpush.msra.mxu2 %v2772_v56 }
 0x569   : > { %v2641_v20 = vsel %vm2640_vm12, %v4068_v3, %v2637_v16  ;;  %v2649_v21 = vmul.f32 %v4070_v17, %v2602_v54  ;;  %vm2654_vm14 = vweird.f32 %v4070_v17  ;;  %v2768_v3 = vld [vmem:[%s5761_s26 + $0x20] sm:$0xff] }
 0x56a   : > { %v2646_v22 = vsel %vm2643_vm13, %v2645_v19, %v2641_v20  ;;  %vm2655_vm0 = vmor %vm2653_vm15, %vm2654_vm14  ;;  %2788 = vmatpush.msra.mxu2 %v2771_v60  ;;  %v2716_v54 = vld [vmem:[%s5763_s25] sm:$0xff]  ;;  %v2887_v20 = vld [vmem:[%s5764_s5 + $0x78] sm:$0xff] }
 0x56b   : > { %v2665_v24 = vmul.f32 %v2646_v22, %v5461_v36  ;;  %v2650_v25 = vsub.f32 1.0, %v2649_v21  ;;  %v2748_v16 = vld [vmem:[%s5762_s29] sm:$0xff]  ;;  %2892 = vmatpush.msra.mxu1 %v2887_v20  ;;  %v2886_v21 = vld [vmem:[%s5764_s5 + $0x70] sm:$0xff]  ;;  %v2885_v22 = vld [vmem:[%s5764_s5 + $0x68] sm:$0xff] }
 0x56c   : > { %2789 = vmatpush.msra.mxu2 %v2770_v53 }
 0x56d   : > { %2709 = vmatmul.f32.gmra.mxu1 %v2665_v24  ;;  %v2651_v23 = vmul.f32 %v4070_v17, %v2650_v25  ;;  %v2884_v24 = vld [vmem:[%s5764_s5 + $0x60] sm:$0xff]  ;;  %v2882_v25 = vld [vmem:[%s5764_s5 + $0x50] sm:$0xff] }
 0x56e   : > { %2790 = vmatpush.msra.mxu2 %v2769_v0  ;;  %2893 = vmatpush.msra.mxu1 %v2886_v21 }
 0x56f   : > { %v2652_v28 = vadd.f32 %v4070_v17, %v2651_v23  ;;  %v2879_v23 = vld [vmem:[%s5764_s5 + $0x38] sm:$0xff] }
 0x570   : > { %2791 = vmatpush.msra.mxu2 %v2768_v3  ;;  %2894 = vmatpush.msra.mxu1 %v2885_v22 }
 0x571   : > { %v2656_v30 = vsel %vm2655_vm0, %v4070_v17, %v2652_v28  ;;  %v2877_v28 = vld [vmem:[%s5764_s5 + $0x28] sm:$0xff] }
 0x572   : > { %v2661_v31 = vsel %vm2658_vm1, %v2660_v29, %v2656_v30  ;;  %2792 = vmatpush.msra.mxu2 %v2767_v5  ;;  %2895 = vmatpush.msra.mxu1 %v2884_v24  ;;  %v2876_v29 = vld [vmem:[%s5764_s5 + $0x20] sm:$0xff]  ;;  %v2875_v30 = vld [vmem:[%s5764_s5 + $0x18] sm:$0xff] }
 0x573   : > { %v2666_v32 = vmul.f32 %v2661_v31, %v5464_v48  ;;  %v4037_v24 = vld [vmem:[%s1696_s30] ss:$0 sm:$0xff] }
 0x574   : > { %2793 = vmatpush.msra.mxu2 %v2766_v58 }
 0x575   : > { %2712 = vmatmul.f32.gmra.mxu1 %v2666_v32  ;;  %v2874_v32 = vld [vmem:[%s5764_s5 + $0x10] sm:$0xff] }
 0x576   : > { %2794 = vmatpush.msra.mxu2 %v2765_v9 }
 0x578   : > { %2795 = vmatpush.msra.mxu2 %v2764_v10 }
 0x57a   : > { %3745 = vmatpush.msrb.mxu2 %v5481_v43 }
 0x5da   : > { %v2704_v34 = vpop.f32.mrf.mxu1 }
 0x5db   : > { %v5472_v35 = vadd.f32 %v4035_v33, %v2704_v34 }
 0x5dd   : > { %v3002_v36 = vadd.f32 %v5472_v35, %v5387_v14  ;;  %v5486_v14 = vld [vmem:[%s5762_s29 + $0x70] sm:$0xff] }
 0x5de   : > { %2804 = vmatpush.msra.mxu0 %v5486_v14  ;;  %3746 = vmatpush.msrb.mxu2 %v5486_v14 }
 0x5df   : > { %3006 = vst [vmem:[#allocation3 + $0x8] sm:$0xff] %v3002_v36 }
 0x5e0   : > { %2805 = vmatpush.msra.mxu0 %v5489_v45  ;;  %3747 = vmatpush.msrb.mxu2 %v5489_v45 }
 0x5e2   : > { %v2707_v37 = vpop.f32.mrf.mxu1  ;;  %2806 = vmatpush.msra.mxu0 %v2760_v51  ;;  %3748 = vmatpush.msrb.mxu2 %v2760_v51 }
 0x5e3   : > { %v2708_v38 = vadd.f32 %v4035_v33, %v2707_v37  ;;  %v2872_v37 = vld [vmem:[%s5764_s5] sm:$0xff] }
 0x5e4   : > { %2807 = vmatpush.msra.mxu0 %v2759_v52  ;;  %3749 = vmatpush.msrb.mxu2 %v2759_v52 }
 0x5e5   : > { %v3003_v41 = vadd.f32 %v2708_v38, %v5390_v4 }
 0x5e6   : > { %2808 = vmatpush.msra.mxu0 %v2758_v49  ;;  %3750 = vmatpush.msrb.mxu2 %v2758_v49 }
 0x5e7   : > { %3007 = vst [vmem:[#allocation3 + $0x10] sm:$0xff] %v3003_v41 }
 0x5e8   : > { %2809 = vmatpush.msra.mxu0 %v2757_v57  ;;  %3751 = vmatpush.msrb.mxu2 %v2757_v57 }
 0x5ea   : > { %v2710_v4 = vpop.f32.mrf.mxu1  ;;  %2810 = vmatpush.msra.mxu0 %v2756_v61  ;;  %3752 = vmatpush.msrb.mxu2 %v2756_v61 }
 0x5eb   : > { %v2711_v48 = vadd.f32 %v4035_v33, %v2710_v4 }
 0x5ec   : > { %2811 = vmatpush.msra.mxu0 %v2755_v63  ;;  %3753 = vmatpush.msrb.mxu2 %v2755_v63 }
 0x5ed   : > { %v3004_v50 = vadd.f32 %v2711_v48, %v5393_v15 }
 0x5ee   : > { %2812 = vmatpush.msra.mxu0 %v2754_v1  ;;  %3754 = vmatpush.msrb.mxu2 %v2754_v1 }
 0x5ef   : > { %3008 = vst [vmem:[#allocation3] sm:$0xff] %v3004_v50 }
 0x5f2   : > { %v2713_v59 = vpop.f32.mrf.mxu1 }
 0x5f3   : > { %v2714_v15 = vadd.f32 %v4035_v33, %v2713_v59  ;;  %v4036_v33 = vld [vmem:[%s1693_s27] ss:$0 sm:$0xff]  ;;  %s5766_s27 = sld [smem:[#allocation82_spill]] }
 0x5f5   : > { %v3005_v62 = vadd.f32 %v2714_v15, %v5396_v18  ;;  %2737 = vmatpush.msrb.mxu3 %v2714_v15  ;;  %v2753_v18 = vld [vmem:[%s5762_s29 + $0x28] sm:$0xff] }
 0x5f6   : > { %2813 = vmatpush.msra.mxu0 %v2753_v18  ;;  %3755 = vmatpush.msrb.mxu2 %v2753_v18 }
 0x5f7   : > { %3009 = vst [vmem:[#allocation3 + $0x18] sm:$0xff] %v3005_v62  ;;  %2738 = vmatpush.msrb.mxu3 %v2711_v48 }
 0x5f8   : > { %2814 = vmatpush.msra.mxu0 %v2752_v7  ;;  %3756 = vmatpush.msrb.mxu2 %v2752_v7 }
 0x5f9   : > { %2739 = vmatpush.msrb.mxu3 %v2708_v38  ;;  %v2970_v7 = vld [vmem:[%s5766_s27 + $0x78] sm:$0xff]  ;;  %v2969_v58 = vld [vmem:[%s5766_s27 + $0x70] sm:$0xff]  ;;  %v2968_v9 = vld [vmem:[%s5766_s27 + $0x68] sm:$0xff] }
 0x5fa   : > { %2815 = vmatpush.msra.mxu0 %v2751_v11  ;;  %3757 = vmatpush.msrb.mxu2 %v2751_v11  ;;  %v2967_v10 = vld [vmem:[%s5766_s27 + $0x60] sm:$0xff]  ;;  %v2965_v11 = vld [vmem:[%s5766_s27 + $0x50] sm:$0xff]  ;;  %v2958_v21 = vld [vmem:[%s5766_s27 + $0x18] sm:$0xff] }
 0x5fb   : > { %2740 = vmatpush.msrb.mxu3 %v5472_v35  ;;  %v2873_v35 = vld [vmem:[%s5764_s5 + $0x8] sm:$0xff]  ;;  %v2959_v20 = vld [vmem:[%s5766_s27 + $0x20] sm:$0xff]  ;;  %v2957_v22 = vld [vmem:[%s5766_s27 + $0x10] sm:$0xff] }
 0x5fc   : > { %3720 = vmatmul.msk.f32.vlgmr.msrb.gmra.mxu3 %vm2718_vm2, %v2716_v54  ;;  %2816 = vmatpush.msra.mxu0 %v2750_v12 }
 0x5fd   : > { %3758 = vmatpush.msrb.mxu2 %v2750_v12  ;;  %2975 = vmatpush.msra.mxu3 %v2970_v7  ;;  %v2964_v12 = vld [vmem:[%s5766_s27 + $0x48] sm:$0xff] }
 0x5fe   : > { %2817 = vmatpush.msra.mxu0 %v2749_v13 }
 0x5ff   : > { %3759 = vmatpush.msrb.mxu2 %v2749_v13  ;;  %2976 = vmatpush.msra.mxu3 %v2969_v58  ;;  %v2963_v13 = vld [vmem:[%s5766_s27 + $0x40] sm:$0xff] }
 0x600   : > { %2818 = vmatpush.msra.mxu0 %v2748_v16 }
 0x601   : > { %3760 = vmatpush.msrb.mxu2 %v2748_v16  ;;  %2819 = vmatmul.f32.vlgmr.msra.gmra.mxu0 %v5371_v6  ;;  %v2883_v6 = vld [vmem:[%s5764_s5 + $0x58] sm:$0xff] }
 0x602   : > { %2896 = vmatpush.msra.mxu1 %v2883_v6  ;;  %2977 = vmatpush.msra.mxu3 %v2968_v9  ;;  %v2962_v16 = vld [vmem:[%s5766_s27 + $0x38] sm:$0xff]  ;;  %v2956_v6 = vld [vmem:[%s5766_s27 + $0x8] sm:$0xff] }
 0x604   : > { %3721 = vmatmul.msk.f32.gmra.mxu3 %vm2718_vm2, %v2717_v2  ;;  %2897 = vmatpush.msra.mxu1 %v2882_v25  ;;  %v2966_v2 = vld [vmem:[%s5766_s27 + $0x58] sm:$0xff]  ;;  %v2955_v25 = vld [vmem:[%s5766_s27] sm:$0xff] }
 0x605   : > { %2978 = vmatpush.msra.mxu3 %v2967_v10 }
 0x606   : > { %2898 = vmatpush.msra.mxu1 %v2881_v26 }
 0x607   : > { %2979 = vmatpush.msra.mxu3 %v2966_v2 }
 0x609   : > { %2980 = vmatpush.msra.mxu3 %v2965_v11 }
 0x60b   : > { %2981 = vmatpush.msra.mxu3 %v2964_v12 }
 0x60d   : > { %2982 = vmatpush.msra.mxu3 %v2963_v13 }
 0x60f   : > { %2983 = vmatpush.msra.mxu3 %v2962_v16 }
 0x67e   : > { %v2820_v31 = vpop.f32.mrf.mxu0 }
 0x67f   : > { %v2742_v17 = vpop.f32.mrf.mxu3 }
 0x680   : > { %2796 = vmatmul.f32.vlgmr.msra.gmra.mxu2 %v2742_v17  ;;  %v2961_v17 = vld [vmem:[%s5766_s27 + $0x30] sm:$0xff] }
 0x681   : > { %2984 = vmatpush.msra.mxu3 %v2961_v17 }
 0x687   : > { %v2745_v19 = vpop.f32.mrf.mxu3 }
 0x688   : > { %2799 = vmatmul.f32.gmra.mxu2 %v2745_v19  ;;  %v2960_v19 = vld [vmem:[%s5766_s27 + $0x28] sm:$0xff] }
 0x689   : > { %2985 = vmatpush.msra.mxu3 %v2960_v19 }
 0x68b   : > { %2986 = vmatpush.msra.mxu3 %v2959_v20 }
 0x68d   : > { %2987 = vmatpush.msra.mxu3 %v2958_v21 }
 0x68f   : > { %2988 = vmatpush.msra.mxu3 %v2957_v22 }
 0x690   : > { %2822 = vmatmul.f32.vlgmr.msrb.gmra.mxu2 %v5377_v8  ;;  %v2880_v8 = vld [vmem:[%s5764_s5 + $0x40] sm:$0xff] }
 0x691   : > { %2899 = vmatpush.msra.mxu1 %v2880_v8  ;;  %2989 = vmatpush.msra.mxu3 %v2956_v6 }
 0x693   : > { %2900 = vmatpush.msra.mxu1 %v2879_v23  ;;  %2990 = vmatpush.msra.mxu3 %v2955_v25 }
 0x695   : > { %2901 = vmatpush.msra.mxu1 %v2878_v27 }
 0x697   : > { %2902 = vmatpush.msra.mxu1 %v2877_v28 }
 0x699   : > { %2903 = vmatpush.msra.mxu1 %v2876_v29 }
 0x69b   : > { %2904 = vmatpush.msra.mxu1 %v2875_v30 }
 0x69d   : > { %2905 = vmatpush.msra.mxu1 %v2874_v32 }
 0x69f   : > { %2906 = vmatpush.msra.mxu1 %v2873_v35 }
 0x6a1   : > { %2907 = vmatpush.msra.mxu1 %v2872_v37 }
 0x703   : > { %v2797_v34 = vpop.f32.mrf.mxu2 }
 0x704   : > { %v2821_v36 = vadd.f32 %v2820_v31, %v2797_v34 }
 0x706   : > { %v2830_v38 = vadd.f32 %v4036_v33, %v2821_v36 }
 0x708   : > { %v3722_v39 = vmul.f32 -1.442695, %v2830_v38 }
 0x70a   : > { %4071 = vpow2.f32 %v3722_v39 }
 0x70b   : > { %v2800_v40 = vpop.f32.mrf.mxu2 }
 0x710   : > { %v4072_v41 = vpop.eup %4071 }
 0x711   : > { %v2838_v42 = vadd.f32 1.0, %v4072_v41 }
 0x713   : > { %4073 = vrcp.f32 %v2838_v42  ;;  %v2823_v43 = vpop.f32.mrf.mxu2  ;;  %v2851_v51 = vand.u32 2147483648, %v2838_v42  ;;  %v2849_v50 = vand.u32 2147483647, %v2838_v42  ;;  %vm2845_vm4 = vweird.f32 %v2838_v42 }
 0x714   : > { %v2824_v44 = vadd.f32 %v2823_v43, %v2800_v40 }
 0x715   : > { %v2852_v49 = vor.u32 1.1754944e-38, %v2851_v51  ;;  %vm2850_vm6 = vcmp.eq.f32.partialorder %v2849_v50, 8.507059e+37 }
 0x716   : > { %v2831_v14 = vadd.f32 %v4036_v33, %v2824_v44 }
 0x718   : > { %v3723_v45 = vmul.f32 -1.442695, %v2831_v14 }
 0x719   : > { %v4074_v4 = vpop.eup %4073 }
 0x71a   : > { %v2841_v47 = vmul.f32 %v4074_v4, %v2838_v42  ;;  %4075 = vpow2.f32 %v3723_v45  ;;  %vm2846_vm3 = vweird.f32 %v4074_v4 }
 0x71b   : > { %vm2847_vm5 = vmor %vm2845_vm4, %vm2846_vm3 }
 0x71c   : > { %v2842_v48 = vsub.f32 1.0, %v2841_v47 }
 0x71e   : > { %v2843_v46 = vmul.f32 %v4074_v4, %v2842_v48 }
 0x720   : > { %v4076_v52 = vpop.eup %4075  ;;  %v2844_v55 = vadd.f32 %v4074_v4, %v2843_v46 }
 0x721   : > { %v2839_v56 = vadd.f32 1.0, %v4076_v52 }
 0x722   : > { %v2848_v57 = vsel %vm2847_vm5, %v4074_v4, %v2844_v55 }
 0x723   : > { %v2853_v59 = vsel %vm2850_vm6, %v2852_v49, %v2848_v57  ;;  %4077 = vrcp.f32 %v2839_v56  ;;  %v2866_v62 = vand.u32 2147483648, %v2839_v56  ;;  %v2864_v0 = vand.u32 2147483647, %v2839_v56 }
 0x724   : > { %v2870_v60 = vmul.f32 %v2853_v59, %v2830_v38  ;;  %vm2860_vm8 = vweird.f32 %v2839_v56 }
 0x725   : > { %v2867_v3 = vor.u32 1.1754944e-38, %v2866_v62  ;;  %vm2865_vm10 = vcmp.eq.f32.partialorder %v2864_v0, 8.507059e+37  ;;  %v4088_v62 = vld [vmem:[#allocation2 + $0x8] sm:$0xff] }
 0x726   : > { %2908 = vmatmul.f32.vlgmr.msra.gmra.mxu1 %v2870_v60  ;;  %v4087_v60 = vld [vmem:[#allocation2] sm:$0xff] }
 0x729   : > { %v4078_v15 = vpop.eup %4077 }
 0x72a   : > { %v2856_v61 = vmul.f32 %v4078_v15, %v2839_v56  ;;  %vm2861_vm7 = vweird.f32 %v4078_v15  ;;  %v4038_v56 = vld [vmem:[%s1699_s1] ss:$0 sm:$0xff]  ;;  %s5771_s1 = sld [smem:[#allocation61_spill]] (!%p3726_p13) }
 0x72b   : > { %vm2862_vm9 = vmor %vm2860_vm8, %vm2861_vm7 }
 0x72c   : > { %v2857_v53 = vsub.f32 1.0, %v2856_v61 }
 0x72e   : > { %v2858_v63 = vmul.f32 %v4078_v15, %v2857_v53 }
 0x730   : > { %v2859_v1 = vadd.f32 %v4078_v15, %v2858_v63 }
 0x732   : > { %v2863_v54 = vsel %vm2862_vm9, %v4078_v15, %v2859_v1 }
 0x733   : > { %v2868_v18 = vsel %vm2865_vm10, %v2867_v3, %v2863_v54 }
 0x734   : > { %v2871_v5 = vmul.f32 %v2868_v18, %v2831_v14 }
 0x736   : > { %2911 = vmatmul.f32.gmra.mxu1 %v2871_v5 }
 0x7a3   : > { %v2909_v26 = vpop.f32.mrf.mxu1 }
 0x7a4   : > { %v2910_v8 = vadd.f32 %v4037_v24, %v2909_v26 }
 0x7a6   : > { %v3724_v23 = vmul.f32 -1.442695, %v2910_v8 }
 0x7a8   : > { %4079 = vpow2.f32 %v3724_v23 }
 0x7ae   : > { %v4080_v27 = vpop.eup %4079 }
 0x7af   : > { %v2921_v28 = vadd.f32 1.0, %v4080_v27 }
 0x7b1   : > { %4081 = vrcp.f32 %v2921_v28  ;;  %v2934_v35 = vand.u32 2147483648, %v2921_v28  ;;  %v2932_v37 = vand.u32 2147483647, %v2921_v28  ;;  %vm2928_vm12 = vweird.f32 %v2921_v28 }
 0x7b3   : > { %v2912_v29 = vpop.f32.mrf.mxu1  ;;  %v2935_v40 = vor.u32 1.1754944e-38, %v2934_v35  ;;  %vm2933_vm14 = vcmp.eq.f32.partialorder %v2932_v37, 8.507059e+37 }
 0x7b4   : > { %v2913_v30 = vadd.f32 %v4037_v24, %v2912_v29 }
 0x7b6   : > { %v3725_v31 = vmul.f32 -1.442695, %v2913_v30 }
 0x7b7   : > { %v4082_v32 = vpop.eup %4081 }
 0x7b8   : > { %v2924_v33 = vmul.f32 %v4082_v32, %v2921_v28  ;;  %4083 = vpow2.f32 %v3725_v31  ;;  %vm2929_vm11 = vweird.f32 %v4082_v32 }
 0x7b9   : > { %vm2930_vm13 = vmor %vm2928_vm12, %vm2929_vm11 }
 0x7ba   : > { %v2925_v34 = vsub.f32 1.0, %v2924_v33 }
 0x7bc   : > { %v2926_v36 = vmul.f32 %v4082_v32, %v2925_v34 }
 0x7be   : > { %v4084_v38 = vpop.eup %4083  ;;  %v2927_v39 = vadd.f32 %v4082_v32, %v2926_v36 }
 0x7bf   : > { %v2922_v41 = vadd.f32 1.0, %v4084_v38 }
 0x7c0   : > { %v2931_v42 = vsel %vm2930_vm13, %v4082_v32, %v2927_v39 }
 0x7c1   : > { %v2936_v43 = vsel %vm2933_vm14, %v2935_v40, %v2931_v42  ;;  %4085 = vrcp.f32 %v2922_v41  ;;  %v2949_v47 = vand.u32 2147483648, %v2922_v41  ;;  %v2947_v51 = vand.u32 2147483647, %v2922_v41 }
 0x7c2   : > { %v2953_v44 = vmul.f32 %v2936_v43, %v2910_v8  ;;  %vm2943_vm0 = vweird.f32 %v2922_v41 }
 0x7c3   : > { %v2950_v50 = vor.u32 1.1754944e-38, %v2949_v47  ;;  %vm2948_vm2 = vcmp.eq.f32.partialorder %v2947_v51, 8.507059e+37 }
 0x7c4   : > { %2991 = vmatmul.f32.vlgmr.msra.gmra.mxu3 %v2953_v44 }
 0x7c7   : > { %v4086_v14 = vpop.eup %4085 }
 0x7c8   : > { %v2939_v45 = vmul.f32 %v4086_v14, %v2922_v41  ;;  %vm2944_vm15 = vweird.f32 %v4086_v14 }
 0x7c9   : > { %vm2945_vm1 = vmor %vm2943_vm0, %vm2944_vm15 }
 0x7ca   : > { %v2940_v4 = vsub.f32 1.0, %v2939_v45 }
 0x7cc   : > { %v2941_v48 = vmul.f32 %v4086_v14, %v2940_v4 }
 0x7ce   : > { %v2942_v46 = vadd.f32 %v4086_v14, %v2941_v48 }
 0x7d0   : > { %v2946_v52 = vsel %vm2945_vm1, %v4086_v14, %v2942_v46 }
 0x7d1   : > { %v2951_v55 = vsel %vm2948_vm2, %v2950_v50, %v2946_v52 }
 0x7d2   : > { %v2954_v49 = vmul.f32 %v2951_v55, %v2913_v30 }
 0x7d4   : > { %2994 = vmatmul.f32.gmra.mxu3 %v2954_v49 }
 0x847   : > { %v2992_v57 = vpop.f32.mrf.mxu3 }
 0x848   : > { %v2993_v59 = vadd.f32 %v4038_v56, %v2992_v57 }
 0x84a   : > { %v2998_v15 = vadd.f32 %v4087_v60, %v2993_v59 }
 0x84c   : > { %3000 = vst [vmem:[#allocation2] sm:$0xff] %v2998_v15 }
 0x857   : > { %v2995_v61 = vpop.f32.mrf.mxu3 }
 0x858   : > { %v2996_v53 = vadd.f32 %v4038_v56, %v2995_v61  ;;  %3013 = sbr.rel (%p3726_p13) target bundleno = 2632 (0xa48), region = 236 }
 0x85a   : > { %v2999_v63 = vadd.f32 %v4088_v62, %v2996_v53 }
 0x85c   : > { %3001 = vst [vmem:[#allocation2 + $0x8] sm:$0xff] %v2999_v63 }
 0x85d   : > { %v3031_v0 = vld [vmem:[#allocation17 + $0x78] sm:$0xff]  ;;  %v3030_v1 = vld [vmem:[#allocation17 + $0x70] sm:$0xff]  ;;  %v3029_v3 = vld [vmem:[#allocation17 + $0x68] sm:$0xff] }
 0x85e   : > { %3070 = vmatpush.msra.mxu0 %v3031_v0  ;;  %3761 = vmatpush.msra.mxu3 %v3031_v0  ;;  %v3028_v54 = vld [vmem:[#allocation17 + $0x60] sm:$0xff]  ;;  %v3027_v18 = vld [vmem:[#allocation17 + $0x58] sm:$0xff]  ;;  %v3026_v5 = vld [vmem:[#allocation17 + $0x50] sm:$0xff] }
 0x85f   : > { %v3025_v7 = vld [vmem:[#allocation17 + $0x48] sm:$0xff]  ;;  %v3024_v58 = vld [vmem:[#allocation17 + $0x40] sm:$0xff]  ;;  %v3023_v9 = vld [vmem:[#allocation17 + $0x38] sm:$0xff] }
 0x860   : > { %3071 = vmatpush.msra.mxu0 %v3030_v1  ;;  %3762 = vmatpush.msra.mxu3 %v3030_v1  ;;  %v3022_v10 = vld [vmem:[#allocation17 + $0x30] sm:$0xff]  ;;  %v3021_v2 = vld [vmem:[#allocation17 + $0x28] sm:$0xff]  ;;  %v3020_v11 = vld [vmem:[#allocation17 + $0x20] sm:$0xff] }
 0x861   : > { %v3019_v12 = vld [vmem:[#allocation17 + $0x18] sm:$0xff]  ;;  %v3018_v13 = vld [vmem:[#allocation17 + $0x10] sm:$0xff]  ;;  %v3017_v16 = vld [vmem:[#allocation17 + $0x8] sm:$0xff] }
 0x862   : > { %3072 = vmatpush.msra.mxu0 %v3029_v3  ;;  %3763 = vmatpush.msra.mxu3 %v3029_v3  ;;  %v3016_v17 = vld [vmem:[#allocation17] sm:$0xff]  ;;  %v3014_v19 = vld [vmem:[#allocation2] sm:$0xff]  ;;  %v3048_v21 = vld [vmem:[#allocation18 + $0x78] sm:$0xff] }
 0x863   : > { %v3015_v20 = vld [vmem:[#allocation2 + $0x8] sm:$0xff]  ;;  %3136 = vmatpush.msra.mxu1 %v3048_v21  ;;  %v3047_v22 = vld [vmem:[#allocation18 + $0x70] sm:$0xff]  ;;  %v3046_v24 = vld [vmem:[#allocation18 + $0x68] sm:$0xff] }
 0x864   : > { %3073 = vmatpush.msra.mxu0 %v3028_v54  ;;  %3764 = vmatpush.msra.mxu3 %v3028_v54  ;;  %v3045_v6 = vld [vmem:[#allocation18 + $0x60] sm:$0xff]  ;;  %v3044_v25 = vld [vmem:[#allocation18 + $0x58] sm:$0xff]  ;;  %v3043_v26 = vld [vmem:[#allocation18 + $0x50] sm:$0xff] }
 0x865   : > { %3137 = vmatpush.msra.mxu1 %v3047_v22  ;;  %v3042_v8 = vld [vmem:[#allocation18 + $0x48] sm:$0xff]  ;;  %v3041_v23 = vld [vmem:[#allocation18 + $0x40] sm:$0xff]  ;;  %v3040_v27 = vld [vmem:[#allocation18 + $0x38] sm:$0xff] }
 0x866   : > { %3074 = vmatpush.msra.mxu0 %v3027_v18  ;;  %3765 = vmatpush.msra.mxu3 %v3027_v18  ;;  %v3039_v28 = vld [vmem:[#allocation18 + $0x30] sm:$0xff]  ;;  %v3038_v29 = vld [vmem:[#allocation18 + $0x28] sm:$0xff]  ;;  %v3037_v30 = vld [vmem:[#allocation18 + $0x20] sm:$0xff] }
 0x867   : > { %3138 = vmatpush.msra.mxu1 %v3046_v24  ;;  %v3036_v31 = vld [vmem:[#allocation18 + $0x18] sm:$0xff]  ;;  %v3035_v32 = vld [vmem:[#allocation18 + $0x10] sm:$0xff]  ;;  %v3034_v33 = vld [vmem:[#allocation18 + $0x8] sm:$0xff] }
 0x868   : > { %3075 = vmatpush.msra.mxu0 %v3026_v5  ;;  %3766 = vmatpush.msra.mxu3 %v3026_v5  ;;  %v4089_v34 = vld [vmem:[%s5770_s13] ss:$0 sm:$0xff]  ;;  %v3033_v35 = vld [vmem:[#allocation18] sm:$0xff]  ;;  %v3065_v54 = vld [vmem:[#allocation20 + $0x78] sm:$0xff] }
 0x869   : > { %3139 = vmatpush.msra.mxu1 %v3045_v6  ;;  %3202 = vmatpush.msra.mxu2 %v3065_v54  ;;  %v3064_v18 = vld [vmem:[#allocation20 + $0x70] sm:$0xff]  ;;  %v3063_v5 = vld [vmem:[#allocation20 + $0x68] sm:$0xff]  ;;  %v3050_v22 = vld [vmem:[#allocation20] sm:$0xff] }
 0x86a   : > { %3076 = vmatpush.msra.mxu0 %v3025_v7  ;;  %3767 = vmatpush.msra.mxu3 %v3025_v7  ;;  %v3062_v7 = vld [vmem:[#allocation20 + $0x60] sm:$0xff]  ;;  %v4090_v21 = vld [vmem:[%s5771_s1] ss:$0 sm:$0xff] }
 0x86b   : > { %3140 = vmatpush.msra.mxu1 %v3044_v25  ;;  %3203 = vmatpush.msra.mxu2 %v3064_v18 }
 0x86c   : > { %3077 = vmatpush.msra.mxu0 %v3024_v58  ;;  %3768 = vmatpush.msra.mxu3 %v3024_v58  ;;  %v3061_v58 = vld [vmem:[#allocation20 + $0x58] sm:$0xff] }
 0x86d   : > { %3141 = vmatpush.msra.mxu1 %v3043_v26  ;;  %3204 = vmatpush.msra.mxu2 %v3063_v5 }
 0x86e   : > { %3078 = vmatpush.msra.mxu0 %v3023_v9  ;;  %3769 = vmatpush.msra.mxu3 %v3023_v9  ;;  %v3060_v9 = vld [vmem:[#allocation20 + $0x50] sm:$0xff] }
 0x86f   : > { %3142 = vmatpush.msra.mxu1 %v3042_v8  ;;  %3205 = vmatpush.msra.mxu2 %v3062_v7 }
 0x870   : > { %3079 = vmatpush.msra.mxu0 %v3022_v10  ;;  %3770 = vmatpush.msra.mxu3 %v3022_v10  ;;  %v3059_v10 = vld [vmem:[#allocation20 + $0x48] sm:$0xff] }
 0x871   : > { %3143 = vmatpush.msra.mxu1 %v3041_v23  ;;  %3206 = vmatpush.msra.mxu2 %v3061_v58 }
 0x872   : > { %3080 = vmatpush.msra.mxu0 %v3021_v2  ;;  %3771 = vmatpush.msra.mxu3 %v3021_v2  ;;  %v3058_v2 = vld [vmem:[#allocation20 + $0x40] sm:$0xff] }
 0x873   : > { %3144 = vmatpush.msra.mxu1 %v3040_v27  ;;  %3207 = vmatpush.msra.mxu2 %v3060_v9 }
 0x874   : > { %3081 = vmatpush.msra.mxu0 %v3020_v11  ;;  %3772 = vmatpush.msra.mxu3 %v3020_v11  ;;  %v3057_v11 = vld [vmem:[#allocation20 + $0x38] sm:$0xff] }
 0x875   : > { %3145 = vmatpush.msra.mxu1 %v3039_v28  ;;  %3208 = vmatpush.msra.mxu2 %v3059_v10 }
 0x876   : > { %3082 = vmatpush.msra.mxu0 %v3019_v12  ;;  %3773 = vmatpush.msra.mxu3 %v3019_v12  ;;  %v3056_v12 = vld [vmem:[#allocation20 + $0x30] sm:$0xff] }
 0x877   : > { %3146 = vmatpush.msra.mxu1 %v3038_v29  ;;  %3209 = vmatpush.msra.mxu2 %v3058_v2 }
 0x878   : > { %3083 = vmatpush.msra.mxu0 %v3018_v13  ;;  %3774 = vmatpush.msra.mxu3 %v3018_v13  ;;  %v3055_v13 = vld [vmem:[#allocation20 + $0x28] sm:$0xff] }
 0x879   : > { %3147 = vmatpush.msra.mxu1 %v3037_v30  ;;  %3210 = vmatpush.msra.mxu2 %v3057_v11 }
 0x87a   : > { %3084 = vmatpush.msra.mxu0 %v3017_v16  ;;  %3775 = vmatpush.msra.mxu3 %v3017_v16  ;;  %v3054_v16 = vld [vmem:[#allocation20 + $0x20] sm:$0xff] }
 0x87b   : > { %3148 = vmatpush.msra.mxu1 %v3036_v31  ;;  %3211 = vmatpush.msra.mxu2 %v3056_v12 }
 0x87c   : > { %3085 = vmatpush.msra.mxu0 %v3016_v17  ;;  %3776 = vmatpush.msra.mxu3 %v3016_v17  ;;  %v3053_v17 = vld [vmem:[#allocation20 + $0x18] sm:$0xff] }
 0x87d   : > { %3086 = vmatmul.f32.vlgmr.msra.gmra.mxu0 %v3014_v19  ;;  %3089 = vmatmul.f32.vlgmr.msra.gmra.mxu3 %v3015_v20  ;;  %v3052_v19 = vld [vmem:[#allocation20 + $0x10] sm:$0xff]  ;;  %v3051_v20 = vld [vmem:[#allocation20 + $0x8] sm:$0xff] }
 0x87e   : > { %3149 = vmatpush.msra.mxu1 %v3035_v32  ;;  %3212 = vmatpush.msra.mxu2 %v3055_v13 }
 0x880   : > { %3150 = vmatpush.msra.mxu1 %v3034_v33  ;;  %3213 = vmatpush.msra.mxu2 %v3054_v16 }
 0x882   : > { %3151 = vmatpush.msra.mxu1 %v3033_v35  ;;  %3214 = vmatpush.msra.mxu2 %v3053_v17 }
 0x884   : > { %3215 = vmatpush.msra.mxu2 %v3052_v19 }
 0x886   : > { %3216 = vmatpush.msra.mxu2 %v3051_v20 }
 0x888   : > { %3217 = vmatpush.msra.mxu2 %v3050_v22 }
 0x8fa   : > { %v3087_v36 = vpop.f32.mrf.mxu0 }
 0x8fb   : > { %v3088_v37 = vadd.f32 %v4089_v34, %v3087_v36 }
 0x8fd   : > { %v3727_v38 = vmul.f32 -1.442695, %v3088_v37 }
 0x8ff   : > { %4092 = vpow2.f32 %v3727_v38 }
 0x900   : > { %v3090_v39 = vpop.f32.mrf.mxu3 }
 0x901   : > { %v3091_v40 = vadd.f32 %v4089_v34, %v3090_v39 }
 0x903   : > { %v3728_v41 = vmul.f32 -1.442695, %v3091_v40 }
 0x905   : > { %v4093_v42 = vpop.eup %4092  ;;  %4094 = vpow2.f32 %v3728_v41 }
 0x906   : > { %v3099_v43 = vadd.f32 1.0, %v4093_v42 }
 0x908   : > { %4096 = vrcp.f32 %v3099_v43  ;;  %v3112_v48 = vand.u32 2147483648, %v3099_v43  ;;  %v3110_v46 = vand.u32 2147483647, %v3099_v43  ;;  %vm3106_vm4 = vweird.f32 %v3099_v43 }
 0x90a   : > { %v3113_v49 = vor.u32 1.1754944e-38, %v3112_v48  ;;  %vm3111_vm6 = vcmp.eq.f32.partialorder %v3110_v46, 8.507059e+37 }
 0x90b   : > { %v4095_v44 = vpop.eup %4094 }
 0x90c   : > { %v3100_v14 = vadd.f32 1.0, %v4095_v44 }
 0x90e   : > { %v4097_v45 = vpop.eup %4096  ;;  %4098 = vrcp.f32 %v3100_v14  ;;  %v3127_v60 = vand.u32 2147483648, %v3100_v14  ;;  %v3125_v53 = vand.u32 2147483647, %v3100_v14  ;;  %vm3121_vm8 = vweird.f32 %v3100_v14 }
 0x90f   : > { %v3102_v4 = vmul.f32 %v4097_v45, %v3099_v43  ;;  %vm3107_vm3 = vweird.f32 %v4097_v45 }
 0x910   : > { %vm3108_vm5 = vmor %vm3106_vm4, %vm3107_vm3  ;;  %v3128_v63 = vor.u32 1.1754944e-38, %v3127_v60  ;;  %vm3126_vm10 = vcmp.eq.f32.partialorder %v3125_v53, 8.507059e+37 }
 0x911   : > { %v3103_v47 = vsub.f32 1.0, %v3102_v4 }
 0x913   : > { %v3104_v51 = vmul.f32 %v4097_v45, %v3103_v47 }
 0x914   : > { %v4099_v50 = vpop.eup %4098 }
 0x915   : > { %v3105_v52 = vadd.f32 %v4097_v45, %v3104_v51  ;;  %v3117_v55 = vmul.f32 %v4099_v50, %v3100_v14  ;;  %vm3122_vm7 = vweird.f32 %v4099_v50 }
 0x916   : > { %vm3123_vm9 = vmor %vm3121_vm8, %vm3122_vm7 }
 0x917   : > { %v3109_v56 = vsel %vm3108_vm5, %v4097_v45, %v3105_v52  ;;  %v3118_v57 = vsub.f32 1.0, %v3117_v55  ;;  %v4091_v52 = vld [vmem:[%s5772_s9] ss:$0 sm:$0xff] }
 0x918   : > { %v3114_v59 = vsel %vm3111_vm6, %v3113_v49, %v3109_v56 }
 0x919   : > { %v3131_v15 = vmul.f32 %v3114_v59, %v3088_v37  ;;  %v3119_v61 = vmul.f32 %v4099_v50, %v3118_v57 }
 0x91b   : > { %3152 = vmatmul.f32.vlgmr.msra.gmra.mxu1 %v3131_v15  ;;  %v3120_v62 = vadd.f32 %v4099_v50, %v3119_v61 }
 0x91d   : > { %v3124_v0 = vsel %vm3123_vm9, %v4099_v50, %v3120_v62 }
 0x91e   : > { %v3129_v1 = vsel %vm3126_vm10, %v3128_v63, %v3124_v0 }
 0x91f   : > { %v3132_v3 = vmul.f32 %v3129_v1, %v3091_v40 }
 0x923   : > { %3155 = vmatmul.f32.gmra.mxu1 %v3132_v3 }
 0x998   : > { %v3153_v24 = vpop.f32.mrf.mxu1 }
 0x999   : > { %v3154_v6 = vadd.f32 %v4090_v21, %v3153_v24 }
 0x99b   : > { %v3729_v25 = vmul.f32 -1.442695, %v3154_v6 }
 0x99d   : > { %4100 = vpow2.f32 %v3729_v25 }
 0x9a0   : > { %v3156_v26 = vpop.f32.mrf.mxu1 }
 0x9a1   : > { %v3157_v8 = vadd.f32 %v4090_v21, %v3156_v26 }
 0x9a3   : > { %v4101_v23 = vpop.eup %4100  ;;  %v3730_v27 = vmul.f32 -1.442695, %v3157_v8 }
 0x9a4   : > { %v3165_v28 = vadd.f32 1.0, %v4101_v23 }
 0x9a5   : > { %4102 = vpow2.f32 %v3730_v27 }
 0x9a6   : > { %4104 = vrcp.f32 %v3165_v28  ;;  %v3178_v34 = vand.u32 2147483648, %v3165_v28  ;;  %v3176_v36 = vand.u32 2147483647, %v3165_v28  ;;  %vm3172_vm12 = vweird.f32 %v3165_v28 }
 0x9a8   : > { %v3179_v39 = vor.u32 1.1754944e-38, %v3178_v34  ;;  %vm3177_vm14 = vcmp.eq.f32.partialorder %v3176_v36, 8.507059e+37 }
 0x9ab   : > { %v4103_v29 = vpop.eup %4102 }
 0x9ac   : > { %v4105_v30 = vpop.eup %4104  ;;  %v3166_v31 = vadd.f32 1.0, %v4103_v29 }
 0x9ad   : > { %v3168_v32 = vmul.f32 %v4105_v30, %v3165_v28  ;;  %vm3173_vm11 = vweird.f32 %v4105_v30 }
 0x9ae   : > { %4106 = vrcp.f32 %v3166_v31  ;;  %vm3174_vm13 = vmor %vm3172_vm12, %vm3173_vm11  ;;  %v3193_v14 = vand.u32 2147483648, %v3166_v31  ;;  %v3191_v4 = vand.u32 2147483647, %v3166_v31  ;;  %vm3187_vm0 = vweird.f32 %v3166_v31 }
 0x9af   : > { %v3169_v33 = vsub.f32 1.0, %v3168_v32 }
 0x9b0   : > { %v3194_v48 = vor.u32 1.1754944e-38, %v3193_v14  ;;  %vm3192_vm2 = vcmp.eq.f32.partialorder %v3191_v4, 8.507059e+37 }
 0x9b1   : > { %v3170_v35 = vmul.f32 %v4105_v30, %v3169_v33 }
 0x9b3   : > { %v3171_v37 = vadd.f32 %v4105_v30, %v3170_v35 }
 0x9b4   : > { %v4107_v38 = vpop.eup %4106 }
 0x9b5   : > { %v3175_v40 = vsel %vm3174_vm13, %v4105_v30, %v3171_v37  ;;  %v3183_v41 = vmul.f32 %v4107_v38, %v3166_v31  ;;  %vm3188_vm15 = vweird.f32 %v4107_v38 }
 0x9b6   : > { %v3180_v42 = vsel %vm3177_vm14, %v3179_v39, %v3175_v40  ;;  %vm3189_vm1 = vmor %vm3187_vm0, %vm3188_vm15 }
 0x9b7   : > { %v3197_v43 = vmul.f32 %v3180_v42, %v3154_v6  ;;  %v3184_v44 = vsub.f32 1.0, %v3183_v41 }
 0x9b9   : > { %3218 = vmatmul.f32.vlgmr.msra.gmra.mxu2 %v3197_v43  ;;  %v3185_v45 = vmul.f32 %v4107_v38, %v3184_v44 }
 0x9bb   : > { %v3186_v47 = vadd.f32 %v4107_v38, %v3185_v45 }
 0x9bd   : > { %v3190_v51 = vsel %vm3189_vm1, %v4107_v38, %v3186_v47 }
 0x9be   : > { %v3195_v46 = vsel %vm3192_vm2, %v3194_v48, %v3190_v51 }
 0x9bf   : > { %v3198_v50 = vmul.f32 %v3195_v46, %v3157_v8 }
 0x9c1   : > { %3221 = vmatmul.f32.gmra.mxu2 %v3198_v50 }
 0xa3c   : > { %v3219_v55 = vpop.f32.mrf.mxu2 }
 0xa3d   : > { %v3220_v49 = vadd.f32 %v4091_v52, %v3219_v55 }
 0xa3f   : > { %3225 = vst [vmem:[%s5218_s2] sm:$0xff] %v3220_v49 }
 0xa44   : > { %v3222_v56 = vpop.f32.mrf.mxu2 }
 0xa45   : > { %v3223_v57 = vadd.f32 %v4091_v52, %v3222_v56 }
 0xa47   : > { %3226 = vst [vmem:[%s5218_s2 + $0x8] sm:$0xff] %v3223_v57 }
 0xa48 PF: > { %s5773_s16 = sld [smem:[#allocation71_spill]] }
 0xa49   : > { %s5774_s15 = sld [smem:[#allocation65_spill]] }
 0xa4a   : > { %s5776_s18 = sld [smem:[#allocation74_spill]] }
 0xa4b   : > { %s5777_s22 = sld [smem:[#allocation69_spill]] }
 0xa4c   : > { %s5778_s23 = sld [smem:[#allocation70_spill]] }
 0xa4d   : > { %s5779_s26 = sld [smem:[#allocation72_spill]] }
 0xa4e   : > { %s90_s1 = sadd.s32 1, %s5773_s16   ;;  %s5775_s16 = sld [smem:[#allocation66_spill]] }
 0xa4f   : > { %p87_p1 = scmp.ge.s32.totalorder %s90_s1, 6   ;;  %s5780_s28 = sld [smem:[#allocation73_spill]] }
 0xa51   :  { %89 = sbr.rel (!%p87_p1) target bundleno = 88 (0x58), region = 389 }
 0xa56   :  { %3248 = vsyncpa [#allocation5], 1 }
 0xa57   :  { %3250 = vsyncpa [#allocation5 + $0x1], 1 }
 0xa58   :  { %3251 = vsyncpa [#allocation7], 1 }
 0xa59   :  { %3252 = vsyncpa [#allocation19], 1 }

</bundles_post_ra>
